<compile_context>
chip_gen: v6e
topology: v6e:2x2x1
jax: 0.10.0
libtpu: 0.0.40
codegen_flags: <defaults>
</compile_context>

<pallas_src>
import functools

import jax
import jax.numpy as jnp
from jax import lax
from jax.experimental import pallas as pl
from jax.experimental.pallas import tpu as pltpu

LANE = 128
BATCH_ALIGN = 16        # bf16 packed-tile (16 sublanes) alignment for per-step stores


def _round_up(n, m):
    return ((n + m - 1) // m) * m


def _vmem_limit_bytes():
    """Generation-aware scoped-VMEM limit (v7x: ~48 MiB; v5e/v6e: ~80 MiB)."""
    try:
        cap = int(pltpu.get_tpu_info().vmem_capacity_bytes)
    except Exception:
        cap = 128 * 1024 * 1024
    return min((cap * 3) // 4, 80 * 1024 * 1024)


def _pick_tile(dim, candidates):
    for c in candidates:
        if c <= dim and dim % c == 0:
            return c
    return dim


def _pick_time_tile(t, batch, max_rows):
    for c in (512, 256, 128, 64, 32, 16, 8, 4, 2, 1):
        if c <= t and t % c == 0 and c * batch <= max_rows:
            return c
    return 1


# --------------------------- QRNN layer kernel ------------------------------

def _qrnn_kernel(*refs, window, Tt, B):
    """One time-chunk of a QRNN layer.

    refs (window=2): x, w_cur, w_prev, b, out, h_s, fz_s, omf_s, o_s, xlast_s
    refs (window=1): x, w_cur,         b, out, h_s, fz_s, omf_s, o_s

    x_ref   : (Tt*B, Dp)   time-major rows (t major, batch minor), bf16
    w_*_ref : (Dp, 3*Hp)   bf16 gate weights (Z | F | O column blocks)
    b_ref   : (1, 3*Hp)    f32 gate bias
    out_ref : (Tt*B, Hp)   bf16
    h_s     : (B, Hp)      f32 persistent recurrent state (across grid steps)
    fz_s    : (Tt*B, Hp)   f32  f*z   (precomputed gates)
    omf_s   : (Tt*B, Hp)   f32  1-f
    o_s     : (Tt*B, Hp)   f32  o
    xlast_s : (B, Dp)      bf16 last timestep's x, carried across chunks (window=2)
    """
    if window == 2:
        (x_ref, wc_ref, wp_ref, b_ref, out_ref,
         h_s, fz_s, omf_s, o_s, xl_s) = refs
    else:
        (x_ref, wc_ref, b_ref, out_ref,
         h_s, fz_s, omf_s, o_s) = refs
        wp_ref = None
        xl_s = None

    Hp = out_ref.shape[-1]

    @pl.when(pl.program_id(0) == 0)
    def _init():
        h_s[...] = jnp.zeros_like(h_s)
        if window == 2:
            xl_s[...] = jnp.zeros_like(xl_s)

    # ---- per-gate matmul + activation (MXU/EUP), straight into VMEM scratch ----
    x = x_ref[...]                                                # (R, Dp) bf16
    if window == 2:
        if Tt > 1:
            x_prev = jnp.concatenate([xl_s[...], x[:(Tt - 1) * B, :]], axis=0)
        else:
            x_prev = xl_s[...]

    def gate(lo, hi):
        g = jnp.dot(x, wc_ref[:, lo:hi], preferred_element_type=jnp.float32)
        if window == 2:
            g = g + jnp.dot(x_prev, wp_ref[:, lo:hi],
                            preferred_element_type=jnp.float32)
        return g + b_ref[:, lo:hi]

    z = jnp.tanh(gate(0, Hp))
    f = jax.nn.sigmoid(gate(Hp, 2 * Hp))
    fz_s[...] = f * z
    omf_s[...] = 1.0 - f
    o_s[...] = jax.nn.sigmoid(gate(2 * Hp, 3 * Hp))
    if window == 2:
        xl_s[...] = x[(Tt - 1) * B:, :]                           # carry to next chunk

    # ---- sequential fo-pool: output gate + bf16 cast fused into the store ----
    if Tt <= 64:                                   # fully unrolled at trace time
        for t in range(Tt):
            r = slice(t * B, (t + 1) * B)
            h = fz_s[r, :] + omf_s[r, :] * h_s[...]
            h_s[...] = h
            out_ref[r, :] = (o_s[r, :] * h).astype(out_ref.dtype)
    else:
        def step(t, carry):
            r = pl.ds(pl.multiple_of(t * B, B), B)
            h = fz_s[r, :] + omf_s[r, :] * h_s[...]
            h_s[...] = h
            out_ref[r, :] = (o_s[r, :] * h).astype(out_ref.dtype)
            return carry
        lax.fori_loop(0, Tt, step, 0, unroll=8)


def qrnn_layer(x, w_cur, w_prev, b, *, batch, window, vmem_limit):
    """x: (T*batch, Dp) bf16 time-major rows -> (T*batch, Hp) bf16."""
    TB, Dp = x.shape
    T = TB // batch
    Hp = w_cur.shape[1] // 3

    # Generation-aware time-chunk size from the VMEM budget.
    budget = (vmem_limit * 3) // 4
    per_row = 4 * Dp + 4 * Hp + 12 * Hp          # x(db,bf16)+out(db,bf16)+fz/omf/o(f32)
    fixed = (window * Dp * 3 * Hp * 2 * 2        # gate weights (double-buffered bf16)
             + 3 * Hp * 4 * 2                    # bias
             + batch * Hp * 4                    # h_s
             + (batch * Dp * 2 if window == 2 else 0))
    max_rows = max(2 * batch, (budget - fixed) // per_row)
    max_rows = min(max_rows, 4096)
    Tt = _pick_time_tile(T, batch, max_rows)
    R = Tt * batch                               # rows per chunk (multiple of 16)

    kernel = functools.partial(_qrnn_kernel, window=window, Tt=Tt, B=batch)

    in_specs = [pl.BlockSpec((R, Dp), lambda c: (c, 0)),
                pl.BlockSpec((Dp, 3 * Hp), lambda c: (0, 0))]
    operands = [x, w_cur]
    if window == 2:
        in_specs.append(pl.BlockSpec((Dp, 3 * Hp), lambda c: (0, 0)))
        operands.append(w_prev)
    in_specs.append(pl.BlockSpec((1, 3 * Hp), lambda c: (0, 0)))
    operands.append(b)

    scratch = [pltpu.VMEM((batch, Hp), jnp.float32),   # h_s (persists across chunks)
               pltpu.VMEM((R, Hp), jnp.float32),       # f*z
               pltpu.VMEM((R, Hp), jnp.float32),       # 1-f
               pltpu.VMEM((R, Hp), jnp.float32)]       # o
    if window == 2:
        scratch.append(pltpu.VMEM((batch, Dp), jnp.bfloat16))   # x_{last} carry

    return pl.pallas_call(
        kernel,
        out_shape=jax.ShapeDtypeStruct((TB, Hp), jnp.bfloat16),
        grid=(T // Tt,),
        in_specs=in_specs,
        out_specs=pl.BlockSpec((R, Hp), lambda c: (c, 0)),
        scratch_shapes=scratch,
        compiler_params=pltpu.CompilerParams(
            dimension_semantics=("arbitrary",),          # sequential recurrence
            vmem_limit_bytes=int(vmem_limit)),
    )(*operands)


# ------------------------ tiled output projection ---------------------------

def _matmul_kernel(a_ref, b_ref, o_ref, acc_ref):
    @pl.when(pl.program_id(2) == 0)
    def _():
        acc_ref[...] = jnp.zeros_like(acc_ref)
    acc_ref[...] += jnp.dot(a_ref[...], b_ref[...],
                            preferred_element_type=jnp.float32)
    @pl.when(pl.program_id(2) == pl.num_programs(2) - 1)
    def _():
        o_ref[...] = acc_ref[...].astype(o_ref.dtype)


def output_projection(a, b, *, vmem_limit):
    """a: (M, K) bf16, b: (K, N) bf16 -> (M, N) f32.  Fused [Ws_share | Ws_i[lang]]."""
    M, K = a.shape
    N = b.shape[1]
    Mp = _round_up(M, 256)                          # keep tm >= 256 (MXU-native)
    if Mp != M:
        a = jnp.pad(a, ((0, Mp - M), (0, 0)))

    tm = _pick_tile(Mp, (512, 256))
    tn = _pick_tile(N, (2048, 1024, 512, 256, 128))
    tk = _pick_tile(K, (1024, 512, 256, 128))

    budget = (vmem_limit * 3) // 4

    def vmem_use(tm_, tn_, tk_):
        return (2 * tm_ * tk_ * 2 + 2 * tk_ * tn_ * 2   # double-buffered bf16 inputs
                + 2 * tm_ * tn_ * 4 + tm_ * tn_ * 4)    # double-buffered f32 out + acc

    while vmem_use(tm, tn, tk) > budget and tn > 256 and N % (tn // 2) == 0:
        tn //= 2
    while vmem_use(tm, tn, tk) > budget and tk > 256 and K % (tk // 2) == 0:
        tk //= 2
    while vmem_use(tm, tn, tk) > budget and tm > 128 and Mp % (tm // 2) == 0:
        tm //= 2

    out = pl.pallas_call(
        _matmul_kernel,
        out_shape=jax.ShapeDtypeStruct((Mp, N), jnp.float32),
        grid=(Mp // tm, N // tn, K // tk),
        in_specs=[pl.BlockSpec((tm, tk), lambda i, j, k: (i, k)),
                  pl.BlockSpec((tk, tn), lambda i, j, k: (k, j))],
        out_specs=pl.BlockSpec((tm, tn), lambda i, j, k: (i, j)),
        scratch_shapes=[pltpu.VMEM((tm, tn), jnp.float32)],
        compiler_params=pltpu.CompilerParams(
            dimension_semantics=("parallel", "parallel", "arbitrary"),
            vmem_limit_bytes=int(vmem_limit)),
    )(a, b)
    return out[:M] if Mp != M else out


# --------------------------- parameters (padded) ----------------------------

def _pad_gate_w(w, d_in, d_out, dp_in, hp_out):
    """(d_in, 3*d_out) [Z|F|O] -> zero-padded (dp_in, 3*hp_out) with 128-aligned gates."""
    out = jnp.zeros((dp_in, 3 * hp_out), jnp.float32)
    for gi in range(3):
        out = out.at[:d_in, gi * hp_out: gi * hp_out + d_out].set(
            w[:, gi * d_out:(gi + 1) * d_out])
    return out


def _pad_gate_b(bias, d_out, hp_out):
    out = jnp.zeros((1, 3 * hp_out), jnp.float32)
    for gi in range(3):
        out = out.at[0, gi * hp_out: gi * hp_out + d_out].set(
            bias[gi * d_out:(gi + 1) * d_out])
    return out


def init_params(key, n_layer, emb_size, h_size, max_word_idx, pad_id, v_sizes):
    assert emb_size == h_size  # required: Ws_share / Ws_i both consume ht[-1]
    ks = iter(jax.random.split(key, 2 + 2 * n_layer + len(v_sizes)))
    scale = 0.1
    Ep = _round_up(emb_size, LANE)
    Hp = _round_up(h_size, LANE)

    emb = scale * jax.random.normal(next(ks), (max_word_idx, emb_size), jnp.float32)
    emb = emb.at[pad_id].set(0.0)                       # nn.Embedding padding_idx row
    emb_p = (jnp.zeros((max_word_idx, Ep), jnp.float32)
             .at[:, :emb_size].set(emb).astype(jnp.bfloat16))

    qrnn_wc, qrnn_wp, qrnn_b = [], [], []
    for l in range(n_layer):
        d_in = emb_size if l == 0 else h_size
        d_out = h_size if l != n_layer - 1 else emb_size  # last layer -> emb_size
        dp_in = Ep if l == 0 else Hp
        hp_out = Hp if l != n_layer - 1 else Ep
        window = 2 if l == 0 else 1
        w = scale * jax.random.normal(next(ks), (window * d_in, 3 * d_out), jnp.float32)
        bias = 0.01 * jax.random.normal(next(ks), (3 * d_out,), jnp.float32)
        if window == 2:        # rows [0:d_in] -> x_{t-1},  rows [d_in:] -> x_t
            qrnn_wp.append(_pad_gate_w(w[:d_in], d_in, d_out, dp_in, hp_out)
                           .astype(jnp.bfloat16))
            w_cur = w[d_in:]
        else:
            qrnn_wp.append(None)
            w_cur = w
        qrnn_wc.append(_pad_gate_w(w_cur, d_in, d_out, dp_in, hp_out).astype(jnp.bfloat16))
        qrnn_b.append(_pad_gate_b(bias, d_out, hp_out))

    # pre-concatenated / pre-transposed / vocab-padded output weight, one per language
    ws_share = scale * jax.random.normal(next(ks), (1, emb_size), jnp.float32)
    w_out = []
    for v in v_sizes:
        ws_i = scale * jax.random.normal(next(ks), (v - 1, h_size), jnp.float32)
        wl = jnp.concatenate([ws_share, ws_i], axis=0).T          # (E, V)
        Vp = _round_up(v, 512)                                    # keep tn >= 512
        wl_p = (jnp.zeros((Ep, Vp), jnp.float32)
                .at[:emb_size, :v].set(wl).astype(jnp.bfloat16))
        w_out.append(wl_p)

    return dict(emb=emb_p, qrnn_wc=qrnn_wc, qrnn_wp=qrnn_wp, qrnn_b=qrnn_b, w_out=w_out)


# --------------------------------- forward ----------------------------------

def shared_language_model_forward(params, input_id, *, lang, v_sizes, pad_id):
    B, T = input_id.shape
    Bp = _round_up(B, BATCH_ALIGN)                     # bf16 packed-tile aligned batch
    Tp = _round_up(T, 32) if T > 32 else _round_up(T, 8)   # tileable time extent
    vmem_limit = _vmem_limit_bytes()

    # decode(): gather directly in (Tp, Bp, Ep) time-major order; batch/time padding
    # is applied to the cheap int32 index array (pad_id row of emb is zero), so no
    # separate transpose / pad passes over the big activation tensor.
    # TODO(synk): fold this gather into the first QRNN pallas_call via scalar prefetch.
    idx = jnp.transpose(input_id, (1, 0))              # (T, B)
    idx = jnp.pad(idx, ((0, Tp - T), (0, Bp - B)), constant_values=pad_id)
    x = params['emb'][idx]                             # (Tp, Bp, Ep) bf16
    h = x.reshape(Tp * Bp, -1)                         # (Tp*Bp, Ep) time-major rows

    for l in range(len(params['qrnn_wc'])):
        window = 2 if l == 0 else 1
        h = qrnn_layer(h, params['qrnn_wc'][l], params['qrnn_wp'][l],
                       params['qrnn_b'][l], batch=Bp, window=window,
                       vmem_limit=vmem_limit)
    # TODO(synk): RNNDropout / hidden_p dropout are eval-mode identity here.

    # score = cat([Ws_share(ht), Ws_i[lang](ht)], dim=2) == ht @ [Ws_share; Ws_i]^T
    score_p = output_projection(h, params['w_out'][lang], vmem_limit=vmem_limit)
    V = v_sizes[lang]
    score = score_p.reshape(Tp, Bp, -1)[:T, :B, :V]    # drop time/batch/vocab padding
    return jnp.transpose(score, (1, 0, 2))             # (B, T, V_size[lang])


# ----------------------------- pure-JAX reference ---------------------------

def reference_forward(params, input_id, *, lang, v_sizes):
    B, T = input_id.shape
    x = params['emb'][input_id]                        # (B, T, Ep) bf16
    h = jnp.transpose(x, (1, 0, 2))                    # (T, B, Ep) bf16
    for l in range(len(params['qrnn_wc'])):
        wc, wp, b = params['qrnn_wc'][l], params['qrnn_wp'][l], params['qrnn_b'][l]
        Hp = wc.shape[1] // 3
        g = jnp.einsum('tbd,dk->tbk', h, wc, preferred_element_type=jnp.float32)
        if wp is not None:
            hprev = jnp.concatenate([jnp.zeros_like(h[:1]), h[:-1]], axis=0)
            g = g + jnp.einsum('tbd,dk->tbk', hprev, wp,
                               preferred_element_type=jnp.float32)
        g = g + b
        z = jnp.tanh(g[..., :Hp])
        f = jax.nn.sigmoid(g[..., Hp:2 * Hp])
        o = jax.nn.sigmoid(g[..., 2 * Hp:])

        def step(h_c, fo):
            fz_t, omf_t = fo
            h_n = fz_t + omf_t * h_c
            return h_n, h_n

        _, hs = lax.scan(step, jnp.zeros((B, Hp), jnp.float32), (f * z, 1.0 - f))
        h = (o * hs).astype(jnp.bfloat16)
    a = h.reshape(T * B, -1)
    score_p = jnp.dot(a, params['w_out'][lang], preferred_element_type=jnp.float32)
    V = v_sizes[lang]
    return jnp.transpose(score_p.reshape(T, B, -1)[:, :, :V], (1, 0, 2))


# ----------------------------------- main ------------------------------------

if __name__ == "__main__":
    B, T = 2, 8
    emb_size = h_size = 32          # emb_size == h_size (required by the module wiring)
    n_layer = 2
    max_word_idx = 40               # input vocab size
    pad_id = 0                      # vocab2id_input[0]['<PAD>']
    v_sizes = (33, 17)              # V_size per output language
    lang = 0                        # Switch_Lang(0); Switch_fwdbkw -> one QRNN stack

    key = jax.random.PRNGKey(0)
    kp, kd = jax.random.split(key)
    params = init_params(kp, n_layer, emb_size, h_size, max_word_idx, pad_id, v_sizes)

    BOS_t_id = jax.random.randint(kd, (B, T), 1, max_word_idx, dtype=jnp.int32)
    BOS_t_id = BOS_t_id.at[1, T - 2:].set(pad_id)
    t_lengths = jnp.array([T, T - 2], dtype=jnp.int32)  # unused by forward (matches PyTorch)

    fwd = jax.jit(functools.partial(shared_language_model_forward,
                                    lang=lang, v_sizes=v_sizes, pad_id=pad_id))
    score = fwd(params, BOS_t_id)
    jax.block_until_ready(score)

    assert score.shape == (B, T, v_sizes[lang]), score.shape
    assert bool(jnp.all(jnp.isfinite(score)))

    ref = reference_forward(params, BOS_t_id, lang=lang, v_sizes=v_sizes)
    max_err = float(jnp.max(jnp.abs(score - ref)))
    assert bool(jnp.allclose(score, ref, rtol=5e-2, atol=1e-2)), max_err

    print("KERNEL_OK")
</pallas_src>

<mosaic_0001>
module attributes {stable_mosaic.version = 11 : i64} {
  func.func @_qrnn_kernel(%arg0: i32, %arg1: memref<128x128xbf16, #tpu.memory_space<vmem>>, %arg2: memref<128x384xbf16, #tpu.memory_space<vmem>>, %arg3: memref<128x384xbf16, #tpu.memory_space<vmem>>, %arg4: memref<1x384xf32, #tpu.memory_space<vmem>>, %arg5: memref<128x128xbf16, #tpu.memory_space<vmem>>, %arg6: memref<16x128xf32, #tpu.memory_space<vmem>>, %arg7: memref<128x128xf32, #tpu.memory_space<vmem>>, %arg8: memref<128x128xf32, #tpu.memory_space<vmem>>, %arg9: memref<128x128xf32, #tpu.memory_space<vmem>>, %arg10: memref<16x128xbf16, #tpu.memory_space<vmem>>) attributes {dimension_semantics = [#tpu.dimension_semantics<arbitrary>], iteration_bounds = array<i64: 1>, scalar_prefetch = 0 : i64, scratch_operands = 5 : i64, tpu.core_type = #tpu.core_type<tc>, window_params = [{transform_indices = @transform_0, window_bounds = array<i64: 128, 128>}, {pipeline_mode = #tpu.pipeline_mode<synchronous>, transform_indices = @transform_1, window_bounds = array<i64: 128, 384>}, {pipeline_mode = #tpu.pipeline_mode<synchronous>, transform_indices = @transform_2, window_bounds = array<i64: 128, 384>}, {pipeline_mode = #tpu.pipeline_mode<synchronous>, transform_indices = @transform_3, window_bounds = array<i64: 1, 384>}, {transform_indices = @transform_4, window_bounds = array<i64: 128, 128>}]} {
    %c0_i32 = arith.constant 0 : i32
    %0 = arith.cmpi eq, %arg0, %c0_i32 : i32
    %1 = arith.extui %0 : i1 to i32
    %c0_i32_0 = arith.constant 0 : i32
    %2 = arith.cmpi ne, %1, %c0_i32_0 : i32
    scf.if %2 {
      %cst_125 = arith.constant 0.000000e+00 : f32
      %130 = vector.broadcast %cst_125 : f32 to vector<16x128xf32>
      %c0_126 = arith.constant 0 : index
      %c0_127 = arith.constant 0 : index
      %131 = vector.load %arg6[%c0_126, %c0_127] : memref<16x128xf32, #tpu.memory_space<vmem>>, vector<16x128xf32>
      tpu.vector_store %arg6[%c0_126, %c0_127], %130 {strides = array<i32>} : memref<16x128xf32, #tpu.memory_space<vmem>>, vector<16x128xf32>,
      %cst_128 = arith.constant 0.000000e+00 : bf16
      %132 = vector.broadcast %cst_128 : bf16 to vector<16x128xbf16>
      %c0_129 = arith.constant 0 : index
      %c0_130 = arith.constant 0 : index
      %133 = vector.load %arg10[%c0_129, %c0_130] : memref<16x128xbf16, #tpu.memory_space<vmem>>, vector<16x128xbf16>
      tpu.vector_store %arg10[%c0_129, %c0_130], %132 {strides = array<i32>} : memref<16x128xbf16, #tpu.memory_space<vmem>>, vector<16x128xbf16>,
    } else {
    }
    %c0 = arith.constant 0 : index
    %c0_1 = arith.constant 0 : index
    %3 = vector.load %arg1[%c0, %c0_1] : memref<128x128xbf16, #tpu.memory_space<vmem>>, vector<128x128xbf16>
    %c0_2 = arith.constant 0 : index
    %c0_3 = arith.constant 0 : index
    %4 = vector.load %arg10[%c0_2, %c0_3] : memref<16x128xbf16, #tpu.memory_space<vmem>>, vector<16x128xbf16>
    %5 = vector.extract_strided_slice %3 {offsets = [0, 0], sizes = [112, 128], strides = [1, 1]} : vector<128x128xbf16> to vector<112x128xbf16>
    %6 = tpu.concatenate %4, %5 in 0 : vector<16x128xbf16>, vector<112x128xbf16> -> vector<128x128xbf16>
    %c0_4 = arith.constant 0 : index
    %c0_5 = arith.constant 0 : index
    %7 = vector.load %arg2[%c0_4, %c0_5] : memref<128x384xbf16, #tpu.memory_space<vmem>>, vector<128x128xbf16>
    %cst = arith.constant dense<0.000000e+00> : vector<128x128xf32>
    %8 = tpu.matmul %3, %7, %cst {dimension_numbers = #tpu.dot_dimension_numbers<[1], [0], [0], [1], [0, 0, 1, 1], [], []>} : vector<128x128xbf16>, vector<128x128xbf16>, vector<128x128xf32> -> vector<128x128xf32>
    %c0_6 = arith.constant 0 : index
    %c0_7 = arith.constant 0 : index
    %9 = vector.load %arg3[%c0_6, %c0_7] : memref<128x384xbf16, #tpu.memory_space<vmem>>, vector<128x128xbf16>
    %cst_8 = arith.constant dense<0.000000e+00> : vector<128x128xf32>
    %10 = tpu.matmul %6, %9, %cst_8 {dimension_numbers = #tpu.dot_dimension_numbers<[1], [0], [0], [1], [0, 0, 1, 1], [], []>} : vector<128x128xbf16>, vector<128x128xbf16>, vector<128x128xf32> -> vector<128x128xf32>
    %11 = arith.addf %8, %10 : vector<128x128xf32>
    %c0_9 = arith.constant 0 : index
    %c0_10 = arith.constant 0 : index
    %12 = vector.load %arg4[%c0_9, %c0_10] : memref<1x384xf32, #tpu.memory_space<vmem>>, vector<1x128xf32>
    %13 = vector.broadcast %12 : vector<1x128xf32> to vector<128x128xf32>
    %14 = arith.addf %11, %13 : vector<128x128xf32>
    %15 = math.tanh %14 : vector<128x128xf32>
    %c0_11 = arith.constant 0 : index
    %c128 = arith.constant 128 : index
    %16 = vector.load %arg2[%c0_11, %c128] : memref<128x384xbf16, #tpu.memory_space<vmem>>, vector<128x128xbf16>
    %cst_12 = arith.constant dense<0.000000e+00> : vector<128x128xf32>
    %17 = tpu.matmul %3, %16, %cst_12 {dimension_numbers = #tpu.dot_dimension_numbers<[1], [0], [0], [1], [0, 0, 1, 1], [], []>} : vector<128x128xbf16>, vector<128x128xbf16>, vector<128x128xf32> -> vector<128x128xf32>
    %c0_13 = arith.constant 0 : index
    %c128_14 = arith.constant 128 : index
    %18 = vector.load %arg3[%c0_13, %c128_14] : memref<128x384xbf16, #tpu.memory_space<vmem>>, vector<128x128xbf16>
    %cst_15 = arith.constant dense<0.000000e+00> : vector<128x128xf32>
    %19 = tpu.matmul %6, %18, %cst_15 {dimension_numbers = #tpu.dot_dimension_numbers<[1], [0], [0], [1], [0, 0, 1, 1], [], []>} : vector<128x128xbf16>, vector<128x128xbf16>, vector<128x128xf32> -> vector<128x128xf32>
    %20 = arith.addf %17, %19 : vector<128x128xf32>
    %c0_16 = arith.constant 0 : index
    %c128_17 = arith.constant 128 : index
    %21 = vector.load %arg4[%c0_16, %c128_17] : memref<1x384xf32, #tpu.memory_space<vmem>>, vector<1x128xf32>
    %22 = vector.broadcast %21 : vector<1x128xf32> to vector<128x128xf32>
    %23 = arith.addf %20, %22 : vector<128x128xf32>
    %24 = arith.negf %23 : vector<128x128xf32>
    %25 = math.exp %24 : vector<128x128xf32>
    %cst_18 = arith.constant 1.000000e+00 : f32
    %26 = vector.broadcast %cst_18 : f32 to vector<128x128xf32>
    %27 = arith.addf %26, %25 : vector<128x128xf32>
    %28 = arith.divf %26, %27 : vector<128x128xf32>
    %29 = arith.mulf %28, %15 : vector<128x128xf32>
    %c0_19 = arith.constant 0 : index
    %c0_20 = arith.constant 0 : index
    %30 = vector.load %arg7[%c0_19, %c0_20] : memref<128x128xf32, #tpu.memory_space<vmem>>, vector<128x128xf32>
    tpu.vector_store %arg7[%c0_19, %c0_20], %29 {strides = array<i32>} : memref<128x128xf32, #tpu.memory_space<vmem>>, vector<128x128xf32>,
    %cst_21 = arith.constant 1.000000e+00 : f32
    %31 = vector.broadcast %cst_21 : f32 to vector<128x128xf32>
    %32 = arith.subf %31, %28 : vector<128x128xf32>
    %c0_22 = arith.constant 0 : index
    %c0_23 = arith.constant 0 : index
    %33 = vector.load %arg8[%c0_22, %c0_23] : memref<128x128xf32, #tpu.memory_space<vmem>>, vector<128x128xf32>
    tpu.vector_store %arg8[%c0_22, %c0_23], %32 {strides = array<i32>} : memref<128x128xf32, #tpu.memory_space<vmem>>, vector<128x128xf32>,
    %c0_24 = arith.constant 0 : index
    %c256 = arith.constant 256 : index
    %34 = vector.load %arg2[%c0_24, %c256] : memref<128x384xbf16, #tpu.memory_space<vmem>>, vector<128x128xbf16>
    %cst_25 = arith.constant dense<0.000000e+00> : vector<128x128xf32>
    %35 = tpu.matmul %3, %34, %cst_25 {dimension_numbers = #tpu.dot_dimension_numbers<[1], [0], [0], [1], [0, 0, 1, 1], [], []>} : vector<128x128xbf16>, vector<128x128xbf16>, vector<128x128xf32> -> vector<128x128xf32>
    %c0_26 = arith.constant 0 : index
    %c256_27 = arith.constant 256 : index
    %36 = vector.load %arg3[%c0_26, %c256_27] : memref<128x384xbf16, #tpu.memory_space<vmem>>, vector<128x128xbf16>
    %cst_28 = arith.constant dense<0.000000e+00> : vector<128x128xf32>
    %37 = tpu.matmul %6, %36, %cst_28 {dimension_numbers = #tpu.dot_dimension_numbers<[1], [0], [0], [1], [0, 0, 1, 1], [], []>} : vector<128x128xbf16>, vector<128x128xbf16>, vector<128x128xf32> -> vector<128x128xf32>
    %38 = arith.addf %35, %37 : vector<128x128xf32>
    %c0_29 = arith.constant 0 : index
    %c256_30 = arith.constant 256 : index
    %39 = vector.load %arg4[%c0_29, %c256_30] : memref<1x384xf32, #tpu.memory_space<vmem>>, vector<1x128xf32>
    %40 = vector.broadcast %39 : vector<1x128xf32> to vector<128x128xf32>
    %41 = arith.addf %38, %40 : vector<128x128xf32>
    %42 = arith.negf %41 : vector<128x128xf32>
    %43 = math.exp %42 : vector<128x128xf32>
    %cst_31 = arith.constant 1.000000e+00 : f32
    %44 = vector.broadcast %cst_31 : f32 to vector<128x128xf32>
    %45 = arith.addf %44, %43 : vector<128x128xf32>
    %46 = arith.divf %44, %45 : vector<128x128xf32>
    %c0_32 = arith.constant 0 : index
    %c0_33 = arith.constant 0 : index
    %47 = vector.load %arg9[%c0_32, %c0_33] : memref<128x128xf32, #tpu.memory_space<vmem>>, vector<128x128xf32>
    tpu.vector_store %arg9[%c0_32, %c0_33], %46 {strides = array<i32>} : memref<128x128xf32, #tpu.memory_space<vmem>>, vector<128x128xf32>,
    %48 = vector.extract_strided_slice %3 {offsets = [112, 0], sizes = [16, 128], strides = [1, 1]} : vector<128x128xbf16> to vector<16x128xbf16>
    %c0_34 = arith.constant 0 : index
    %c0_35 = arith.constant 0 : index
    %49 = vector.load %arg10[%c0_34, %c0_35] : memref<16x128xbf16, #tpu.memory_space<vmem>>, vector<16x128xbf16>
    tpu.vector_store %arg10[%c0_34, %c0_35], %48 {strides = array<i32>} : memref<16x128xbf16, #tpu.memory_space<vmem>>, vector<16x128xbf16>,
    %c0_36 = arith.constant 0 : index
    %c0_37 = arith.constant 0 : index
    %50 = vector.load %arg7[%c0_36, %c0_37] : memref<128x128xf32, #tpu.memory_space<vmem>>, vector<16x128xf32>
    %c0_38 = arith.constant 0 : index
    %c0_39 = arith.constant 0 : index
    %51 = vector.load %arg8[%c0_38, %c0_39] : memref<128x128xf32, #tpu.memory_space<vmem>>, vector<16x128xf32>
    %c0_40 = arith.constant 0 : index
    %c0_41 = arith.constant 0 : index
    %52 = vector.load %arg6[%c0_40, %c0_41] : memref<16x128xf32, #tpu.memory_space<vmem>>, vector<16x128xf32>
    %53 = arith.mulf %51, %52 : vector<16x128xf32>
    %54 = arith.addf %50, %53 : vector<16x128xf32>
    %c0_42 = arith.constant 0 : index
    %c0_43 = arith.constant 0 : index
    %55 = vector.load %arg6[%c0_42, %c0_43] : memref<16x128xf32, #tpu.memory_space<vmem>>, vector<16x128xf32>
    tpu.vector_store %arg6[%c0_42, %c0_43], %54 {strides = array<i32>} : memref<16x128xf32, #tpu.memory_space<vmem>>, vector<16x128xf32>,
    %c0_44 = arith.constant 0 : index
    %c0_45 = arith.constant 0 : index
    %56 = vector.load %arg9[%c0_44, %c0_45] : memref<128x128xf32, #tpu.memory_space<vmem>>, vector<16x128xf32>
    %57 = arith.mulf %56, %54 : vector<16x128xf32>
    %58 = arith.truncf %57 : vector<16x128xf32> to vector<16x128xbf16>
    %c0_46 = arith.constant 0 : index
    %c0_47 = arith.constant 0 : index
    %59 = vector.load %arg5[%c0_46, %c0_47] : memref<128x128xbf16, #tpu.memory_space<vmem>>, vector<16x128xbf16>
    tpu.vector_store %arg5[%c0_46, %c0_47], %58 {strides = array<i32>} : memref<128x128xbf16, #tpu.memory_space<vmem>>, vector<16x128xbf16>,
    %c16 = arith.constant 16 : index
    %c0_48 = arith.constant 0 : index
    %60 = vector.load %arg7[%c16, %c0_48] : memref<128x128xf32, #tpu.memory_space<vmem>>, vector<16x128xf32>
    %c16_49 = arith.constant 16 : index
    %c0_50 = arith.constant 0 : index
    %61 = vector.load %arg8[%c16_49, %c0_50] : memref<128x128xf32, #tpu.memory_space<vmem>>, vector<16x128xf32>
    %c0_51 = arith.constant 0 : index
    %c0_52 = arith.constant 0 : index
    %62 = vector.load %arg6[%c0_51, %c0_52] : memref<16x128xf32, #tpu.memory_space<vmem>>, vector<16x128xf32>
    %63 = arith.mulf %61, %62 : vector<16x128xf32>
    %64 = arith.addf %60, %63 : vector<16x128xf32>
    %c0_53 = arith.constant 0 : index
    %c0_54 = arith.constant 0 : index
    %65 = vector.load %arg6[%c0_53, %c0_54] : memref<16x128xf32, #tpu.memory_space<vmem>>, vector<16x128xf32>
    tpu.vector_store %arg6[%c0_53, %c0_54], %64 {strides = array<i32>} : memref<16x128xf32, #tpu.memory_space<vmem>>, vector<16x128xf32>,
    %c16_55 = arith.constant 16 : index
    %c0_56 = arith.constant 0 : index
    %66 = vector.load %arg9[%c16_55, %c0_56] : memref<128x128xf32, #tpu.memory_space<vmem>>, vector<16x128xf32>
    %67 = arith.mulf %66, %64 : vector<16x128xf32>
    %68 = arith.truncf %67 : vector<16x128xf32> to vector<16x128xbf16>
    %c16_57 = arith.constant 16 : index
    %c0_58 = arith.constant 0 : index
    %69 = vector.load %arg5[%c16_57, %c0_58] : memref<128x128xbf16, #tpu.memory_space<vmem>>, vector<16x128xbf16>
    tpu.vector_store %arg5[%c16_57, %c0_58], %68 {strides = array<i32>} : memref<128x128xbf16, #tpu.memory_space<vmem>>, vector<16x128xbf16>,
    %c32 = arith.constant 32 : index
    %c0_59 = arith.constant 0 : index
    %70 = vector.load %arg7[%c32, %c0_59] : memref<128x128xf32, #tpu.memory_space<vmem>>, vector<16x128xf32>
    %c32_60 = arith.constant 32 : index
    %c0_61 = arith.constant 0 : index
    %71 = vector.load %arg8[%c32_60, %c0_61] : memref<128x128xf32, #tpu.memory_space<vmem>>, vector<16x128xf32>
    %c0_62 = arith.constant 0 : index
    %c0_63 = arith.constant 0 : index
    %72 = vector.load %arg6[%c0_62, %c0_63] : memref<16x128xf32, #tpu.memory_space<vmem>>, vector<16x128xf32>
    %73 = arith.mulf %71, %72 : vector<16x128xf32>
    %74 = arith.addf %70, %73 : vector<16x128xf32>
    %c0_64 = arith.constant 0 : index
    %c0_65 = arith.constant 0 : index
    %75 = vector.load %arg6[%c0_64, %c0_65] : memref<16x128xf32, #tpu.memory_space<vmem>>, vector<16x128xf32>
    tpu.vector_store %arg6[%c0_64, %c0_65], %74 {strides = array<i32>} : memref<16x128xf32, #tpu.memory_space<vmem>>, vector<16x128xf32>,
    %c32_66 = arith.constant 32 : index
    %c0_67 = arith.constant 0 : index
    %76 = vector.load %arg9[%c32_66, %c0_67] : memref<128x128xf32, #tpu.memory_space<vmem>>, vector<16x128xf32>
    %77 = arith.mulf %76, %74 : vector<16x128xf32>
    %78 = arith.truncf %77 : vector<16x128xf32> to vector<16x128xbf16>
    %c32_68 = arith.constant 32 : index
    %c0_69 = arith.constant 0 : index
    %79 = vector.load %arg5[%c32_68, %c0_69] : memref<128x128xbf16, #tpu.memory_space<vmem>>, vector<16x128xbf16>
    tpu.vector_store %arg5[%c32_68, %c0_69], %78 {strides = array<i32>} : memref<128x128xbf16, #tpu.memory_space<vmem>>, vector<16x128xbf16>,
    %c48 = arith.constant 48 : index
    %c0_70 = arith.constant 0 : index
    %80 = vector.load %arg7[%c48, %c0_70] : memref<128x128xf32, #tpu.memory_space<vmem>>, vector<16x128xf32>
    %c48_71 = arith.constant 48 : index
    %c0_72 = arith.constant 0 : index
    %81 = vector.load %arg8[%c48_71, %c0_72] : memref<128x128xf32, #tpu.memory_space<vmem>>, vector<16x128xf32>
    %c0_73 = arith.constant 0 : index
    %c0_74 = arith.constant 0 : index
    %82 = vector.load %arg6[%c0_73, %c0_74] : memref<16x128xf32, #tpu.memory_space<vmem>>, vector<16x128xf32>
    %83 = arith.mulf %81, %82 : vector<16x128xf32>
    %84 = arith.addf %80, %83 : vector<16x128xf32>
    %c0_75 = arith.constant 0 : index
    %c0_76 = arith.constant 0 : index
    %85 = vector.load %arg6[%c0_75, %c0_76] : memref<16x128xf32, #tpu.memory_space<vmem>>, vector<16x128xf32>
    tpu.vector_store %arg6[%c0_75, %c0_76], %84 {strides = array<i32>} : memref<16x128xf32, #tpu.memory_space<vmem>>, vector<16x128xf32>,
    %c48_77 = arith.constant 48 : index
    %c0_78 = arith.constant 0 : index
    %86 = vector.load %arg9[%c48_77, %c0_78] : memref<128x128xf32, #tpu.memory_space<vmem>>, vector<16x128xf32>
    %87 = arith.mulf %86, %84 : vector<16x128xf32>
    %88 = arith.truncf %87 : vector<16x128xf32> to vector<16x128xbf16>
    %c48_79 = arith.constant 48 : index
    %c0_80 = arith.constant 0 : index
    %89 = vector.load %arg5[%c48_79, %c0_80] : memref<128x128xbf16, #tpu.memory_space<vmem>>, vector<16x128xbf16>
    tpu.vector_store %arg5[%c48_79, %c0_80], %88 {strides = array<i32>} : memref<128x128xbf16, #tpu.memory_space<vmem>>, vector<16x128xbf16>,
    %c64 = arith.constant 64 : index
    %c0_81 = arith.constant 0 : index
    %90 = vector.load %arg7[%c64, %c0_81] : memref<128x128xf32, #tpu.memory_space<vmem>>, vector<16x128xf32>
    %c64_82 = arith.constant 64 : index
    %c0_83 = arith.constant 0 : index
    %91 = vector.load %arg8[%c64_82, %c0_83] : memref<128x128xf32, #tpu.memory_space<vmem>>, vector<16x128xf32>
    %c0_84 = arith.constant 0 : index
    %c0_85 = arith.constant 0 : index
    %92 = vector.load %arg6[%c0_84, %c0_85] : memref<16x128xf32, #tpu.memory_space<vmem>>, vector<16x128xf32>
    %93 = arith.mulf %91, %92 : vector<16x128xf32>
    %94 = arith.addf %90, %93 : vector<16x128xf32>
    %c0_86 = arith.constant 0 : index
    %c0_87 = arith.constant 0 : index
    %95 = vector.load %arg6[%c0_86, %c0_87] : memref<16x128xf32, #tpu.memory_space<vmem>>, vector<16x128xf32>
    tpu.vector_store %arg6[%c0_86, %c0_87], %94 {strides = array<i32>} : memref<16x128xf32, #tpu.memory_space<vmem>>, vector<16x128xf32>,
    %c64_88 = arith.constant 64 : index
    %c0_89 = arith.constant 0 : index
    %96 = vector.load %arg9[%c64_88, %c0_89] : memref<128x128xf32, #tpu.memory_space<vmem>>, vector<16x128xf32>
    %97 = arith.mulf %96, %94 : vector<16x128xf32>
    %98 = arith.truncf %97 : vector<16x128xf32> to vector<16x128xbf16>
    %c64_90 = arith.constant 64 : index
    %c0_91 = arith.constant 0 : index
    %99 = vector.load %arg5[%c64_90, %c0_91] : memref<128x128xbf16, #tpu.memory_space<vmem>>, vector<16x128xbf16>
    tpu.vector_store %arg5[%c64_90, %c0_91], %98 {strides = array<i32>} : memref<128x128xbf16, #tpu.memory_space<vmem>>, vector<16x128xbf16>,
    %c80 = arith.constant 80 : index
    %c0_92 = arith.constant 0 : index
    %100 = vector.load %arg7[%c80, %c0_92] : memref<128x128xf32, #tpu.memory_space<vmem>>, vector<16x128xf32>
    %c80_93 = arith.constant 80 : index
    %c0_94 = arith.constant 0 : index
    %101 = vector.load %arg8[%c80_93, %c0_94] : memref<128x128xf32, #tpu.memory_space<vmem>>, vector<16x128xf32>
    %c0_95 = arith.constant 0 : index
    %c0_96 = arith.constant 0 : index
    %102 = vector.load %arg6[%c0_95, %c0_96] : memref<16x128xf32, #tpu.memory_space<vmem>>, vector<16x128xf32>
    %103 = arith.mulf %101, %102 : vector<16x128xf32>
    %104 = arith.addf %100, %103 : vector<16x128xf32>
    %c0_97 = arith.constant 0 : index
    %c0_98 = arith.constant 0 : index
    %105 = vector.load %arg6[%c0_97, %c0_98] : memref<16x128xf32, #tpu.memory_space<vmem>>, vector<16x128xf32>
    tpu.vector_store %arg6[%c0_97, %c0_98], %104 {strides = array<i32>} : memref<16x128xf32, #tpu.memory_space<vmem>>, vector<16x128xf32>,
    %c80_99 = arith.constant 80 : index
    %c0_100 = arith.constant 0 : index
    %106 = vector.load %arg9[%c80_99, %c0_100] : memref<128x128xf32, #tpu.memory_space<vmem>>, vector<16x128xf32>
    %107 = arith.mulf %106, %104 : vector<16x128xf32>
    %108 = arith.truncf %107 : vector<16x128xf32> to vector<16x128xbf16>
    %c80_101 = arith.constant 80 : index
    %c0_102 = arith.constant 0 : index
    %109 = vector.load %arg5[%c80_101, %c0_102] : memref<128x128xbf16, #tpu.memory_space<vmem>>, vector<16x128xbf16>
    tpu.vector_store %arg5[%c80_101, %c0_102], %108 {strides = array<i32>} : memref<128x128xbf16, #tpu.memory_space<vmem>>, vector<16x128xbf16>,
    %c96 = arith.constant 96 : index
    %c0_103 = arith.constant 0 : index
    %110 = vector.load %arg7[%c96, %c0_103] : memref<128x128xf32, #tpu.memory_space<vmem>>, vector<16x128xf32>
    %c96_104 = arith.constant 96 : index
    %c0_105 = arith.constant 0 : index
    %111 = vector.load %arg8[%c96_104, %c0_105] : memref<128x128xf32, #tpu.memory_space<vmem>>, vector<16x128xf32>
    %c0_106 = arith.constant 0 : index
    %c0_107 = arith.constant 0 : index
    %112 = vector.load %arg6[%c0_106, %c0_107] : memref<16x128xf32, #tpu.memory_space<vmem>>, vector<16x128xf32>
    %113 = arith.mulf %111, %112 : vector<16x128xf32>
    %114 = arith.addf %110, %113 : vector<16x128xf32>
    %c0_108 = arith.constant 0 : index
    %c0_109 = arith.constant 0 : index
    %115 = vector.load %arg6[%c0_108, %c0_109] : memref<16x128xf32, #tpu.memory_space<vmem>>, vector<16x128xf32>
    tpu.vector_store %arg6[%c0_108, %c0_109], %114 {strides = array<i32>} : memref<16x128xf32, #tpu.memory_space<vmem>>, vector<16x128xf32>,
    %c96_110 = arith.constant 96 : index
    %c0_111 = arith.constant 0 : index
    %116 = vector.load %arg9[%c96_110, %c0_111] : memref<128x128xf32, #tpu.memory_space<vmem>>, vector<16x128xf32>
    %117 = arith.mulf %116, %114 : vector<16x128xf32>
    %118 = arith.truncf %117 : vector<16x128xf32> to vector<16x128xbf16>
    %c96_112 = arith.constant 96 : index
    %c0_113 = arith.constant 0 : index
    %119 = vector.load %arg5[%c96_112, %c0_113] : memref<128x128xbf16, #tpu.memory_space<vmem>>, vector<16x128xbf16>
    tpu.vector_store %arg5[%c96_112, %c0_113], %118 {strides = array<i32>} : memref<128x128xbf16, #tpu.memory_space<vmem>>, vector<16x128xbf16>,
    %c112 = arith.constant 112 : index
    %c0_114 = arith.constant 0 : index
    %120 = vector.load %arg7[%c112, %c0_114] : memref<128x128xf32, #tpu.memory_space<vmem>>, vector<16x128xf32>
    %c112_115 = arith.constant 112 : index
    %c0_116 = arith.constant 0 : index
    %121 = vector.load %arg8[%c112_115, %c0_116] : memref<128x128xf32, #tpu.memory_space<vmem>>, vector<16x128xf32>
    %c0_117 = arith.constant 0 : index
    %c0_118 = arith.constant 0 : index
    %122 = vector.load %arg6[%c0_117, %c0_118] : memref<16x128xf32, #tpu.memory_space<vmem>>, vector<16x128xf32>
    %123 = arith.mulf %121, %122 : vector<16x128xf32>
    %124 = arith.addf %120, %123 : vector<16x128xf32>
    %c0_119 = arith.constant 0 : index
    %c0_120 = arith.constant 0 : index
    %125 = vector.load %arg6[%c0_119, %c0_120] : memref<16x128xf32, #tpu.memory_space<vmem>>, vector<16x128xf32>
    tpu.vector_store %arg6[%c0_119, %c0_120], %124 {strides = array<i32>} : memref<16x128xf32, #tpu.memory_space<vmem>>, vector<16x128xf32>,
    %c112_121 = arith.constant 112 : index
    %c0_122 = arith.constant 0 : index
    %126 = vector.load %arg9[%c112_121, %c0_122] : memref<128x128xf32, #tpu.memory_space<vmem>>, vector<16x128xf32>
    %127 = arith.mulf %126, %124 : vector<16x128xf32>
    %128 = arith.truncf %127 : vector<16x128xf32> to vector<16x128xbf16>
    %c112_123 = arith.constant 112 : index
    %c0_124 = arith.constant 0 : index
    %129 = vector.load %arg5[%c112_123, %c0_124] : memref<128x128xbf16, #tpu.memory_space<vmem>>, vector<16x128xbf16>
    tpu.vector_store %arg5[%c112_123, %c0_124], %128 {strides = array<i32>} : memref<128x128xbf16, #tpu.memory_space<vmem>>, vector<16x128xbf16>,
    return
  }
  func.func @transform_0(%arg0: i32) -> (i32, i32) {
    %c0_i32 = arith.constant 0 : i32
    %c0_i32_0 = arith.constant 0 : i32
    return %arg0, %c0_i32 : i32, i32
  }
  func.func @transform_1(%arg0: i32) -> (i32, i32) {
    %c0_i32 = arith.constant 0 : i32
    %c0_i32_0 = arith.constant 0 : i32
    %c0_i32_1 = arith.constant 0 : i32
    return %c0_i32, %c0_i32_0 : i32, i32
  }
  func.func @transform_2(%arg0: i32) -> (i32, i32) {
    %c0_i32 = arith.constant 0 : i32
    %c0_i32_0 = arith.constant 0 : i32
    %c0_i32_1 = arith.constant 0 : i32
    return %c0_i32, %c0_i32_0 : i32, i32
  }
  func.func @transform_3(%arg0: i32) -> (i32, i32) {
    %c0_i32 = arith.constant 0 : i32
    %c0_i32_0 = arith.constant 0 : i32
    %c0_i32_1 = arith.constant 0 : i32
    return %c0_i32, %c0_i32_0 : i32, i32
  }
  func.func @transform_4(%arg0: i32) -> (i32, i32) {
    %c0_i32 = arith.constant 0 : i32
    %c0_i32_0 = arith.constant 0 : i32
    return %arg0, %c0_i32 : i32, i32
  }
}

module attributes {stable_mosaic.version = 11 : i64} {
  func.func @_qrnn_kernel(%arg0: i32, %arg1: memref<128x128xbf16, #tpu.memory_space<vmem>>, %arg2: memref<128x384xbf16, #tpu.memory_space<vmem>>, %arg3: memref<1x384xf32, #tpu.memory_space<vmem>>, %arg4: memref<128x128xbf16, #tpu.memory_space<vmem>>, %arg5: memref<16x128xf32, #tpu.memory_space<vmem>>, %arg6: memref<128x128xf32, #tpu.memory_space<vmem>>, %arg7: memref<128x128xf32, #tpu.memory_space<vmem>>, %arg8: memref<128x128xf32, #tpu.memory_space<vmem>>) attributes {dimension_semantics = [#tpu.dimension_semantics<arbitrary>], iteration_bounds = array<i64: 1>, scalar_prefetch = 0 : i64, scratch_operands = 4 : i64, tpu.core_type = #tpu.core_type<tc>, window_params = [{transform_indices = @transform_0, window_bounds = array<i64: 128, 128>}, {pipeline_mode = #tpu.pipeline_mode<synchronous>, transform_indices = @transform_1, window_bounds = array<i64: 128, 384>}, {pipeline_mode = #tpu.pipeline_mode<synchronous>, transform_indices = @transform_2, window_bounds = array<i64: 1, 384>}, {transform_indices = @transform_3, window_bounds = array<i64: 128, 128>}]} {
    %c0_i32 = arith.constant 0 : i32
    %0 = arith.cmpi eq, %arg0, %c0_i32 : i32
    %1 = arith.extui %0 : i1 to i32
    %c0_i32_0 = arith.constant 0 : i32
    %2 = arith.cmpi ne, %1, %c0_i32_0 : i32
    scf.if %2 {
      %cst_112 = arith.constant 0.000000e+00 : f32
      %116 = vector.broadcast %cst_112 : f32 to vector<16x128xf32>
      %c0_113 = arith.constant 0 : index
      %c0_114 = arith.constant 0 : index
      %117 = vector.load %arg5[%c0_113, %c0_114] : memref<16x128xf32, #tpu.memory_space<vmem>>, vector<16x128xf32>
      tpu.vector_store %arg5[%c0_113, %c0_114], %116 {strides = array<i32>} : memref<16x128xf32, #tpu.memory_space<vmem>>, vector<16x128xf32>,
    } else {
    }
    %c0 = arith.constant 0 : index
    %c0_1 = arith.constant 0 : index
    %3 = vector.load %arg1[%c0, %c0_1] : memref<128x128xbf16, #tpu.memory_space<vmem>>, vector<128x128xbf16>
    %c0_2 = arith.constant 0 : index
    %c0_3 = arith.constant 0 : index
    %4 = vector.load %arg2[%c0_2, %c0_3] : memref<128x384xbf16, #tpu.memory_space<vmem>>, vector<128x128xbf16>
    %cst = arith.constant dense<0.000000e+00> : vector<128x128xf32>
    %5 = tpu.matmul %3, %4, %cst {dimension_numbers = #tpu.dot_dimension_numbers<[1], [0], [0], [1], [0, 0, 1, 1], [], []>} : vector<128x128xbf16>, vector<128x128xbf16>, vector<128x128xf32> -> vector<128x128xf32>
    %c0_4 = arith.constant 0 : index
    %c0_5 = arith.constant 0 : index
    %6 = vector.load %arg3[%c0_4, %c0_5] : memref<1x384xf32, #tpu.memory_space<vmem>>, vector<1x128xf32>
    %7 = vector.broadcast %6 : vector<1x128xf32> to vector<128x128xf32>
    %8 = arith.addf %5, %7 : vector<128x128xf32>
    %9 = math.tanh %8 : vector<128x128xf32>
    %c0_6 = arith.constant 0 : index
    %c128 = arith.constant 128 : index
    %10 = vector.load %arg2[%c0_6, %c128] : memref<128x384xbf16, #tpu.memory_space<vmem>>, vector<128x128xbf16>
    %cst_7 = arith.constant dense<0.000000e+00> : vector<128x128xf32>
    %11 = tpu.matmul %3, %10, %cst_7 {dimension_numbers = #tpu.dot_dimension_numbers<[1], [0], [0], [1], [0, 0, 1, 1], [], []>} : vector<128x128xbf16>, vector<128x128xbf16>, vector<128x128xf32> -> vector<128x128xf32>
    %c0_8 = arith.constant 0 : index
    %c128_9 = arith.constant 128 : index
    %12 = vector.load %arg3[%c0_8, %c128_9] : memref<1x384xf32, #tpu.memory_space<vmem>>, vector<1x128xf32>
    %13 = vector.broadcast %12 : vector<1x128xf32> to vector<128x128xf32>
    %14 = arith.addf %11, %13 : vector<128x128xf32>
    %15 = arith.negf %14 : vector<128x128xf32>
    %16 = math.exp %15 : vector<128x128xf32>
    %cst_10 = arith.constant 1.000000e+00 : f32
    %17 = vector.broadcast %cst_10 : f32 to vector<128x128xf32>
    %18 = arith.addf %17, %16 : vector<128x128xf32>
    %19 = arith.divf %17, %18 : vector<128x128xf32>
    %20 = arith.mulf %19, %9 : vector<128x128xf32>
    %c0_11 = arith.constant 0 : index
    %c0_12 = arith.constant 0 : index
    %21 = vector.load %arg6[%c0_11, %c0_12] : memref<128x128xf32, #tpu.memory_space<vmem>>, vector<128x128xf32>
    tpu.vector_store %arg6[%c0_11, %c0_12], %20 {strides = array<i32>} : memref<128x128xf32, #tpu.memory_space<vmem>>, vector<128x128xf32>,
    %cst_13 = arith.constant 1.000000e+00 : f32
    %22 = vector.broadcast %cst_13 : f32 to vector<128x128xf32>
    %23 = arith.subf %22, %19 : vector<128x128xf32>
    %c0_14 = arith.constant 0 : index
    %c0_15 = arith.constant 0 : index
    %24 = vector.load %arg7[%c0_14, %c0_15] : memref<128x128xf32, #tpu.memory_space<vmem>>, vector<128x128xf32>
    tpu.vector_store %arg7[%c0_14, %c0_15], %23 {strides = array<i32>} : memref<128x128xf32, #tpu.memory_space<vmem>>, vector<128x128xf32>,
    %c0_16 = arith.constant 0 : index
    %c256 = arith.constant 256 : index
    %25 = vector.load %arg2[%c0_16, %c256] : memref<128x384xbf16, #tpu.memory_space<vmem>>, vector<128x128xbf16>
    %cst_17 = arith.constant dense<0.000000e+00> : vector<128x128xf32>
    %26 = tpu.matmul %3, %25, %cst_17 {dimension_numbers = #tpu.dot_dimension_numbers<[1], [0], [0], [1], [0, 0, 1, 1], [], []>} : vector<128x128xbf16>, vector<128x128xbf16>, vector<128x128xf32> -> vector<128x128xf32>
    %c0_18 = arith.constant 0 : index
    %c256_19 = arith.constant 256 : index
    %27 = vector.load %arg3[%c0_18, %c256_19] : memref<1x384xf32, #tpu.memory_space<vmem>>, vector<1x128xf32>
    %28 = vector.broadcast %27 : vector<1x128xf32> to vector<128x128xf32>
    %29 = arith.addf %26, %28 : vector<128x128xf32>
    %30 = arith.negf %29 : vector<128x128xf32>
    %31 = math.exp %30 : vector<128x128xf32>
    %cst_20 = arith.constant 1.000000e+00 : f32
    %32 = vector.broadcast %cst_20 : f32 to vector<128x128xf32>
    %33 = arith.addf %32, %31 : vector<128x128xf32>
    %34 = arith.divf %32, %33 : vector<128x128xf32>
    %c0_21 = arith.constant 0 : index
    %c0_22 = arith.constant 0 : index
    %35 = vector.load %arg8[%c0_21, %c0_22] : memref<128x128xf32, #tpu.memory_space<vmem>>, vector<128x128xf32>
    tpu.vector_store %arg8[%c0_21, %c0_22], %34 {strides = array<i32>} : memref<128x128xf32, #tpu.memory_space<vmem>>, vector<128x128xf32>,
    %c0_23 = arith.constant 0 : index
    %c0_24 = arith.constant 0 : index
    %36 = vector.load %arg6[%c0_23, %c0_24] : memref<128x128xf32, #tpu.memory_space<vmem>>, vector<16x128xf32>
    %c0_25 = arith.constant 0 : index
    %c0_26 = arith.constant 0 : index
    %37 = vector.load %arg7[%c0_25, %c0_26] : memref<128x128xf32, #tpu.memory_space<vmem>>, vector<16x128xf32>
    %c0_27 = arith.constant 0 : index
    %c0_28 = arith.constant 0 : index
    %38 = vector.load %arg5[%c0_27, %c0_28] : memref<16x128xf32, #tpu.memory_space<vmem>>, vector<16x128xf32>
    %39 = arith.mulf %37, %38 : vector<16x128xf32>
    %40 = arith.addf %36, %39 : vector<16x128xf32>
    %c0_29 = arith.constant 0 : index
    %c0_30 = arith.constant 0 : index
    %41 = vector.load %arg5[%c0_29, %c0_30] : memref<16x128xf32, #tpu.memory_space<vmem>>, vector<16x128xf32>
    tpu.vector_store %arg5[%c0_29, %c0_30], %40 {strides = array<i32>} : memref<16x128xf32, #tpu.memory_space<vmem>>, vector<16x128xf32>,
    %c0_31 = arith.constant 0 : index
    %c0_32 = arith.constant 0 : index
    %42 = vector.load %arg8[%c0_31, %c0_32] : memref<128x128xf32, #tpu.memory_space<vmem>>, vector<16x128xf32>
    %43 = arith.mulf %42, %40 : vector<16x128xf32>
    %44 = arith.truncf %43 : vector<16x128xf32> to vector<16x128xbf16>
    %c0_33 = arith.constant 0 : index
    %c0_34 = arith.constant 0 : index
    %45 = vector.load %arg4[%c0_33, %c0_34] : memref<128x128xbf16, #tpu.memory_space<vmem>>, vector<16x128xbf16>
    tpu.vector_store %arg4[%c0_33, %c0_34], %44 {strides = array<i32>} : memref<128x128xbf16, #tpu.memory_space<vmem>>, vector<16x128xbf16>,
    %c16 = arith.constant 16 : index
    %c0_35 = arith.constant 0 : index
    %46 = vector.load %arg6[%c16, %c0_35] : memref<128x128xf32, #tpu.memory_space<vmem>>, vector<16x128xf32>
    %c16_36 = arith.constant 16 : index
    %c0_37 = arith.constant 0 : index
    %47 = vector.load %arg7[%c16_36, %c0_37] : memref<128x128xf32, #tpu.memory_space<vmem>>, vector<16x128xf32>
    %c0_38 = arith.constant 0 : index
    %c0_39 = arith.constant 0 : index
    %48 = vector.load %arg5[%c0_38, %c0_39] : memref<16x128xf32, #tpu.memory_space<vmem>>, vector<16x128xf32>
    %49 = arith.mulf %47, %48 : vector<16x128xf32>
    %50 = arith.addf %46, %49 : vector<16x128xf32>
    %c0_40 = arith.constant 0 : index
    %c0_41 = arith.constant 0 : index
    %51 = vector.load %arg5[%c0_40, %c0_41] : memref<16x128xf32, #tpu.memory_space<vmem>>, vector<16x128xf32>
    tpu.vector_store %arg5[%c0_40, %c0_41], %50 {strides = array<i32>} : memref<16x128xf32, #tpu.memory_space<vmem>>, vector<16x128xf32>,
    %c16_42 = arith.constant 16 : index
    %c0_43 = arith.constant 0 : index
    %52 = vector.load %arg8[%c16_42, %c0_43] : memref<128x128xf32, #tpu.memory_space<vmem>>, vector<16x128xf32>
    %53 = arith.mulf %52, %50 : vector<16x128xf32>
    %54 = arith.truncf %53 : vector<16x128xf32> to vector<16x128xbf16>
    %c16_44 = arith.constant 16 : index
    %c0_45 = arith.constant 0 : index
    %55 = vector.load %arg4[%c16_44, %c0_45] : memref<128x128xbf16, #tpu.memory_space<vmem>>, vector<16x128xbf16>
    tpu.vector_store %arg4[%c16_44, %c0_45], %54 {strides = array<i32>} : memref<128x128xbf16, #tpu.memory_space<vmem>>, vector<16x128xbf16>,
    %c32 = arith.constant 32 : index
    %c0_46 = arith.constant 0 : index
    %56 = vector.load %arg6[%c32, %c0_46] : memref<128x128xf32, #tpu.memory_space<vmem>>, vector<16x128xf32>
    %c32_47 = arith.constant 32 : index
    %c0_48 = arith.constant 0 : index
    %57 = vector.load %arg7[%c32_47, %c0_48] : memref<128x128xf32, #tpu.memory_space<vmem>>, vector<16x128xf32>
    %c0_49 = arith.constant 0 : index
    %c0_50 = arith.constant 0 : index
    %58 = vector.load %arg5[%c0_49, %c0_50] : memref<16x128xf32, #tpu.memory_space<vmem>>, vector<16x128xf32>
    %59 = arith.mulf %57, %58 : vector<16x128xf32>
    %60 = arith.addf %56, %59 : vector<16x128xf32>
    %c0_51 = arith.constant 0 : index
    %c0_52 = arith.constant 0 : index
    %61 = vector.load %arg5[%c0_51, %c0_52] : memref<16x128xf32, #tpu.memory_space<vmem>>, vector<16x128xf32>
    tpu.vector_store %arg5[%c0_51, %c0_52], %60 {strides = array<i32>} : memref<16x128xf32, #tpu.memory_space<vmem>>, vector<16x128xf32>,
    %c32_53 = arith.constant 32 : index
    %c0_54 = arith.constant 0 : index
    %62 = vector.load %arg8[%c32_53, %c0_54] : memref<128x128xf32, #tpu.memory_space<vmem>>, vector<16x128xf32>
    %63 = arith.mulf %62, %60 : vector<16x128xf32>
    %64 = arith.truncf %63 : vector<16x128xf32> to vector<16x128xbf16>
    %c32_55 = arith.constant 32 : index
    %c0_56 = arith.constant 0 : index
    %65 = vector.load %arg4[%c32_55, %c0_56] : memref<128x128xbf16, #tpu.memory_space<vmem>>, vector<16x128xbf16>
    tpu.vector_store %arg4[%c32_55, %c0_56], %64 {strides = array<i32>} : memref<128x128xbf16, #tpu.memory_space<vmem>>, vector<16x128xbf16>,
    %c48 = arith.constant 48 : index
    %c0_57 = arith.constant 0 : index
    %66 = vector.load %arg6[%c48, %c0_57] : memref<128x128xf32, #tpu.memory_space<vmem>>, vector<16x128xf32>
    %c48_58 = arith.constant 48 : index
    %c0_59 = arith.constant 0 : index
    %67 = vector.load %arg7[%c48_58, %c0_59] : memref<128x128xf32, #tpu.memory_space<vmem>>, vector<16x128xf32>
    %c0_60 = arith.constant 0 : index
    %c0_61 = arith.constant 0 : index
    %68 = vector.load %arg5[%c0_60, %c0_61] : memref<16x128xf32, #tpu.memory_space<vmem>>, vector<16x128xf32>
    %69 = arith.mulf %67, %68 : vector<16x128xf32>
    %70 = arith.addf %66, %69 : vector<16x128xf32>
    %c0_62 = arith.constant 0 : index
    %c0_63 = arith.constant 0 : index
    %71 = vector.load %arg5[%c0_62, %c0_63] : memref<16x128xf32, #tpu.memory_space<vmem>>, vector<16x128xf32>
    tpu.vector_store %arg5[%c0_62, %c0_63], %70 {strides = array<i32>} : memref<16x128xf32, #tpu.memory_space<vmem>>, vector<16x128xf32>,
    %c48_64 = arith.constant 48 : index
    %c0_65 = arith.constant 0 : index
    %72 = vector.load %arg8[%c48_64, %c0_65] : memref<128x128xf32, #tpu.memory_space<vmem>>, vector<16x128xf32>
    %73 = arith.mulf %72, %70 : vector<16x128xf32>
    %74 = arith.truncf %73 : vector<16x128xf32> to vector<16x128xbf16>
    %c48_66 = arith.constant 48 : index
    %c0_67 = arith.constant 0 : index
    %75 = vector.load %arg4[%c48_66, %c0_67] : memref<128x128xbf16, #tpu.memory_space<vmem>>, vector<16x128xbf16>
    tpu.vector_store %arg4[%c48_66, %c0_67], %74 {strides = array<i32>} : memref<128x128xbf16, #tpu.memory_space<vmem>>, vector<16x128xbf16>,
    %c64 = arith.constant 64 : index
    %c0_68 = arith.constant 0 : index
    %76 = vector.load %arg6[%c64, %c0_68] : memref<128x128xf32, #tpu.memory_space<vmem>>, vector<16x128xf32>
    %c64_69 = arith.constant 64 : index
    %c0_70 = arith.constant 0 : index
    %77 = vector.load %arg7[%c64_69, %c0_70] : memref<128x128xf32, #tpu.memory_space<vmem>>, vector<16x128xf32>
    %c0_71 = arith.constant 0 : index
    %c0_72 = arith.constant 0 : index
    %78 = vector.load %arg5[%c0_71, %c0_72] : memref<16x128xf32, #tpu.memory_space<vmem>>, vector<16x128xf32>
    %79 = arith.mulf %77, %78 : vector<16x128xf32>
    %80 = arith.addf %76, %79 : vector<16x128xf32>
    %c0_73 = arith.constant 0 : index
    %c0_74 = arith.constant 0 : index
    %81 = vector.load %arg5[%c0_73, %c0_74] : memref<16x128xf32, #tpu.memory_space<vmem>>, vector<16x128xf32>
    tpu.vector_store %arg5[%c0_73, %c0_74], %80 {strides = array<i32>} : memref<16x128xf32, #tpu.memory_space<vmem>>, vector<16x128xf32>,
    %c64_75 = arith.constant 64 : index
    %c0_76 = arith.constant 0 : index
    %82 = vector.load %arg8[%c64_75, %c0_76] : memref<128x128xf32, #tpu.memory_space<vmem>>, vector<16x128xf32>
    %83 = arith.mulf %82, %80 : vector<16x128xf32>
    %84 = arith.truncf %83 : vector<16x128xf32> to vector<16x128xbf16>
    %c64_77 = arith.constant 64 : index
    %c0_78 = arith.constant 0 : index
    %85 = vector.load %arg4[%c64_77, %c0_78] : memref<128x128xbf16, #tpu.memory_space<vmem>>, vector<16x128xbf16>
    tpu.vector_store %arg4[%c64_77, %c0_78], %84 {strides = array<i32>} : memref<128x128xbf16, #tpu.memory_space<vmem>>, vector<16x128xbf16>,
    %c80 = arith.constant 80 : index
    %c0_79 = arith.constant 0 : index
    %86 = vector.load %arg6[%c80, %c0_79] : memref<128x128xf32, #tpu.memory_space<vmem>>, vector<16x128xf32>
    %c80_80 = arith.constant 80 : index
    %c0_81 = arith.constant 0 : index
    %87 = vector.load %arg7[%c80_80, %c0_81] : memref<128x128xf32, #tpu.memory_space<vmem>>, vector<16x128xf32>
    %c0_82 = arith.constant 0 : index
    %c0_83 = arith.constant 0 : index
    %88 = vector.load %arg5[%c0_82, %c0_83] : memref<16x128xf32, #tpu.memory_space<vmem>>, vector<16x128xf32>
    %89 = arith.mulf %87, %88 : vector<16x128xf32>
    %90 = arith.addf %86, %89 : vector<16x128xf32>
    %c0_84 = arith.constant 0 : index
    %c0_85 = arith.constant 0 : index
    %91 = vector.load %arg5[%c0_84, %c0_85] : memref<16x128xf32, #tpu.memory_space<vmem>>, vector<16x128xf32>
    tpu.vector_store %arg5[%c0_84, %c0_85], %90 {strides = array<i32>} : memref<16x128xf32, #tpu.memory_space<vmem>>, vector<16x128xf32>,
    %c80_86 = arith.constant 80 : index
    %c0_87 = arith.constant 0 : index
    %92 = vector.load %arg8[%c80_86, %c0_87] : memref<128x128xf32, #tpu.memory_space<vmem>>, vector<16x128xf32>
    %93 = arith.mulf %92, %90 : vector<16x128xf32>
    %94 = arith.truncf %93 : vector<16x128xf32> to vector<16x128xbf16>
    %c80_88 = arith.constant 80 : index
    %c0_89 = arith.constant 0 : index
    %95 = vector.load %arg4[%c80_88, %c0_89] : memref<128x128xbf16, #tpu.memory_space<vmem>>, vector<16x128xbf16>
    tpu.vector_store %arg4[%c80_88, %c0_89], %94 {strides = array<i32>} : memref<128x128xbf16, #tpu.memory_space<vmem>>, vector<16x128xbf16>,
    %c96 = arith.constant 96 : index
    %c0_90 = arith.constant 0 : index
    %96 = vector.load %arg6[%c96, %c0_90] : memref<128x128xf32, #tpu.memory_space<vmem>>, vector<16x128xf32>
    %c96_91 = arith.constant 96 : index
    %c0_92 = arith.constant 0 : index
    %97 = vector.load %arg7[%c96_91, %c0_92] : memref<128x128xf32, #tpu.memory_space<vmem>>, vector<16x128xf32>
    %c0_93 = arith.constant 0 : index
    %c0_94 = arith.constant 0 : index
    %98 = vector.load %arg5[%c0_93, %c0_94] : memref<16x128xf32, #tpu.memory_space<vmem>>, vector<16x128xf32>
    %99 = arith.mulf %97, %98 : vector<16x128xf32>
    %100 = arith.addf %96, %99 : vector<16x128xf32>
    %c0_95 = arith.constant 0 : index
    %c0_96 = arith.constant 0 : index
    %101 = vector.load %arg5[%c0_95, %c0_96] : memref<16x128xf32, #tpu.memory_space<vmem>>, vector<16x128xf32>
    tpu.vector_store %arg5[%c0_95, %c0_96], %100 {strides = array<i32>} : memref<16x128xf32, #tpu.memory_space<vmem>>, vector<16x128xf32>,
    %c96_97 = arith.constant 96 : index
    %c0_98 = arith.constant 0 : index
    %102 = vector.load %arg8[%c96_97, %c0_98] : memref<128x128xf32, #tpu.memory_space<vmem>>, vector<16x128xf32>
    %103 = arith.mulf %102, %100 : vector<16x128xf32>
    %104 = arith.truncf %103 : vector<16x128xf32> to vector<16x128xbf16>
    %c96_99 = arith.constant 96 : index
    %c0_100 = arith.constant 0 : index
    %105 = vector.load %arg4[%c96_99, %c0_100] : memref<128x128xbf16, #tpu.memory_space<vmem>>, vector<16x128xbf16>
    tpu.vector_store %arg4[%c96_99, %c0_100], %104 {strides = array<i32>} : memref<128x128xbf16, #tpu.memory_space<vmem>>, vector<16x128xbf16>,
    %c112 = arith.constant 112 : index
    %c0_101 = arith.constant 0 : index
    %106 = vector.load %arg6[%c112, %c0_101] : memref<128x128xf32, #tpu.memory_space<vmem>>, vector<16x128xf32>
    %c112_102 = arith.constant 112 : index
    %c0_103 = arith.constant 0 : index
    %107 = vector.load %arg7[%c112_102, %c0_103] : memref<128x128xf32, #tpu.memory_space<vmem>>, vector<16x128xf32>
    %c0_104 = arith.constant 0 : index
    %c0_105 = arith.constant 0 : index
    %108 = vector.load %arg5[%c0_104, %c0_105] : memref<16x128xf32, #tpu.memory_space<vmem>>, vector<16x128xf32>
    %109 = arith.mulf %107, %108 : vector<16x128xf32>
    %110 = arith.addf %106, %109 : vector<16x128xf32>
    %c0_106 = arith.constant 0 : index
    %c0_107 = arith.constant 0 : index
    %111 = vector.load %arg5[%c0_106, %c0_107] : memref<16x128xf32, #tpu.memory_space<vmem>>, vector<16x128xf32>
    tpu.vector_store %arg5[%c0_106, %c0_107], %110 {strides = array<i32>} : memref<16x128xf32, #tpu.memory_space<vmem>>, vector<16x128xf32>,
    %c112_108 = arith.constant 112 : index
    %c0_109 = arith.constant 0 : index
    %112 = vector.load %arg8[%c112_108, %c0_109] : memref<128x128xf32, #tpu.memory_space<vmem>>, vector<16x128xf32>
    %113 = arith.mulf %112, %110 : vector<16x128xf32>
    %114 = arith.truncf %113 : vector<16x128xf32> to vector<16x128xbf16>
    %c112_110 = arith.constant 112 : index
    %c0_111 = arith.constant 0 : index
    %115 = vector.load %arg4[%c112_110, %c0_111] : memref<128x128xbf16, #tpu.memory_space<vmem>>, vector<16x128xbf16>
    tpu.vector_store %arg4[%c112_110, %c0_111], %114 {strides = array<i32>} : memref<128x128xbf16, #tpu.memory_space<vmem>>, vector<16x128xbf16>,
    return
  }
  func.func @transform_0(%arg0: i32) -> (i32, i32) {
    %c0_i32 = arith.constant 0 : i32
    %c0_i32_0 = arith.constant 0 : i32
    return %arg0, %c0_i32 : i32, i32
  }
  func.func @transform_1(%arg0: i32) -> (i32, i32) {
    %c0_i32 = arith.constant 0 : i32
    %c0_i32_0 = arith.constant 0 : i32
    %c0_i32_1 = arith.constant 0 : i32
    return %c0_i32, %c0_i32_0 : i32, i32
  }
  func.func @transform_2(%arg0: i32) -> (i32, i32) {
    %c0_i32 = arith.constant 0 : i32
    %c0_i32_0 = arith.constant 0 : i32
    %c0_i32_1 = arith.constant 0 : i32
    return %c0_i32, %c0_i32_0 : i32, i32
  }
  func.func @transform_3(%arg0: i32) -> (i32, i32) {
    %c0_i32 = arith.constant 0 : i32
    %c0_i32_0 = arith.constant 0 : i32
    return %arg0, %c0_i32 : i32, i32
  }
}

module attributes {stable_mosaic.version = 11 : i64} {
  func.func @_matmul_kernel(%arg0: i32, %arg1: i32, %arg2: i32, %arg3: memref<256x128xbf16, #tpu.memory_space<vmem>>, %arg4: memref<128x512xbf16, #tpu.memory_space<vmem>>, %arg5: memref<256x512xf32, #tpu.memory_space<vmem>>, %arg6: memref<256x512xf32, #tpu.memory_space<vmem>>) attributes {dimension_semantics = [#tpu.dimension_semantics<parallel>, #tpu.dimension_semantics<parallel>, #tpu.dimension_semantics<arbitrary>], iteration_bounds = array<i64: 1, 1, 1>, scalar_prefetch = 0 : i64, scratch_operands = 1 : i64, tpu.core_type = #tpu.core_type<tc>, window_params = [{transform_indices = @transform_0, window_bounds = array<i64: 256, 128>}, {transform_indices = @transform_1, window_bounds = array<i64: 128, 512>}, {transform_indices = @transform_2, window_bounds = array<i64: 256, 512>}]} {
    %c0_i32 = arith.constant 0 : i32
    %0 = arith.cmpi eq, %arg2, %c0_i32 : i32
    %1 = arith.extui %0 : i1 to i32
    %c0_i32_0 = arith.constant 0 : i32
    %2 = arith.cmpi ne, %1, %c0_i32_0 : i32
    scf.if %2 {
      %cst_10 = arith.constant 0.000000e+00 : f32
      %12 = vector.broadcast %cst_10 : f32 to vector<256x512xf32>
      %c0_11 = arith.constant 0 : index
      %c0_12 = arith.constant 0 : index
      %13 = vector.load %arg6[%c0_11, %c0_12] : memref<256x512xf32, #tpu.memory_space<vmem>>, vector<256x512xf32>
      tpu.vector_store %arg6[%c0_11, %c0_12], %12 {strides = array<i32>} : memref<256x512xf32, #tpu.memory_space<vmem>>, vector<256x512xf32>,
    } else {
    }
    %c0 = arith.constant 0 : index
    %c0_1 = arith.constant 0 : index
    %3 = vector.load %arg6[%c0, %c0_1] : memref<256x512xf32, #tpu.memory_space<vmem>>, vector<256x512xf32>
    %c0_2 = arith.constant 0 : index
    %c0_3 = arith.constant 0 : index
    %4 = vector.load %arg3[%c0_2, %c0_3] : memref<256x128xbf16, #tpu.memory_space<vmem>>, vector<256x128xbf16>
    %c0_4 = arith.constant 0 : index
    %c0_5 = arith.constant 0 : index
    %5 = vector.load %arg4[%c0_4, %c0_5] : memref<128x512xbf16, #tpu.memory_space<vmem>>, vector<128x512xbf16>
    %cst = arith.constant dense<0.000000e+00> : vector<256x512xf32>
    %6 = tpu.matmul %4, %5, %cst {dimension_numbers = #tpu.dot_dimension_numbers<[1], [0], [0], [1], [0, 0, 1, 1], [], []>} : vector<256x128xbf16>, vector<128x512xbf16>, vector<256x512xf32> -> vector<256x512xf32>
    %7 = arith.addf %3, %6 : vector<256x512xf32>
    %c0_6 = arith.constant 0 : index
    %c0_7 = arith.constant 0 : index
    %8 = vector.load %arg6[%c0_6, %c0_7] : memref<256x512xf32, #tpu.memory_space<vmem>>, vector<256x512xf32>
    tpu.vector_store %arg6[%c0_6, %c0_7], %7 {strides = array<i32>} : memref<256x512xf32, #tpu.memory_space<vmem>>, vector<256x512xf32>,
    %c0_i32_8 = arith.constant 0 : i32
    %9 = arith.cmpi eq, %arg2, %c0_i32_8 : i32
    %10 = arith.extui %9 : i1 to i32
    %c0_i32_9 = arith.constant 0 : i32
    %11 = arith.cmpi ne, %10, %c0_i32_9 : i32
    scf.if %11 {
      %c0_10 = arith.constant 0 : index
      %c0_11 = arith.constant 0 : index
      %12 = vector.load %arg6[%c0_10, %c0_11] : memref<256x512xf32, #tpu.memory_space<vmem>>, vector<256x512xf32>
      %c0_12 = arith.constant 0 : index
      %c0_13 = arith.constant 0 : index
      %13 = vector.load %arg5[%c0_12, %c0_13] : memref<256x512xf32, #tpu.memory_space<vmem>>, vector<256x512xf32>
      tpu.vector_store %arg5[%c0_12, %c0_13], %12 {strides = array<i32>} : memref<256x512xf32, #tpu.memory_space<vmem>>, vector<256x512xf32>,
    } else {
    }
    return
  }
  func.func @transform_0(%arg0: i32, %arg1: i32, %arg2: i32) -> (i32, i32) {
    %c0_i32 = arith.constant 0 : i32
    return %arg0, %arg2 : i32, i32
  }
  func.func @transform_1(%arg0: i32, %arg1: i32, %arg2: i32) -> (i32, i32) {
    %c0_i32 = arith.constant 0 : i32
    return %arg2, %arg1 : i32, i32
  }
  func.func @transform_2(%arg0: i32, %arg1: i32, %arg2: i32) -> (i32, i32) {
    %c0_i32 = arith.constant 0 : i32
    return %arg0, %arg1 : i32, i32
  }
}

</mosaic_0001>

<bundles_post_ra>
// kernel: shared_language_model_forward.4
= control target key start
LH: loop header
LB: loop body
LE: loop exit
PB: predicated region body
PF: predicated region fallthrough
CT: control target
= control target key end

     0   :  { %s1905_s1 = inlined_call_operand.vmem [shape: bf16[128,384], index: 1, kind: input, shape index: {}]   ;;  %s1906_s0 = inlined_call_operand.vmem [shape: bf16[128,128], index: 0, kind: input, shape index: {}]   ;;  %s1907_s2 = inlined_call_operand.vmem [shape: f32[1,384], index: 2, kind: input, shape index: {}]   ;;  %s1908_s3 = inlined_call_operand.vmem [shape: bf16[128,128], index: 3, kind: output, shape index: {}]  }
   0x1   :  { %v1395_v0 = vld [vmem:[%s1905_s1 + $0xa8] ss:$12 sps:$4 sm:$0xff]   ;;  %v1396_v1 = vld [vmem:[%s1905_s1 + $0xac] ss:$12 sps:$4 sm:$0xff]   ;;  %v1397_v2 = vld [vmem:[%s1905_s1 + $0x90] ss:$12 sps:$4 sm:$0xff]  }
   0x2   :  { %1283 = vmatprep.subr.bf16.mxu0 %v1395_v0  ;;  %1315 = vmatprep.subr.bf16.mxu1 %v1396_v1  ;;  %v1398_v3 = vld [vmem:[%s1905_s1 + $0x94] ss:$12 sps:$4 sm:$0xff]   ;;  %v1399_v4 = vld [vmem:[%s1905_s1 + $0x78] ss:$12 sps:$4 sm:$0xff]   ;;  %v1400_v5 = vld [vmem:[%s1905_s1 + $0x7c] ss:$12 sps:$4 sm:$0xff]  }
   0x3   :  { %1284 = vmatpush3.bf16.msra.mxu0 %v1395_v0  ;;  %1316 = vmatpush3.bf16.msra.mxu1 %v1396_v1  ;;  %v1401_v6 = vld [vmem:[%s1905_s1 + $0x60] ss:$12 sps:$4 sm:$0xff]   ;;  %v1402_v7 = vld [vmem:[%s1905_s1 + $0x64] ss:$12 sps:$4 sm:$0xff]   ;;  %v1403_v8 = vld [vmem:[%s1905_s1 + $0x48] ss:$12 sps:$4 sm:$0xff]  }
   0x4   :  { %1285 = vmatprep.subr.bf16.mxu0 %v1397_v2  ;;  %1317 = vmatprep.subr.bf16.mxu1 %v1398_v3  ;;  %v1404_v9 = vld [vmem:[%s1905_s1 + $0x4c] ss:$12 sps:$4 sm:$0xff]   ;;  %v1405_v10 = vld [vmem:[%s1905_s1 + $0x30] ss:$12 sps:$4 sm:$0xff]   ;;  %v1643_v11 = vld [vmem:[%s1906_s0] sm:$0xff]  }
   0x5   :  { %v1406_v12 = vld [vmem:[%s1905_s1 + $0x34] ss:$12 sps:$4 sm:$0xff]   ;;  %1299 = vmatprep.mubr.bf16.mxu0 %v1643_v11  ;;  %1331 = vmatprep.mubr.bf16.mxu1 %v1643_v11  ;;  %v1407_v13 = vld [vmem:[%s1905_s1 + $0x18] ss:$12 sps:$4 sm:$0xff]   ;;  %v1408_v14 = vld [vmem:[%s1905_s1 + $0x1c] ss:$12 sps:$4 sm:$0xff]  }
   0x6   :  { %v1409_v15 = vld [vmem:[%s1905_s1] ss:$12 sps:$4 sm:$0xff]   ;;  %v1410_v16 = vld [vmem:[%s1905_s1 + $0x4] ss:$12 sps:$4 sm:$0xff]   ;;  %v1416_v22 = vld [vmem:[%s1906_s0 + $0x18] sm:$0xff]  }
   0x7   :  { %1286 = vmatpush3.bf16.msra.mxu0 %v1397_v2  ;;  %1318 = vmatpush3.bf16.msra.mxu1 %v1398_v3  ;;  %v1413_v17 = vld [vmem:[%s1905_s1 + $0xb0] ss:$12 sps:$4 sm:$0xff]   ;;  %v1668_v18 = vld [vmem:[%s1906_s0 + $0x8] sm:$0xff]   ;;  %v1414_v19 = vld [vmem:[%s1905_s1 + $0x98] ss:$12 sps:$4 sm:$0xff]  }
   0x8   :  { %1287 = vmatprep.subr.bf16.mxu0 %v1399_v4  ;;  %1319 = vmatprep.subr.bf16.mxu1 %v1400_v5  ;;  %v1415_v20 = vld [vmem:[%s1906_s0 + $0x10] sm:$0xff]   ;;  %v1417_v21 = vld [vmem:[%s1905_s1 + $0x80] ss:$12 sps:$4 sm:$0xff]   ;;  %v1422_v27 = vld [vmem:[%s1905_s1 + $0x38] ss:$12 sps:$4 sm:$0xff]  }
   0x9   :  { %v1418_v23 = vld [vmem:[%s1905_s1 + $0x68] ss:$12 sps:$4 sm:$0xff]   ;;  %v1419_v24 = vld [vmem:[%s1906_s0 + $0x20] sm:$0xff]   ;;  %v1421_v25 = vld [vmem:[%s1905_s1 + $0x50] ss:$12 sps:$4 sm:$0xff]  }
   0xa   :  { %v1420_v26 = vld [vmem:[%s1906_s0 + $0x28] sm:$0xff]   ;;  %v1423_v28 = vld [vmem:[%s1906_s0 + $0x30] sm:$0xff]   ;;  %v1424_v30 = vld [vmem:[%s1906_s0 + $0x38] sm:$0xff]  }
   0xb   :  { %1288 = vmatpush3.bf16.msra.mxu0 %v1399_v4  ;;  %1320 = vmatpush3.bf16.msra.mxu1 %v1400_v5  ;;  %v1425_v29 = vld [vmem:[%s1905_s1 + $0x20] ss:$12 sps:$4 sm:$0xff]   ;;  %v1426_v31 = vld [vmem:[%s1905_s1 + $0x8] ss:$12 sps:$4 sm:$0xff]  }
   0xc   :  { %1289 = vmatprep.subr.bf16.mxu0 %v1401_v6  ;;  %1321 = vmatprep.subr.bf16.mxu1 %v1402_v7  ;;  %v1716_v32 = vld [vmem:[%s1907_s2 + $0x1] ss:$0 sm:$0xff]  ;;  %v1723_v42 = vld [vmem:[%s1907_s2] ss:$0 sm:$0xff] }
   0xf   :  { %1290 = vmatpush3.bf16.msra.mxu0 %v1401_v6  ;;  %1322 = vmatpush3.bf16.msra.mxu1 %v1402_v7 }
  0x10   :  { %1291 = vmatprep.subr.bf16.mxu0 %v1403_v8  ;;  %1323 = vmatprep.subr.bf16.mxu1 %v1404_v9 }
  0x13   :  { %1292 = vmatpush3.bf16.msra.mxu0 %v1403_v8  ;;  %1324 = vmatpush3.bf16.msra.mxu1 %v1404_v9 }
  0x14   :  { %1293 = vmatprep.subr.bf16.mxu0 %v1405_v10  ;;  %1325 = vmatprep.subr.bf16.mxu1 %v1406_v12 }
  0x17   :  { %1294 = vmatpush3.bf16.msra.mxu0 %v1405_v10  ;;  %1326 = vmatpush3.bf16.msra.mxu1 %v1406_v12 }
  0x18   :  { %1295 = vmatprep.subr.bf16.mxu0 %v1407_v13  ;;  %1327 = vmatprep.subr.bf16.mxu1 %v1408_v14 }
  0x1b   :  { %1296 = vmatpush3.bf16.msra.mxu0 %v1407_v13  ;;  %1328 = vmatpush3.bf16.msra.mxu1 %v1408_v14 }
  0x1c   :  { %1297 = vmatprep.subr.bf16.mxu0 %v1409_v15  ;;  %1329 = vmatprep.subr.bf16.mxu1 %v1410_v16 }
  0x1f   :  { %1298 = vmatpush3.bf16.msra.mxu0 %v1409_v15  ;;  %1330 = vmatpush3.bf16.msra.mxu1 %v1410_v16 }
  0x20   :  { %1347 = vmatprep.subr.bf16.mxu0 %v1413_v17  ;;  %1379 = vmatprep.subr.bf16.mxu1 %v1413_v17 }
  0x22   :  { %1300 = vmatmul.mubr.bf16.vlgmr.msra.gmra.mxu0 %v1668_v18  ;;  %1332 = vmatmul.mubr.bf16.vlgmr.msra.gmra.mxu1 %v1668_v18 }
  0x23   :  { %1348 = vmatpush3.bf16.msra.mxu0 %v1413_v17  ;;  %1387 = vmatpush3.bf16.msra.mxu1 %v1413_v17 }
  0x24   :  { %1349 = vmatprep.subr.bf16.mxu0 %v1414_v19  ;;  %1380 = vmatprep.subr.bf16.mxu1 %v1414_v19 }
  0x25   :  { %1303 = vmatprep.mubr.bf16.mxu0 %v1415_v20  ;;  %1335 = vmatprep.mubr.bf16.mxu1 %v1415_v20 }
  0x27   :  { %1350 = vmatpush3.bf16.msra.mxu0 %v1414_v19  ;;  %1388 = vmatpush3.bf16.msra.mxu1 %v1414_v19 }
  0x28   :  { %1351 = vmatprep.subr.bf16.mxu0 %v1417_v21  ;;  %1381 = vmatprep.subr.bf16.mxu1 %v1417_v21 }
  0x2a   :  { %1304 = vmatmul.mubr.bf16.gmra.mxu0 %v1416_v22  ;;  %1336 = vmatmul.mubr.bf16.gmra.mxu1 %v1416_v22 }
  0x2b   :  { %1352 = vmatpush3.bf16.msra.mxu0 %v1417_v21  ;;  %1389 = vmatpush3.bf16.msra.mxu1 %v1417_v21 }
  0x2c   :  { %1353 = vmatprep.subr.bf16.mxu0 %v1418_v23  ;;  %1382 = vmatprep.subr.bf16.mxu1 %v1418_v23 }
  0x2d   :  { %1307 = vmatprep.mubr.bf16.mxu0 %v1419_v24  ;;  %1339 = vmatprep.mubr.bf16.mxu1 %v1419_v24 }
  0x2f   :  { %1354 = vmatpush3.bf16.msra.mxu0 %v1418_v23  ;;  %1390 = vmatpush3.bf16.msra.mxu1 %v1418_v23 }
  0x30   :  { %1355 = vmatprep.subr.bf16.mxu0 %v1421_v25  ;;  %1383 = vmatprep.subr.bf16.mxu1 %v1421_v25 }
  0x32   :  { %1308 = vmatmul.mubr.bf16.gmra.mxu0 %v1420_v26  ;;  %1340 = vmatmul.mubr.bf16.gmra.mxu1 %v1420_v26 }
  0x33   :  { %1356 = vmatpush3.bf16.msra.mxu0 %v1421_v25  ;;  %1391 = vmatpush3.bf16.msra.mxu1 %v1421_v25 }
  0x34   :  { %1357 = vmatprep.subr.bf16.mxu0 %v1422_v27  ;;  %1384 = vmatprep.subr.bf16.mxu1 %v1422_v27 }
  0x35   :  { %1311 = vmatprep.mubr.bf16.mxu0 %v1423_v28  ;;  %1343 = vmatprep.mubr.bf16.mxu1 %v1423_v28 }
  0x37   :  { %1358 = vmatpush3.bf16.msra.mxu0 %v1422_v27  ;;  %1392 = vmatpush3.bf16.msra.mxu1 %v1422_v27 }
  0x38   :  { %1359 = vmatprep.subr.bf16.mxu0 %v1425_v29  ;;  %1385 = vmatprep.subr.bf16.mxu1 %v1425_v29 }
  0x3a   :  { %1312 = vmatmul.mubr.bf16.gmra.mxu0 %v1424_v30  ;;  %1344 = vmatmul.mubr.bf16.gmra.mxu1 %v1424_v30 }
  0x3b   :  { %1360 = vmatpush3.bf16.msra.mxu0 %v1425_v29  ;;  %1393 = vmatpush3.bf16.msra.mxu1 %v1425_v29 }
  0x3c   :  { %1361 = vmatprep.subr.bf16.mxu0 %v1426_v31  ;;  %1386 = vmatprep.subr.bf16.mxu1 %v1426_v31 }
  0x3d   :  { %1363 = vmatprep.mubr.bf16.mxu0 %v1643_v11  ;;  %1371 = vmatprep.mubr.bf16.mxu1 %v1419_v24 }
  0x3f   :  { %1362 = vmatpush3.bf16.msra.mxu0 %v1426_v31  ;;  %1394 = vmatpush3.bf16.msra.mxu1 %v1426_v31 }
  0x42   :  { %1364 = vmatmul.mubr.bf16.vlgmr.msra.gmra.mxu0 %v1668_v18  ;;  %1372 = vmatmul.mubr.bf16.vlgmr.msra.gmra.mxu1 %v1420_v26 }
  0x43   :  { %1367 = vmatprep.mubr.bf16.mxu0 %v1415_v20  ;;  %1375 = vmatprep.mubr.bf16.mxu1 %v1423_v28 }
  0x4a   :  { %1368 = vmatmul.mubr.bf16.gmra.mxu0 %v1416_v22  ;;  %1376 = vmatmul.mubr.bf16.gmra.mxu1 %v1424_v30 }
  0xe2   :  { %v1301_v33 = vpop.f32.mrf.mxu0  ;;  %v1333_v34 = vpop.f32.mrf.mxu1 }
  0xe3   :  { %v383_v35 = vadd.f32 %v1333_v34, %v1716_v32  ;;  %v199_v50 = vadd.f32 %v1301_v33, %v1723_v42 }
  0xe4   :  { %v190_v36 = vpop.f32.mrf.mxu0  ;;  %v374_v37 = vpop.f32.mrf.mxu1 }
  0xe5   :  { %v1117_v38 = vmul.f32 -1.442695, %v383_v35  ;;  %v375_v39 = vadd.f32 %v1716_v32, %v374_v37  ;;  %v191_v52 = vadd.f32 %v1723_v42, %v190_v36 }
  0xe6   :  { %v1302_v40 = vpop.f32.mrf.mxu0  ;;  %v1334_v41 = vpop.f32.mrf.mxu1 }
  0xe7   :  { %1427 = vpow2.f32 %v1117_v38  ;;  %v1115_v43 = vmul.f32 -1.442695, %v375_v39  ;;  %v386_v44 = vadd.f32 %v1334_v41, %v1716_v32  ;;  %v202_v55 = vadd.f32 %v1302_v40, %v1723_v42 }
  0xe8   :  { %v193_v45 = vpop.f32.mrf.mxu0  ;;  %v377_v46 = vpop.f32.mrf.mxu1 }
  0xe9   :  { %1429 = vpow2.f32 %v1115_v43  ;;  %v1118_v47 = vmul.f32 -1.442695, %v386_v44  ;;  %v378_v48 = vadd.f32 %v1716_v32, %v377_v46  ;;  %v194_v60 = vadd.f32 %v1723_v42, %v193_v45 }
  0xea   :  { %v1305_v49 = vpop.f32.mrf.mxu0  ;;  %v1337_v51 = vpop.f32.mrf.mxu1 }
  0xeb   :  { %1431 = vpow2.f32 %v1118_v47  ;;  %v1116_v53 = vmul.f32 -1.442695, %v378_v48  ;;  %v399_v56 = vadd.f32 %v1337_v51, %v1716_v32  ;;  %v215_v62 = vadd.f32 %v1305_v49, %v1723_v42 }
  0xec   :  { %v206_v54 = vpop.f32.mrf.mxu0  ;;  %v390_v57 = vpop.f32.mrf.mxu1 }
  0xed   :  { %1433 = vpow2.f32 %v1116_v53  ;;  %v391_v58 = vadd.f32 %v1716_v32, %v390_v57  ;;  %v1121_v2 = vmul.f32 -1.442695, %v399_v56  ;;  %v207_v6 = vadd.f32 %v1723_v42, %v206_v54 }
  0xee   :  { %v1306_v59 = vpop.f32.mrf.mxu0  ;;  %1435 = vtanh.f32 %v199_v50  ;;  %v1338_v61 = vpop.f32.mrf.mxu1 }
  0xef   :  { %1437 = vtanh.f32 %v191_v52  ;;  %v1119_v63 = vmul.f32 -1.442695, %v391_v58  ;;  %v402_v0 = vadd.f32 %v1338_v61, %v1716_v32  ;;  %v218_v13 = vadd.f32 %v1306_v59, %v1723_v42 }
  0xf0   :  { %v209_v1 = vpop.f32.mrf.mxu0  ;;  %1439 = vtanh.f32 %v202_v55  ;;  %v393_v3 = vpop.f32.mrf.mxu1 }
  0xf1   :  { %1441 = vpow2.f32 %v1119_v63  ;;  %v394_v4 = vadd.f32 %v1716_v32, %v393_v3  ;;  %v1122_v8 = vmul.f32 -1.442695, %v402_v0  ;;  %v210_v38 = vadd.f32 %v1723_v42, %v209_v1 }
  0xf2   :  { %v1309_v5 = vpop.f32.mrf.mxu0  ;;  %1443 = vtanh.f32 %v194_v60  ;;  %v1341_v7 = vpop.f32.mrf.mxu1 }
  0xf3   :  { %1445 = vtanh.f32 %v215_v62  ;;  %v1120_v9 = vmul.f32 -1.442695, %v394_v4  ;;  %v415_v10 = vadd.f32 %v1341_v7, %v1716_v32  ;;  %v231_v41 = vadd.f32 %v1309_v5, %v1723_v42 }
  0xf4   :  { %v222_v11 = vpop.f32.mrf.mxu0  ;;  %v1428_v12 = vpop.eup %1427  ;;  %1447 = vpow2.f32 %v1121_v2 }
  0xf5   :  { %v406_v14 = vpop.f32.mrf.mxu1  ;;  %1449 = vpow2.f32 %v1120_v9  ;;  %v487_v18 = vadd.f32 1.0, %v1428_v12  ;;  %v1125_v21 = vmul.f32 -1.442695, %v415_v10  ;;  %v223_v52 = vadd.f32 %v1723_v42, %v222_v11 }
  0xf6   :  { %v407_v15 = vadd.f32 %v1716_v32, %v406_v14  ;;  %v1310_v16 = vpop.f32.mrf.mxu0  ;;  %v1430_v17 = vpop.eup %1429  ;;  %1451 = vtanh.f32 %v207_v6 }
  0xf7   :  { %v1342_v19 = vpop.f32.mrf.mxu1  ;;  %v485_v20 = vadd.f32 1.0, %v1430_v17  ;;  %1453 = vpow2.f32 %v1122_v8  ;;  %v234_v60 = vadd.f32 %v1310_v16, %v1723_v42  ;;  %v1769_v16 = vld [vmem:[%s1907_s2 + $0x2] ss:$0 sm:$0xff] }
  0xf8   :  { %v418_v22 = vadd.f32 %v1342_v19, %v1716_v32  ;;  %v225_v23 = vpop.f32.mrf.mxu0  ;;  %v1432_v24 = vpop.eup %1431  ;;  %1455 = vtanh.f32 %v218_v13  ;;  %v1123_v25 = vmul.f32 -1.442695, %v407_v15 }
  0xf9   :  { %v409_v26 = vpop.f32.mrf.mxu1  ;;  %1457 = vrcp.f32 %v485_v20  ;;  %v488_v34 = vadd.f32 1.0, %v1432_v24  ;;  %v226_v5 = vadd.f32 %v1723_v42, %v225_v23 }
  0xfa   :  { %v1741_v27 = vpop.f32.mrf.mxu0  ;;  %v1434_v28 = vpop.eup %1433  ;;  %1459 = vrcp.f32 %v487_v18  ;;  %v1126_v29 = vmul.f32 -1.442695, %v418_v22  ;;  %v410_v30 = vadd.f32 %v1716_v32, %v409_v26 }
  0xfb   :  { %v1345_v31 = vpop.f32.mrf.mxu1  ;;  %v1744_v33 = vpop.eup %1435  ;;  %v486_v35 = vadd.f32 1.0, %v1434_v28  ;;  %1461 = vpow2.f32 %v1125_v21 }
  0xfc   :  { %v238_v36 = vpop.f32.mrf.mxu0  ;;  %v1438_v37 = vpop.eup %1437  ;;  %1463 = vpow2.f32 %v1123_v25  ;;  %v1124_v45 = vmul.f32 -1.442695, %v410_v30  ;;  %v431_v46 = vadd.f32 %v1345_v31, %v1716_v32 }
  0xfd   :  { %v422_v39 = vpop.f32.mrf.mxu1  ;;  %v1747_v40 = vpop.eup %1439  ;;  %1465 = vrcp.f32 %v486_v35  ;;  %v239_v18 = vadd.f32 %v1723_v42, %v238_v36 }
  0xfe   :  { %v1750_v43 = vpop.f32.mrf.mxu0  ;;  %v1442_v44 = vpop.eup %1441  ;;  %1467 = vpow2.f32 %v1126_v29  ;;  %v423_v55 = vadd.f32 %v1716_v32, %v422_v39  ;;  %v1129_v57 = vmul.f32 -1.442695, %v431_v46 }
  0xff   :  { %v1346_v47 = vpop.f32.mrf.mxu1  ;;  %v1444_v48 = vpop.eup %1443  ;;  %1469 = vrcp.f32 %v488_v34  ;;  %v489_v49 = vadd.f32 1.0, %v1442_v44 }
 0x100   :  { %v1753_v50 = vpop.f32.mrf.mxu0  ;;  %v1755_v51 = vpop.eup %1445  ;;  %1471 = vtanh.f32 %v210_v38  ;;  %v434_v0 = vadd.f32 %v1346_v47, %v1716_v32  ;;  %v1127_v3 = vmul.f32 -1.442695, %v423_v55 }
 0x101   :  { %v425_v53 = vpop.f32.mrf.mxu1  ;;  %v1448_v54 = vpop.eup %1447  ;;  %1473 = vtanh.f32 %v231_v41  ;;  %v242_v38 = vadd.f32 %v1723_v42, %v1753_v50 }
 0x102   :  { %v1450_v56 = vpop.eup %1449  ;;  %1475 = vpow2.f32 %v1124_v45  ;;  %v1365_v61 = vpop.f32.mrf.mxu0  ;;  %v491_v63 = vadd.f32 1.0, %v1448_v54  ;;  %v1130_v11 = vmul.f32 -1.442695, %v434_v0  ;;  %v426_v19 = vadd.f32 %v1716_v32, %v425_v53 }
 0x103   :  { %v1759_v58 = vpop.eup %1451  ;;  %1477 = vrcp.f32 %v489_v49  ;;  %v490_v59 = vadd.f32 1.0, %v1450_v56  ;;  %v1373_v1 = vpop.f32.mrf.mxu1  ;;  %v711_v28 = vadd.f32 %v1365_v61, %v1769_v16 }
 0x104   :  { %v1454_v62 = vpop.eup %1453  ;;  %1479 = vtanh.f32 %v223_v52  ;;  %v702_v9 = vpop.f32.mrf.mxu0  ;;  %v743_v29 = vadd.f32 %v1373_v1, %v1769_v16  ;;  %v1128_v52 = vmul.f32 -1.442695, %v426_v19 }
 0x105   :  { %v1763_v2 = vpop.eup %1455  ;;  %1481 = vrcp.f32 %v490_v59  ;;  %v492_v8 = vadd.f32 1.0, %v1454_v62  ;;  %v734_v12 = vpop.f32.mrf.mxu1  ;;  %v703_v39 = vadd.f32 %v1769_v16, %v702_v9  ;;  %v1142_v53 = vmul.f32 -1.442695, %v711_v28 }
 0x106   :  { %v1458_v4 = vpop.eup %1457  ;;  %1483 = vpow2.f32 %v1129_v57  ;;  %v1366_v24 = vpop.f32.mrf.mxu0  ;;  %v1150_v57 = vmul.f32 -1.442695, %v743_v29  ;;  %v735_v61 = vadd.f32 %v1769_v16, %v734_v12 }
 0x107   :  { %v1460_v6 = vpop.eup %1459  ;;  %v565_v7 = vsub.f32 1.0, %v1458_v4  ;;  %1485 = vtanh.f32 %v234_v60  ;;  %v533_v14 = vmul.f32 %v1458_v4, %v1438_v37  ;;  %v1374_v30 = vpop.f32.mrf.mxu1  ;;  %v1140_v60 = vmul.f32 -1.442695, %v703_v39 }
 0x108   :  { %v1462_v10 = vpop.eup %1461  ;;  %1487 = vrcp.f32 %v491_v63  ;;  %v567_v34 = vsub.f32 1.0, %v1460_v6  ;;  %v705_v47 = vpop.f32.mrf.mxu0  ;;  %v535_v50 = vmul.f32 %v1460_v6, %v1744_v33  ;;  %v714_v62 = vadd.f32 %v1366_v24, %v1769_v16 }
 0x109   :  { %v1464_v13 = vpop.eup %1463  ;;  %v883_v15 = vmul.f32 0.0, %v565_v7  ;;  %1489 = vpow2.f32 %v1127_v3  ;;  %v495_v23 = vadd.f32 1.0, %v1462_v10  ;;  %v737_v54 = vpop.f32.mrf.mxu1  ;;  %v746_v6 = vadd.f32 %v1374_v30, %v1769_v16 }
 0x10a   :  { %v1466_v17 = vpop.eup %1465  ;;  %1491 = vtanh.f32 %v226_v5  ;;  %v493_v26 = vadd.f32 1.0, %v1464_v13  ;;  %v1369_v4 = vpop.f32.mrf.mxu0  ;;  %v706_v7 = vadd.f32 %v1769_v16, %v705_v47  ;;  %v1148_v12 = vmul.f32 -1.442695, %v735_v61 }
 0x10b   :  { %v1468_v20 = vpop.eup %1467  ;;  %v1773_v21 = vadd.f32 %v883_v15, %v533_v14  ;;  %v566_v22 = vsub.f32 1.0, %v1466_v17  ;;  %1493 = vrcp.f32 %v492_v8  ;;  %v534_v35 = vmul.f32 %v1466_v17, %v1444_v48  ;;  %v1377_v8 = vpop.f32.mrf.mxu1 }
 0x10c   :  { %v1470_v25 = vpop.eup %1469  ;;  %1495 = vpow2.f32 %v1130_v11  ;;  %v496_v36 = vadd.f32 1.0, %v1468_v20  ;;  %v738_v13 = vadd.f32 %v1769_v16, %v737_v54  ;;  %v718_v19 = vpop.f32.mrf.mxu0  ;;  %v727_v24 = vadd.f32 %v1369_v4, %v1769_v16 }
 0x10d   :  { %v1777_v31 = vpop.eup %1471  ;;  %v884_v32 = vmul.f32 0.0, %v566_v22  ;;  %1497 = vtanh.f32 %v239_v18  ;;  %v909_v44 = vmul.f32 %v1773_v21, %v567_v34  ;;  %v568_v45 = vsub.f32 1.0, %v1470_v25 }
 0x10e   :  { %v1779_v37 = vpop.eup %1473  ;;  %1499 = vrcp.f32 %v495_v23  ;;  %v536_v0 = vmul.f32 %v1470_v25, %v1747_v40  ;;  %v1143_v18 = vmul.f32 -1.442695, %v714_v62  ;;  %v1151_v22 = vmul.f32 -1.442695, %v746_v6  ;;  %v750_v25 = vpop.f32.mrf.mxu1 }
 0x10f   :  { %v1476_v41 = vpop.eup %1475  ;;  %v1785_v46 = vadd.f32 %v884_v32, %v534_v35  ;;  %1501 = vrcp.f32 %v493_v26  ;;  %v1794_v3 = vadd.f32 %v909_v44, %v535_v50  ;;  %v1141_v23 = vmul.f32 -1.442695, %v706_v7 }
 0x110   :  { %v1478_v49 = vpop.eup %1477  ;;  %v494_v48 = vadd.f32 1.0, %v1476_v41  ;;  %1503 = vrcp.f32 %v496_v36  ;;  %v759_v30 = vadd.f32 %v1377_v8, %v1769_v16  ;;  %v1149_v35 = vmul.f32 -1.442695, %v738_v13 }
 0x111   :  { %v1787_v55 = vpop.eup %1479  ;;  %v910_v56 = vmul.f32 %v1785_v46, %v568_v45  ;;  %1505 = vtanh.f32 %v242_v38  ;;  %v569_v1 = vsub.f32 1.0, %v1478_v49  ;;  %v537_v28 = vmul.f32 %v1478_v49, %v1759_v58  ;;  %v1370_v58 = vpop.f32.mrf.mxu0 }
 0x112   :  { %v1482_v59 = vpop.eup %1481  ;;  %1507 = vrcp.f32 %v494_v48  ;;  %v719_v32 = vadd.f32 %v1769_v16, %v718_v19  ;;  %v751_v41 = vadd.f32 %v1769_v16, %v750_v25  ;;  %v1146_v45 = vmul.f32 -1.442695, %v727_v24 }
 0x113   :  { %v1484_v63 = vpop.eup %1483  ;;  %1509 = vpow2.f32 %v1128_v52  ;;  %v570_v10 = vsub.f32 1.0, %v1482_v59  ;;  %v1800_v11 = vadd.f32 %v910_v56, %v536_v0  ;;  %v935_v15 = vmul.f32 %v1794_v3, %v569_v1  ;;  %v721_v4 = vpop.f32.mrf.mxu0 }
 0x114   :  { %v1796_v33 = vpop.eup %1485  ;;  %v499_v5 = vadd.f32 1.0, %v1484_v63  ;;  %1511 = vpow2.f32 %v1142_v53  ;;  %v538_v39 = vmul.f32 %v1482_v59, %v1777_v31  ;;  %v1154_v52 = vmul.f32 -1.442695, %v759_v30  ;;  %v1378_v53 = vpop.f32.mrf.mxu1 }
 0x115   :  { %v1488_v9 = vpop.eup %1487  ;;  %v936_v29 = vmul.f32 %v1800_v11, %v570_v10  ;;  %v1813_v38 = vadd.f32 %v935_v15, %v537_v28  ;;  %v1144_v50 = vmul.f32 -1.442695, %v719_v32  ;;  %v730_v31 = vadd.f32 %v1370_v58, %v1769_v16 }
 0x116   :  { %v1490_v40 = vpop.eup %1489  ;;  %1513 = vrcp.f32 %v499_v5  ;;  %v571_v49 = vsub.f32 1.0, %v1488_v9  ;;  %v762_v62 = vadd.f32 %v1378_v53, %v1769_v16  ;;  %v539_v0 = vmul.f32 %v1488_v9, %v1755_v51 }
 0x117   :  { %v1803_v14 = vpop.eup %1491  ;;  %v497_v17 = vadd.f32 1.0, %v1490_v40  ;;  %1515 = vpow2.f32 %v1150_v57  ;;  %v1819_v48 = vadd.f32 %v936_v29, %v538_v39  ;;  %v1147_v7 = vmul.f32 -1.442695, %v730_v31 }
 0x118   :  { %v1494_v20 = vpop.eup %1493  ;;  %1517 = vpow2.f32 %v1140_v60  ;;  %v961_v57 = vmul.f32 %v1813_v38, %v571_v49  ;;  %v1152_v60 = vmul.f32 -1.442695, %v751_v41  ;;  %v1155_v51 = vmul.f32 -1.442695, %v762_v62 }
 0x119   :  { %v1496_v26 = vpop.eup %1495  ;;  %1519 = vrcp.f32 %v497_v17  ;;  %v572_v59 = vsub.f32 1.0, %v1494_v20  ;;  %v540_v10 = vmul.f32 %v1494_v20, %v1763_v2  ;;  %v722_v9 = vadd.f32 %v1769_v16, %v721_v4 }
 0x11a   :  { %v500_v34 = vadd.f32 1.0, %v1496_v26  ;;  %1521 = vpow2.f32 %v1148_v12  ;;  %v1811_v36 = vpop.eup %1497  ;;  %v1833_v40 = vadd.f32 %v961_v57, %v539_v0 }
 0x11b   :  { %1523 = vpow2.f32 %v1143_v18  ;;  %v1817_v44 = vpop.eup %1499  ;;  %v962_v1 = vmul.f32 %v1819_v48, %v572_v59  ;;  %v1145_v28 = vmul.f32 -1.442695, %v722_v9 }
 0x11c   :  { %1525 = vrcp.f32 %v500_v34  ;;  %v1502_v47 = vpop.eup %1501 }
 0x11d   :  { %1527 = vpow2.f32 %v1151_v22  ;;  %v1821_v54 = vpop.eup %1503  ;;  %v573_v15 = vsub.f32 1.0, %v1502_v47  ;;  %v1836_v19 = vadd.f32 %v962_v1, %v540_v10  ;;  %v541_v39 = vmul.f32 %v1502_v47, %v1787_v55 }
 0x11e   :  { %1529 = vpow2.f32 %v1141_v23  ;;  %v1824_v56 = vpop.eup %1505  ;;  %v575_v55 = vsub.f32 1.0, %v1817_v44  ;;  %v544_v10 = vmul.f32 %v1821_v54, %v1796_v33 }
 0x11f   :  { %1531 = vpow2.f32 %v1149_v35  ;;  %v1508_v61 = vpop.eup %1507  ;;  %v987_v25 = vmul.f32 %v1833_v40, %v573_v15  ;;  %v753_v35 = vpop.f32.mrf.mxu1 }
 0x120   :  { %1533 = vpow2.f32 %v1146_v45  ;;  %v1510_v63 = vpop.eup %1509  ;;  %v574_v18 = vsub.f32 1.0, %v1508_v61  ;;  %v542_v58 = vmul.f32 %v1508_v61, %v1803_v14  ;;  %v247_v14 = vadd.f32 %v1741_v27, %v1723_v42 }
 0x121   :  { %1535 = vpow2.f32 %v1154_v52  ;;  %v1512_v5 = vpop.eup %1511  ;;  %v498_v6 = vadd.f32 1.0, %v1510_v63  ;;  %v1846_v52 = vadd.f32 %v987_v25, %v541_v39  ;;  %v576_v61 = vsub.f32 1.0, %v1821_v54 }
 0x122   :  { %1537 = vpow2.f32 %v1144_v50  ;;  %v815_v12 = vadd.f32 1.0, %v1512_v5  ;;  %v988_v30 = vmul.f32 %v1836_v19, %v574_v18  ;;  %v754_v50 = vadd.f32 %v1769_v16, %v753_v35 }
 0x123   :  { %v1830_v8 = vpop.eup %1513  ;;  %1539 = vpow2.f32 %v1152_v60  ;;  %v1013_v16 = vmul.f32 %v1846_v52, %v575_v55  ;;  %v250_v5 = vadd.f32 %v1750_v43, %v1723_v42  ;;  %v543_v27 = vmul.f32 %v1817_v44, %v1779_v37 }
 0x124   :  { %v1516_v13 = vpop.eup %1515  ;;  %1541 = vrcp.f32 %v498_v6  ;;  %v1849_v57 = vadd.f32 %v988_v30, %v542_v58  ;;  %v1153_v0 = vmul.f32 -1.442695, %v754_v50 }
 0x125   :  { %v1518_v17 = vpop.eup %1517  ;;  %1543 = vrcp.f32 %v815_v12  ;;  %v823_v22 = vadd.f32 1.0, %v1516_v13 }
 0x126   :  { %v1838_v23 = vpop.eup %1519  ;;  %v813_v24 = vadd.f32 1.0, %v1518_v17  ;;  %1545 = vpow2.f32 %v1147_v7  ;;  %v1014_v4 = vmul.f32 %v1849_v57, %v576_v61 }
 0x127   :  { %v1522_v2 = vpop.eup %1521  ;;  %1547 = vrcp.f32 %v823_v22  ;;  %v577_v15 = vsub.f32 1.0, %v1838_v23 }
 0x128   :  { %v1524_v20 = vpop.eup %1523  ;;  %1549 = vrcp.f32 %v813_v24  ;;  %v821_v26 = vadd.f32 1.0, %v1522_v2  ;;  %v1016_v43 = vadd.f32 %v1014_v4, %v544_v10 }
 0x129   :  { %v1841_v29 = vpop.eup %1525  ;;  %v816_v34 = vadd.f32 1.0, %v1524_v20  ;;  %1551 = vpow2.f32 %v1155_v51  ;;  %v1015_v51 = vadd.f32 %v1013_v16, %v543_v27 }
 0x12a   :  { %v1528_v32 = vpop.eup %1527  ;;  %1553 = vrcp.f32 %v821_v26 }
 0x12b   :  { %v1530_v41 = vpop.eup %1529  ;;  %1555 = vrcp.f32 %v816_v34  ;;  %v824_v45 = vadd.f32 1.0, %v1528_v32  ;;  %v1039_v33 = vmul.f32 %v1015_v51, %v577_v15 }
 0x12c   :  { %v1532_v49 = vpop.eup %1531  ;;  %v814_v53 = vadd.f32 1.0, %v1530_v41  ;;  %1557 = vpow2.f32 %v1145_v28  ;;  %v545_v28 = vmul.f32 %v1838_v23, %v1811_v36 }
 0x12d   :  { %v1534_v31 = vpop.eup %1533  ;;  %1559 = vrcp.f32 %v824_v45  ;;  %v822_v59 = vadd.f32 1.0, %v1532_v49 }
 0x12e   :  { %v1536_v60 = vpop.eup %1535  ;;  %1561 = vrcp.f32 %v814_v53  ;;  %v819_v62 = vadd.f32 1.0, %v1534_v31  ;;  %v1041_v45 = vadd.f32 %v1039_v33, %v545_v28 }
 0x12f   :  { %v1538_v47 = vpop.eup %1537  ;;  %1563 = vrcp.f32 %v822_v59  ;;  %v827_v12 = vadd.f32 1.0, %v1536_v60  ;;  %v579_v59 = vsub.f32 1.0, %v1830_v8 }
 0x130   :  { %v1540_v63 = vpop.eup %1539  ;;  %1565 = vtanh.f32 %v247_v14  ;;  %v817_v22 = vadd.f32 1.0, %v1538_v47 }
 0x131   :  { %v1542_v1 = vpop.eup %1541  ;;  %1567 = vrcp.f32 %v819_v62  ;;  %v825_v50 = vadd.f32 1.0, %v1540_v63 }
 0x132   :  { %v1544_v6 = vpop.eup %1543  ;;  %1569 = vpow2.f32 %v1153_v0  ;;  %v578_v42 = vsub.f32 1.0, %v1542_v1  ;;  %v546_v35 = vmul.f32 %v1542_v1, %v1824_v56 }
 0x133   :  { %v1546_v7 = vpop.eup %1545  ;;  %1571 = vtanh.f32 %v250_v5  ;;  %v917_v20 = vmul.f32 %v1544_v6, %v1794_v3 }
 0x134   :  { %v1548_v13 = vpop.eup %1547  ;;  %v820_v9 = vadd.f32 1.0, %v1546_v7  ;;  %v1040_v2 = vmul.f32 %v1016_v43, %v578_v42 }
 0x135   :  { %v1550_v17 = vpop.eup %1549  ;;  %v1021_v32 = vmul.f32 %v1548_v13, %v1015_v51 }
 0x136   :  { %v1552_v18 = vpop.eup %1551  ;;  %1573 = vrcp.f32 %v820_v9  ;;  %v891_v49 = vmul.f32 %v1550_v17, %v1773_v21  ;;  %v580_v21 = vsub.f32 1.0, %v1841_v29 }
 0x137   :  { %v1554_v37 = vpop.eup %1553  ;;  %1575 = vrcp.f32 %v827_v12  ;;  %v828_v44 = vadd.f32 1.0, %v1552_v18 }
 0x138   :  { %v1556_v24 = vpop.eup %1555  ;;  %v995_v53 = vmul.f32 %v1554_v37, %v1846_v52 }
 0x139   :  { %v1558_v54 = vpop.eup %1557  ;;  %v918_v25 = vmul.f32 %v1556_v24, %v1800_v11  ;;  %1577 = vrcp.f32 %v828_v44  ;;  %v1042_v11 = vadd.f32 %v1040_v2, %v546_v35 }
 0x13a   :  { %v1560_v26 = vpop.eup %1559  ;;  %1579 = vrcp.f32 %v817_v22  ;;  %v818_v30 = vadd.f32 1.0, %v1558_v54 }
 0x13b   :  { %v1562_v34 = vpop.eup %1561  ;;  %v1196_v39 = vpack.c.bf16 %v918_v25, %v917_v20  ;;  %v1022_v41 = vmul.f32 %v1560_v26, %v1016_v43  ;;  %v1066_v55 = vmul.f32 %v1042_v11, %v580_v21 }
 0x13c   :  { %v1564_v58 = vpop.eup %1563  ;;  %v892_v3 = vmul.f32 %v1562_v34, %v1785_v46  ;;  %1581 = vrcp.f32 %v818_v30 }
 0x13d   :  { %1228 = vst [vmem:[%s1908_s3 + $0x8] sm:$0xff] %v1196_v39   ;;  %v1216_v36 = vpack.c.bf16 %v1022_v41, %v1021_v32  ;;  %v996_v56 = vmul.f32 %v1564_v58, %v1849_v57  ;;  %v1566_v31 = vpop.eup %1565  ;;  %v1065_v57 = vmul.f32 %v1041_v45, %v579_v59  ;;  %1583 = vrcp.f32 %v825_v50 }
 0x13e   :  { %v1191_v23 = vpack.c.bf16 %v892_v3, %v891_v49  ;;  %v1568_v52 = vpop.eup %1567  ;;  %v547_v62 = vmul.f32 %v1566_v31, %v1830_v8 }
 0x13f   :  { %1232 = vst [vmem:[%s1908_s3 + $0x28] sm:$0xff] %v1216_v36   ;;  %v1211_v46 = vpack.c.bf16 %v996_v56, %v995_v53  ;;  %v1570_v60 = vpop.eup %1569  ;;  %v969_v0 = vmul.f32 %v1568_v52, %v1833_v40 }
 0x140   :  { %1192 = vst [vmem:[%s1908_s3] sm:$0xff] %v1191_v23   ;;  %v1572_v14 = vpop.eup %1571  ;;  %v826_v47 = vadd.f32 1.0, %v1570_v60  ;;  %v1067_v4 = vadd.f32 %v1065_v57, %v547_v62 }
 0x141   :  { %1231 = vst [vmem:[%s1908_s3 + $0x20] sm:$0xff] %v1211_v46   ;;  %v548_v63 = vmul.f32 %v1572_v14, %v1841_v29 }
 0x142   :  { %1585 = vrcp.f32 %v826_v47 }
 0x143   :  { %v1574_v61 = vpop.eup %1573  ;;  %v1068_v5 = vadd.f32 %v1066_v55, %v548_v63 }
 0x144   :  { %v1576_v16 = vpop.eup %1575  ;;  %v970_v1 = vmul.f32 %v1574_v61, %v1836_v19 }
 0x145   :  { %v1073_v10 = vmul.f32 %v1576_v16, %v1067_v4 }
 0x146   :  { %v1578_v6 = vpop.eup %1577  ;;  %v1206_v27 = vpack.c.bf16 %v970_v1, %v969_v0 }
 0x147   :  { %v1580_v7 = vpop.eup %1579  ;;  %v1074_v12 = vmul.f32 %v1578_v6, %v1068_v5 }
 0x148   :  { %1230 = vst [vmem:[%s1908_s3 + $0x18] sm:$0xff] %v1206_v27   ;;  %v943_v29 = vmul.f32 %v1580_v7, %v1813_v38 }
 0x149   :  { %v1582_v8 = vpop.eup %1581  ;;  %v1226_v13 = vpack.c.bf16 %v1074_v12, %v1073_v10 }
 0x14a   :  { %v944_v40 = vmul.f32 %v1582_v8, %v1819_v48  ;;  %v1584_v15 = vpop.eup %1583 }
 0x14b   :  { %1234 = vst [vmem:[%s1908_s3 + $0x38] sm:$0xff] %v1226_v13   ;;  %v1047_v9 = vmul.f32 %v1584_v15, %v1041_v45 }
 0x14c   :  { %v1201_v19 = vpack.c.bf16 %v944_v40, %v943_v29 }
 0x14e   :  { %1229 = vst [vmem:[%s1908_s3 + $0x10] sm:$0xff] %v1201_v19  }
 0x14f   :  { %v1586_v51 = vpop.eup %1585 }
 0x150   :  { %v1048_v17 = vmul.f32 %v1586_v51, %v1042_v11 }
 0x152   :  { %v1221_v42 = vpack.c.bf16 %v1048_v17, %v1047_v9 }
 0x154   :  { %1233 = vst [vmem:[%s1908_s3 + $0x30] sm:$0xff] %v1221_v42  }

// kernel: shared_language_model_forward.3
= control target key start
LH: loop header
LB: loop body
LE: loop exit
PB: predicated region body
PF: predicated region fallthrough
CT: control target
= control target key end

     0   :  { %v2312_v1 = vmov 0   ;;  %s2790_s2 = inlined_call_operand.vmem [shape: bf16[128,384], index: 2, kind: input, shape index: {}]   ;;  %s2791_s1 = inlined_call_operand.vmem [shape: bf16[128,384], index: 1, kind: input, shape index: {}]   ;;  %s2792_s0 = inlined_call_operand.vmem [shape: bf16[128,128], index: 0, kind: input, shape index: {}]   ;;  %s2793_s3 = inlined_call_operand.vmem [shape: f32[1,384], index: 3, kind: input, shape index: {}]   ;;  %s2794_s4 = inlined_call_operand.vmem [shape: bf16[128,128], index: 4, kind: output, shape index: {}]  }
   0x1   :  { %v2095_v0 = vld [vmem:[%s2790_s2 + $0xa8] ss:$12 sps:$4 sm:$0xff]   ;;  %24 = vst [vmem:[#allocation6] sm:$0xf] %v2312_v1  ;;  %25 = vst [vmem:[#allocation6 + $0x4] sm:$0xf] %v2312_v1 }
   0x2   :  { %v2096_v2 = vld [vmem:[%s2791_s1 + $0xa8] ss:$12 sps:$4 sm:$0xff]   ;;  %1902 = vmatprep.subr.bf16.mxu0 %v2095_v0  ;;  %v2097_v3 = vld [vmem:[%s2790_s2 + $0x90] ss:$12 sps:$4 sm:$0xff]   ;;  %v2099_v5 = vld [vmem:[%s2790_s2 + $0x78] ss:$12 sps:$4 sm:$0xff]  }
   0x3   :  { %1934 = vmatprep.subr.bf16.mxu1 %v2096_v2  ;;  %1903 = vmatpush3.bf16.msra.mxu0 %v2095_v0  ;;  %v2098_v4 = vld [vmem:[%s2791_s1 + $0x90] ss:$12 sps:$4 sm:$0xff]   ;;  %v2100_v6 = vld [vmem:[%s2791_s1 + $0x78] ss:$12 sps:$4 sm:$0xff]   ;;  %v2101_v7 = vld [vmem:[%s2790_s2 + $0x60] ss:$12 sps:$4 sm:$0xff]  }
   0x4   :  { %1935 = vmatpush3.bf16.msra.mxu1 %v2096_v2  ;;  %1904 = vmatprep.subr.bf16.mxu0 %v2097_v3  ;;  %v2102_v8 = vld [vmem:[%s2791_s1 + $0x60] ss:$12 sps:$4 sm:$0xff]   ;;  %v2103_v9 = vld [vmem:[%s2790_s2 + $0x48] ss:$12 sps:$4 sm:$0xff]   ;;  %v2105_v11 = vld [vmem:[%s2790_s2 + $0x30] ss:$12 sps:$4 sm:$0xff]  }
   0x5   :  { %1936 = vmatprep.subr.bf16.mxu1 %v2098_v4  ;;  %v2104_v10 = vld [vmem:[%s2791_s1 + $0x48] ss:$12 sps:$4 sm:$0xff]   ;;  %v2106_v12 = vld [vmem:[%s2791_s1 + $0x30] ss:$12 sps:$4 sm:$0xff]   ;;  %v2379_v14 = vld [vmem:[%s2792_s0] sm:$0xff]  }
   0x6   :  { %1950 = vmatprep.mubr.bf16.mxu1 %v2379_v14  ;;  %v2107_v15 = vld [vmem:[%s2790_s2 + $0x18] ss:$12 sps:$4 sm:$0xff]   ;;  %v2109_v17 = vld [vmem:[%s2790_s2] ss:$12 sps:$4 sm:$0xff]   ;;  %v2416_v24 = vld [vmem:[%s2792_s0 + $0x10] sm:$0xff]  }
   0x7   :  { %1905 = vmatpush3.bf16.msra.mxu0 %v2097_v3  ;;  %v2108_v16 = vld [vmem:[%s2791_s1 + $0x18] ss:$12 sps:$4 sm:$0xff]   ;;  %v2110_v18 = vld [vmem:[%s2791_s1] ss:$12 sps:$4 sm:$0xff]   ;;  %v2120_v25 = vld [vmem:[%s2790_s2 + $0x7c] ss:$12 sps:$4 sm:$0xff]  }
   0x8   :  { %1937 = vmatpush3.bf16.msra.mxu1 %v2098_v4  ;;  %1906 = vmatprep.subr.bf16.mxu0 %v2099_v5  ;;  %v2374_v13 = vld [vmem:[#allocation6] sm:$0xff]   ;;  %v2114_v19 = vld [vmem:[%s2790_s2 + $0xac] ss:$12 sps:$4 sm:$0xff]   ;;  %v41_v27 = vld [vmem:[%s2792_s0 + $0x3c] sm:$0xf] }
   0x9   :  { %1938 = vmatprep.subr.bf16.mxu1 %v2100_v6  ;;  %1918 = vmatprep.mubr.bf16.mxu0 %v2374_v13  ;;  %v2115_v20 = vld [vmem:[%s2791_s1 + $0xac] ss:$12 sps:$4 sm:$0xff]   ;;  %v2116_v22 = vld [vmem:[%s2790_s2 + $0x94] ss:$12 sps:$4 sm:$0xff]   ;;  %v2121_v28 = vld [vmem:[%s2791_s1 + $0x7c] ss:$12 sps:$4 sm:$0xff]  }
   0xa   :  { %v2404_v21 = vld [vmem:[%s2792_s0 + $0x8] sm:$0xff]   ;;  %v2117_v23 = vld [vmem:[%s2791_s1 + $0x94] ss:$12 sps:$4 sm:$0xff]   ;;  %v40_v26 = vld [vmem:[%s2792_s0 + $0x38] sm:$0xf] }
   0xb   :  { %1907 = vmatpush3.bf16.msra.mxu0 %v2099_v5  ;;  %1421 = vst [vmem:[#allocation6] sm:$0xf] %v40_v26  ;;  %1422 = vst [vmem:[#allocation6 + $0x4] sm:$0xf] %v41_v27  ;;  %v2436_v29 = vld [vmem:[%s2792_s0 + $0x18] sm:$0xff]   ;;  %v2448_v32 = vld [vmem:[%s2792_s0 + $0x20] sm:$0xff]   ;;  %v2485_v41 = vcombine.low %v40_v26, %v41_v27 }
   0xc   :  { %1939 = vmatpush3.bf16.msra.mxu1 %v2100_v6  ;;  %1908 = vmatprep.subr.bf16.mxu0 %v2101_v7  ;;  %v2122_v30 = vld [vmem:[%s2790_s2 + $0x64] ss:$12 sps:$4 sm:$0xff]   ;;  %v2126_v33 = vld [vmem:[%s2790_s2 + $0x4c] ss:$12 sps:$4 sm:$0xff]   ;;  %v2128_v36 = vld [vmem:[%s2790_s2 + $0x34] ss:$12 sps:$4 sm:$0xff]  }
   0xd   :  { %1940 = vmatprep.subr.bf16.mxu1 %v2102_v8  ;;  %v2123_v31 = vld [vmem:[%s2791_s1 + $0x64] ss:$12 sps:$4 sm:$0xff]   ;;  %v2127_v34 = vld [vmem:[%s2791_s1 + $0x4c] ss:$12 sps:$4 sm:$0xff]   ;;  %v2129_v37 = vld [vmem:[%s2791_s1 + $0x34] ss:$12 sps:$4 sm:$0xff]  }
   0xe   :  { %v2462_v35 = vld [vmem:[%s2792_s0 + $0x28] sm:$0xff]   ;;  %v2474_v38 = vld [vmem:[%s2792_s0 + $0x30] sm:$0xff]   ;;  %v2138_v46 = vld [vmem:[%s2790_s2 + $0x98] ss:$12 sps:$4 sm:$0xff]  }
   0xf   :  { %1909 = vmatpush3.bf16.msra.mxu0 %v2101_v7  ;;  %v2132_v39 = vld [vmem:[%s2790_s2 + $0x1c] ss:$12 sps:$4 sm:$0xff]   ;;  %v2134_v42 = vld [vmem:[%s2790_s2 + $0x4] ss:$12 sps:$4 sm:$0xff]   ;;  %v2140_v48 = vld [vmem:[%s2790_s2 + $0x80] ss:$12 sps:$4 sm:$0xff]  }
  0x10   :  { %1941 = vmatpush3.bf16.msra.mxu1 %v2102_v8  ;;  %1910 = vmatprep.subr.bf16.mxu0 %v2103_v9  ;;  %v2133_v40 = vld [vmem:[%s2791_s1 + $0x1c] ss:$12 sps:$4 sm:$0xff]   ;;  %v2135_v43 = vld [vmem:[%s2791_s1 + $0x4] ss:$12 sps:$4 sm:$0xff]   ;;  %v2141_v49 = vld [vmem:[%s2791_s1 + $0x80] ss:$12 sps:$4 sm:$0xff]  }
  0x11   :  { %1942 = vmatprep.subr.bf16.mxu1 %v2104_v10  ;;  %v2136_v44 = vld [vmem:[%s2790_s2 + $0xb0] ss:$12 sps:$4 sm:$0xff]   ;;  %v2139_v47 = vld [vmem:[%s2791_s1 + $0x98] ss:$12 sps:$4 sm:$0xff]   ;;  %v2142_v50 = vld [vmem:[%s2790_s2 + $0x68] ss:$12 sps:$4 sm:$0xff]  }
  0x12   :  { %v2137_v45 = vld [vmem:[%s2791_s1 + $0xb0] ss:$12 sps:$4 sm:$0xff]   ;;  %v2143_v51 = vld [vmem:[%s2791_s1 + $0x68] ss:$12 sps:$4 sm:$0xff]   ;;  %v2146_v54 = vld [vmem:[%s2790_s2 + $0x38] ss:$12 sps:$4 sm:$0xff]  }
  0x13   :  { %1911 = vmatpush3.bf16.msra.mxu0 %v2103_v9  ;;  %v2144_v52 = vld [vmem:[%s2790_s2 + $0x50] ss:$12 sps:$4 sm:$0xff]   ;;  %v2147_v55 = vld [vmem:[%s2791_s1 + $0x38] ss:$12 sps:$4 sm:$0xff]   ;;  %v2148_v56 = vld [vmem:[%s2790_s2 + $0x20] ss:$12 sps:$4 sm:$0xff]  }
  0x14   :  { %1943 = vmatpush3.bf16.msra.mxu1 %v2104_v10  ;;  %1912 = vmatprep.subr.bf16.mxu0 %v2105_v11  ;;  %v2145_v53 = vld [vmem:[%s2791_s1 + $0x50] ss:$12 sps:$4 sm:$0xff]   ;;  %v2149_v57 = vld [vmem:[%s2791_s1 + $0x20] ss:$12 sps:$4 sm:$0xff]   ;;  %v2150_v58 = vld [vmem:[%s2790_s2 + $0x8] ss:$12 sps:$4 sm:$0xff]  }
  0x15   :  { %1944 = vmatprep.subr.bf16.mxu1 %v2106_v12  ;;  %v2151_v59 = vld [vmem:[%s2791_s1 + $0x8] ss:$12 sps:$4 sm:$0xff]  }
  0x17   :  { %1913 = vmatpush3.bf16.msra.mxu0 %v2105_v11 }
  0x18   :  { %1945 = vmatpush3.bf16.msra.mxu1 %v2106_v12  ;;  %1914 = vmatprep.subr.bf16.mxu0 %v2107_v15 }
  0x19   :  { %1946 = vmatprep.subr.bf16.mxu1 %v2108_v16 }
  0x1b   :  { %1915 = vmatpush3.bf16.msra.mxu0 %v2107_v15 }
  0x1c   :  { %1947 = vmatpush3.bf16.msra.mxu1 %v2108_v16  ;;  %1916 = vmatprep.subr.bf16.mxu0 %v2109_v17 }
  0x1d   :  { %1948 = vmatprep.subr.bf16.mxu1 %v2110_v18 }
  0x1f   :  { %1917 = vmatpush3.bf16.msra.mxu0 %v2109_v17 }
  0x20   :  { %1949 = vmatpush3.bf16.msra.mxu1 %v2110_v18  ;;  %1966 = vmatprep.subr.bf16.mxu0 %v2114_v19 }
  0x21   :  { %1998 = vmatprep.subr.bf16.mxu1 %v2115_v20 }
  0x22   :  { %1919 = vmatmul.mubr.bf16.vlgmr.msra.gmra.mxu0 %v2379_v14 }
  0x23   :  { %1951 = vmatmul.mubr.bf16.vlgmr.msra.gmra.mxu1 %v2404_v21  ;;  %1967 = vmatpush3.bf16.msra.mxu0 %v2114_v19 }
  0x24   :  { %1999 = vmatpush3.bf16.msra.mxu1 %v2115_v20  ;;  %1968 = vmatprep.subr.bf16.mxu0 %v2116_v22 }
  0x25   :  { %2000 = vmatprep.subr.bf16.mxu1 %v2117_v23  ;;  %1922 = vmatprep.mubr.bf16.mxu0 %v2404_v21 }
  0x26   :  { %1954 = vmatprep.mubr.bf16.mxu1 %v2416_v24 }
  0x27   :  { %1969 = vmatpush3.bf16.msra.mxu0 %v2116_v22 }
  0x28   :  { %2001 = vmatpush3.bf16.msra.mxu1 %v2117_v23  ;;  %1970 = vmatprep.subr.bf16.mxu0 %v2120_v25 }
  0x29   :  { %2002 = vmatprep.subr.bf16.mxu1 %v2121_v28 }
  0x2a   :  { %1923 = vmatmul.mubr.bf16.gmra.mxu0 %v2416_v24 }
  0x2b   :  { %1955 = vmatmul.mubr.bf16.gmra.mxu1 %v2436_v29  ;;  %1971 = vmatpush3.bf16.msra.mxu0 %v2120_v25 }
  0x2c   :  { %2003 = vmatpush3.bf16.msra.mxu1 %v2121_v28  ;;  %1972 = vmatprep.subr.bf16.mxu0 %v2122_v30 }
  0x2d   :  { %2004 = vmatprep.subr.bf16.mxu1 %v2123_v31  ;;  %1926 = vmatprep.mubr.bf16.mxu0 %v2436_v29 }
  0x2e   :  { %1958 = vmatprep.mubr.bf16.mxu1 %v2448_v32 }
  0x2f   :  { %1973 = vmatpush3.bf16.msra.mxu0 %v2122_v30 }
  0x30   :  { %2005 = vmatpush3.bf16.msra.mxu1 %v2123_v31  ;;  %1974 = vmatprep.subr.bf16.mxu0 %v2126_v33 }
  0x31   :  { %2006 = vmatprep.subr.bf16.mxu1 %v2127_v34 }
  0x32   :  { %1927 = vmatmul.mubr.bf16.gmra.mxu0 %v2448_v32 }
  0x33   :  { %1959 = vmatmul.mubr.bf16.gmra.mxu1 %v2462_v35  ;;  %1975 = vmatpush3.bf16.msra.mxu0 %v2126_v33 }
  0x34   :  { %2007 = vmatpush3.bf16.msra.mxu1 %v2127_v34  ;;  %1976 = vmatprep.subr.bf16.mxu0 %v2128_v36  ;;  %v2582_v34 = vld [vmem:[%s2793_s3] ss:$0 sm:$0xff] }
  0x35   :  { %2008 = vmatprep.subr.bf16.mxu1 %v2129_v37  ;;  %1930 = vmatprep.mubr.bf16.mxu0 %v2462_v35 }
  0x36   :  { %1962 = vmatprep.mubr.bf16.mxu1 %v2474_v38 }
  0x37   :  { %1977 = vmatpush3.bf16.msra.mxu0 %v2128_v36 }
  0x38   :  { %2009 = vmatpush3.bf16.msra.mxu1 %v2129_v37  ;;  %1978 = vmatprep.subr.bf16.mxu0 %v2132_v39 }
  0x39   :  { %2010 = vmatprep.subr.bf16.mxu1 %v2133_v40 }
  0x3a   :  { %1931 = vmatmul.mubr.bf16.gmra.mxu0 %v2474_v38 }
  0x3b   :  { %1963 = vmatmul.mubr.bf16.gmra.mxu1 %v2485_v41  ;;  %1979 = vmatpush3.bf16.msra.mxu0 %v2132_v39 }
  0x3c   :  { %2011 = vmatpush3.bf16.msra.mxu1 %v2133_v40  ;;  %1980 = vmatprep.subr.bf16.mxu0 %v2134_v42 }
  0x3d   :  { %2012 = vmatprep.subr.bf16.mxu1 %v2135_v43  ;;  %1982 = vmatprep.mubr.bf16.mxu0 %v2374_v13 }
  0x3e   :  { %2014 = vmatprep.mubr.bf16.mxu1 %v2379_v14 }
  0x3f   :  { %1981 = vmatpush3.bf16.msra.mxu0 %v2134_v42 }
  0x40   :  { %2013 = vmatpush3.bf16.msra.mxu1 %v2135_v43  ;;  %2030 = vmatprep.subr.bf16.mxu0 %v2136_v44 }
  0x41   :  { %2062 = vmatprep.subr.bf16.mxu1 %v2137_v45 }
  0x42   :  { %1983 = vmatmul.mubr.bf16.vlgmr.msra.gmra.mxu0 %v2379_v14 }
  0x43   :  { %2015 = vmatmul.mubr.bf16.vlgmr.msra.gmra.mxu1 %v2404_v21  ;;  %2031 = vmatpush3.bf16.msra.mxu0 %v2136_v44 }
  0x44   :  { %2063 = vmatpush3.bf16.msra.mxu1 %v2137_v45  ;;  %2032 = vmatprep.subr.bf16.mxu0 %v2138_v46 }
  0x45   :  { %2064 = vmatprep.subr.bf16.mxu1 %v2139_v47  ;;  %1986 = vmatprep.mubr.bf16.mxu0 %v2404_v21 }
  0x46   :  { %2018 = vmatprep.mubr.bf16.mxu1 %v2416_v24 }
  0x47   :  { %2033 = vmatpush3.bf16.msra.mxu0 %v2138_v46 }
  0x48   :  { %2065 = vmatpush3.bf16.msra.mxu1 %v2139_v47  ;;  %2034 = vmatprep.subr.bf16.mxu0 %v2140_v48 }
  0x49   :  { %2066 = vmatprep.subr.bf16.mxu1 %v2141_v49 }
  0x4a   :  { %1987 = vmatmul.mubr.bf16.gmra.mxu0 %v2416_v24 }
  0x4b   :  { %2019 = vmatmul.mubr.bf16.gmra.mxu1 %v2436_v29  ;;  %2035 = vmatpush3.bf16.msra.mxu0 %v2140_v48 }
  0x4c   :  { %2067 = vmatpush3.bf16.msra.mxu1 %v2141_v49  ;;  %2036 = vmatprep.subr.bf16.mxu0 %v2142_v50 }
  0x4d   :  { %2068 = vmatprep.subr.bf16.mxu1 %v2143_v51  ;;  %1990 = vmatprep.mubr.bf16.mxu0 %v2436_v29 }
  0x4e   :  { %2022 = vmatprep.mubr.bf16.mxu1 %v2448_v32 }
  0x4f   :  { %2037 = vmatpush3.bf16.msra.mxu0 %v2142_v50 }
  0x50   :  { %2069 = vmatpush3.bf16.msra.mxu1 %v2143_v51  ;;  %2038 = vmatprep.subr.bf16.mxu0 %v2144_v52 }
  0x51   :  { %2070 = vmatprep.subr.bf16.mxu1 %v2145_v53 }
  0x52   :  { %1991 = vmatmul.mubr.bf16.gmra.mxu0 %v2448_v32 }
  0x53   :  { %2023 = vmatmul.mubr.bf16.gmra.mxu1 %v2462_v35  ;;  %2039 = vmatpush3.bf16.msra.mxu0 %v2144_v52  ;;  %v2600_v52 = vld [vmem:[%s2793_s3 + $0x1] ss:$0 sm:$0xff] }
  0x54   :  { %2071 = vmatpush3.bf16.msra.mxu1 %v2145_v53  ;;  %2040 = vmatprep.subr.bf16.mxu0 %v2146_v54 }
  0x55   :  { %2072 = vmatprep.subr.bf16.mxu1 %v2147_v55  ;;  %1994 = vmatprep.mubr.bf16.mxu0 %v2462_v35 }
  0x56   :  { %2026 = vmatprep.mubr.bf16.mxu1 %v2474_v38 }
  0x57   :  { %2041 = vmatpush3.bf16.msra.mxu0 %v2146_v54 }
  0x58   :  { %2073 = vmatpush3.bf16.msra.mxu1 %v2147_v55  ;;  %2042 = vmatprep.subr.bf16.mxu0 %v2148_v56 }
  0x59   :  { %2074 = vmatprep.subr.bf16.mxu1 %v2149_v57 }
  0x5a   :  { %1995 = vmatmul.mubr.bf16.gmra.mxu0 %v2474_v38 }
  0x5b   :  { %2027 = vmatmul.mubr.bf16.gmra.mxu1 %v2485_v41  ;;  %2043 = vmatpush3.bf16.msra.mxu0 %v2148_v56 }
  0x5c   :  { %2075 = vmatpush3.bf16.msra.mxu1 %v2149_v57  ;;  %2044 = vmatprep.subr.bf16.mxu0 %v2150_v58 }
  0x5d   :  { %2076 = vmatprep.subr.bf16.mxu1 %v2151_v59  ;;  %2046 = vmatprep.mubr.bf16.mxu0 %v2374_v13 }
  0x5e   :  { %2078 = vmatprep.mubr.bf16.mxu1 %v2379_v14 }
  0x5f   :  { %2045 = vmatpush3.bf16.msra.mxu0 %v2150_v58 }
  0x60   :  { %2077 = vmatpush3.bf16.msra.mxu1 %v2151_v59 }
  0x62   :  { %2047 = vmatmul.mubr.bf16.vlgmr.msra.gmra.mxu0 %v2379_v14 }
  0x63   :  { %2079 = vmatmul.mubr.bf16.vlgmr.msra.gmra.mxu1 %v2404_v21  ;;  %2050 = vmatprep.mubr.bf16.mxu0 %v2404_v21 }
  0x64   :  { %2082 = vmatprep.mubr.bf16.mxu1 %v2416_v24 }
  0x6a   :  { %2051 = vmatmul.mubr.bf16.gmra.mxu0 %v2416_v24 }
  0x6b   :  { %2083 = vmatmul.mubr.bf16.gmra.mxu1 %v2436_v29  ;;  %2054 = vmatprep.mubr.bf16.mxu0 %v2436_v29 }
  0x6c   :  { %2086 = vmatprep.mubr.bf16.mxu1 %v2448_v32 }
  0x72   :  { %2055 = vmatmul.mubr.bf16.gmra.mxu0 %v2448_v32 }
  0x73   :  { %2087 = vmatmul.mubr.bf16.gmra.mxu1 %v2462_v35  ;;  %2058 = vmatprep.mubr.bf16.mxu0 %v2462_v35 }
  0x74   :  { %2090 = vmatprep.mubr.bf16.mxu1 %v2474_v38 }
  0x7a   :  { %2059 = vmatmul.mubr.bf16.gmra.mxu0 %v2474_v38 }
  0x7b   :  { %2091 = vmatmul.mubr.bf16.gmra.mxu1 %v2485_v41 }
  0xe2   :  { %v1920_v60 = vpop.f32.mrf.mxu0 }
  0xe3   :  { %v1952_v61 = vpop.f32.mrf.mxu1 }
  0xe4   :  { %v366_v62 = vadd.f32 %v1952_v61, %v1920_v60  ;;  %v206_v63 = vpop.f32.mrf.mxu0 }
  0xe5   :  { %v357_v0 = vpop.f32.mrf.mxu1 }
  0xe6   :  { %v358_v1 = vadd.f32 %v357_v0, %v206_v63  ;;  %v1921_v2 = vpop.f32.mrf.mxu0  ;;  %v429_v40 = vadd.f32 %v2582_v34, %v366_v62 }
  0xe7   :  { %v1953_v3 = vpop.f32.mrf.mxu1 }
  0xe8   :  { %v369_v4 = vadd.f32 %v1953_v3, %v1921_v2  ;;  %v209_v5 = vpop.f32.mrf.mxu0  ;;  %v427_v42 = vadd.f32 %v2582_v34, %v358_v1  ;;  %2152 = vtanh.f32 %v429_v40 }
  0xe9   :  { %v360_v6 = vpop.f32.mrf.mxu1 }
  0xea   :  { %v361_v7 = vadd.f32 %v360_v6, %v209_v5  ;;  %v1924_v8 = vpop.f32.mrf.mxu0  ;;  %v430_v45 = vadd.f32 %v2582_v34, %v369_v4  ;;  %2154 = vtanh.f32 %v427_v42 }
  0xeb   :  { %v1956_v9 = vpop.f32.mrf.mxu1 }
  0xec   :  { %v382_v10 = vadd.f32 %v1956_v9, %v1924_v8  ;;  %v222_v11 = vpop.f32.mrf.mxu0  ;;  %v428_v47 = vadd.f32 %v2582_v34, %v361_v7  ;;  %2156 = vtanh.f32 %v430_v45 }
  0xed   :  { %v373_v12 = vpop.f32.mrf.mxu1 }
  0xee   :  { %v374_v13 = vadd.f32 %v373_v12, %v222_v11  ;;  %v1925_v14 = vpop.f32.mrf.mxu0  ;;  %v433_v50 = vadd.f32 %v2582_v34, %v382_v10  ;;  %2158 = vtanh.f32 %v428_v47 }
  0xef   :  { %v1957_v15 = vpop.f32.mrf.mxu1 }
  0xf0   :  { %v385_v16 = vadd.f32 %v1957_v15, %v1925_v14  ;;  %v225_v17 = vpop.f32.mrf.mxu0  ;;  %v431_v53 = vadd.f32 %v2582_v34, %v374_v13  ;;  %2160 = vtanh.f32 %v433_v50 }
  0xf1   :  { %v376_v18 = vpop.f32.mrf.mxu1 }
  0xf2   :  { %v377_v19 = vadd.f32 %v376_v18, %v225_v17  ;;  %v1928_v20 = vpop.f32.mrf.mxu0  ;;  %v434_v56 = vadd.f32 %v2582_v34, %v385_v16  ;;  %2162 = vtanh.f32 %v431_v53 }
  0xf3   :  { %v1960_v21 = vpop.f32.mrf.mxu1 }
  0xf4   :  { %v398_v22 = vadd.f32 %v1960_v21, %v1928_v20  ;;  %v238_v23 = vpop.f32.mrf.mxu0  ;;  %v432_v61 = vadd.f32 %v2582_v34, %v377_v19  ;;  %2164 = vtanh.f32 %v434_v56 }
  0xf5   :  { %v389_v24 = vpop.f32.mrf.mxu1 }
  0xf6   :  { %v390_v25 = vadd.f32 %v389_v24, %v238_v23  ;;  %v1929_v26 = vpop.f32.mrf.mxu0  ;;  %v437_v3 = vadd.f32 %v2582_v34, %v398_v22  ;;  %v2616_v23 = vpop.eup %2152 }
  0xf7   :  { %v1961_v27 = vpop.f32.mrf.mxu1 }
  0xf8   :  { %v2575_v28 = vadd.f32 %v1961_v27, %v1929_v26  ;;  %v241_v29 = vpop.f32.mrf.mxu0  ;;  %v435_v9 = vadd.f32 %v2582_v34, %v390_v25 }
  0xf9   :  { %v392_v30 = vpop.f32.mrf.mxu1 }
  0xfa   :  { %v2577_v31 = vadd.f32 %v392_v30, %v241_v29  ;;  %v1932_v32 = vpop.f32.mrf.mxu0  ;;  %v438_v15 = vadd.f32 %v2582_v34, %v2575_v28  ;;  %v2619_v28 = vpop.eup %2154 }
  0xfb   :  { %v1964_v33 = vpop.f32.mrf.mxu1 }
  0xfc   :  { %v2584_v35 = vadd.f32 %v1964_v33, %v1932_v32  ;;  %v254_v36 = vpop.f32.mrf.mxu0  ;;  %v436_v21 = vadd.f32 %v2582_v34, %v2577_v31  ;;  %v2623_v32 = vpop.eup %2156 }
  0xfd   :  { %v405_v37 = vpop.f32.mrf.mxu1 }
  0xfe   :  { %v2586_v38 = vadd.f32 %v405_v37, %v254_v36  ;;  %v1933_v39 = vpop.f32.mrf.mxu0  ;;  %v441_v29 = vadd.f32 %v2582_v34, %v2584_v35 }
  0xff   :  { %v1965_v41 = vpop.f32.mrf.mxu1 }
 0x100   :  { %v2590_v43 = vadd.f32 %v1965_v41, %v1933_v39  ;;  %v257_v44 = vpop.f32.mrf.mxu0  ;;  %v2626_v39 = vpop.eup %2158  ;;  %v439_v40 = vadd.f32 %v2582_v34, %v2586_v38 }
 0x101   :  { %v408_v46 = vpop.f32.mrf.mxu1  ;;  %v2630_v42 = vpop.eup %2160 }
 0x102   :  { %v2594_v48 = vadd.f32 %v408_v46, %v257_v44  ;;  %v1984_v49 = vpop.f32.mrf.mxu0  ;;  %v2633_v47 = vpop.eup %2162 }
 0x103   :  { %v2016_v51 = vpop.f32.mrf.mxu1 }
 0x104   :  { %v727_v54 = vadd.f32 %v2016_v51, %v1984_v49  ;;  %v573_v55 = vpop.f32.mrf.mxu0  ;;  %v442_v49 = vadd.f32 %v2582_v34, %v2590_v43  ;;  %v2637_v51 = vpop.eup %2164 }
 0x105   :  { %v718_v57 = vpop.f32.mrf.mxu1 }
 0x106   :  { %v790_v58 = vadd.f32 %v2600_v52, %v727_v54  ;;  %v719_v59 = vadd.f32 %v718_v57, %v573_v55  ;;  %v1985_v60 = vpop.f32.mrf.mxu0 }
 0x107   :  { %v2017_v62 = vpop.f32.mrf.mxu1 }
 0x108   :  { %v1680_v63 = vmul.f32 -1.442695, %v790_v58  ;;  %v788_v0 = vadd.f32 %v2600_v52, %v719_v59  ;;  %v730_v1 = vadd.f32 %v2017_v62, %v1985_v60  ;;  %v576_v2 = vpop.f32.mrf.mxu0 }
 0x109   :  { %v721_v4 = vpop.f32.mrf.mxu1 }
 0x10a   :  { %2166 = vpow2.f32 %v1680_v63  ;;  %v1678_v5 = vmul.f32 -1.442695, %v788_v0  ;;  %v791_v6 = vadd.f32 %v2600_v52, %v730_v1  ;;  %v722_v7 = vadd.f32 %v721_v4, %v576_v2  ;;  %v1988_v8 = vpop.f32.mrf.mxu0 }
 0x10b   :  { %2168 = vtanh.f32 %v432_v61  ;;  %v2020_v10 = vpop.f32.mrf.mxu1 }
 0x10c   :  { %2170 = vpow2.f32 %v1678_v5  ;;  %v1681_v11 = vmul.f32 -1.442695, %v791_v6  ;;  %v789_v12 = vadd.f32 %v2600_v52, %v722_v7  ;;  %v743_v13 = vadd.f32 %v2020_v10, %v1988_v8  ;;  %v589_v14 = vpop.f32.mrf.mxu0 }
 0x10d   :  { %2172 = vtanh.f32 %v437_v3  ;;  %v734_v16 = vpop.f32.mrf.mxu1 }
 0x10e   :  { %2174 = vpow2.f32 %v1681_v11  ;;  %v1679_v17 = vmul.f32 -1.442695, %v789_v12  ;;  %v794_v18 = vadd.f32 %v2600_v52, %v743_v13  ;;  %v735_v19 = vadd.f32 %v734_v16, %v589_v14  ;;  %v1989_v20 = vpop.f32.mrf.mxu0 }
 0x10f   :  { %2176 = vtanh.f32 %v435_v9  ;;  %v2021_v22 = vpop.f32.mrf.mxu1 }
 0x110   :  { %2178 = vpow2.f32 %v1679_v17  ;;  %v1684_v24 = vmul.f32 -1.442695, %v794_v18  ;;  %v792_v25 = vadd.f32 %v2600_v52, %v735_v19  ;;  %v746_v26 = vadd.f32 %v2021_v22, %v1989_v20  ;;  %v592_v27 = vpop.f32.mrf.mxu0 }
 0x111   :  { %2180 = vtanh.f32 %v438_v15  ;;  %v737_v30 = vpop.f32.mrf.mxu1 }
 0x112   :  { %2182 = vpow2.f32 %v1684_v24  ;;  %v1682_v31 = vmul.f32 -1.442695, %v792_v25  ;;  %v795_v33 = vadd.f32 %v2600_v52, %v746_v26  ;;  %v738_v36 = vadd.f32 %v737_v30, %v592_v27  ;;  %v1992_v37 = vpop.f32.mrf.mxu0 }
 0x113   :  { %2184 = vtanh.f32 %v436_v21  ;;  %v2024_v41 = vpop.f32.mrf.mxu1 }
 0x114   :  { %2186 = vpow2.f32 %v1682_v31  ;;  %v1685_v35 = vmul.f32 -1.442695, %v795_v33  ;;  %v793_v44 = vadd.f32 %v2600_v52, %v738_v36  ;;  %v759_v45 = vadd.f32 %v2024_v41, %v1992_v37  ;;  %v605_v46 = vpop.f32.mrf.mxu0 }
 0x115   :  { %2188 = vtanh.f32 %v441_v29  ;;  %v750_v50 = vpop.f32.mrf.mxu1 }
 0x116   :  { %2190 = vpow2.f32 %v1685_v35  ;;  %v1683_v38 = vmul.f32 -1.442695, %v793_v44  ;;  %v798_v53 = vadd.f32 %v2600_v52, %v759_v45  ;;  %v751_v54 = vadd.f32 %v750_v50, %v605_v46  ;;  %v1993_v55 = vpop.f32.mrf.mxu0 }
 0x117   :  { %v2167_v56 = vpop.eup %2166  ;;  %2192 = vtanh.f32 %v439_v40  ;;  %v2025_v57 = vpop.f32.mrf.mxu1 }
 0x118   :  { %v2640_v58 = vpop.eup %2168  ;;  %v854_v59 = vadd.f32 1.0, %v2167_v56  ;;  %2194 = vpow2.f32 %v1683_v38  ;;  %v1688_v60 = vmul.f32 -1.442695, %v798_v53  ;;  %v796_v61 = vadd.f32 %v2600_v52, %v751_v54  ;;  %v608_v43 = vpop.f32.mrf.mxu0  ;;  %v2664_v56 = vld [vmem:[%s2793_s3 + $0x2] ss:$0 sm:$0xff] }
 0x119   :  { %v2171_v62 = vpop.eup %2170  ;;  %2196 = vtanh.f32 %v442_v49  ;;  %v762_v63 = vadd.f32 %v2025_v57, %v1993_v55  ;;  %v753_v0 = vpop.f32.mrf.mxu1 }
 0x11a   :  { %v2643_v1 = vpop.eup %2172  ;;  %2198 = vrcp.f32 %v854_v59  ;;  %v852_v2 = vadd.f32 1.0, %v2171_v62  ;;  %v1686_v3 = vmul.f32 -1.442695, %v796_v61  ;;  %v754_v4 = vadd.f32 %v753_v0, %v608_v43  ;;  %v1996_v5 = vpop.f32.mrf.mxu0 }
 0x11b   :  { %v2175_v6 = vpop.eup %2174  ;;  %2200 = vpow2.f32 %v1688_v60  ;;  %v799_v7 = vadd.f32 %v2600_v52, %v762_v63  ;;  %v2028_v8 = vpop.f32.mrf.mxu1  ;;  %v440_v60 = vadd.f32 %v2582_v34, %v2594_v48 }
 0x11c   :  { %v2646_v9 = vpop.eup %2176  ;;  %2202 = vrcp.f32 %v852_v2  ;;  %v855_v10 = vadd.f32 1.0, %v2175_v6  ;;  %v797_v11 = vadd.f32 %v2600_v52, %v754_v4  ;;  %v775_v12 = vadd.f32 %v2028_v8, %v1996_v5  ;;  %v621_v13 = vpop.f32.mrf.mxu0 }
 0x11d   :  { %v2179_v14 = vpop.eup %2178  ;;  %2204 = vpow2.f32 %v1686_v3  ;;  %v1689_v15 = vmul.f32 -1.442695, %v799_v7  ;;  %v766_v16 = vpop.f32.mrf.mxu1 }
 0x11e   :  { %v2649_v17 = vpop.eup %2180  ;;  %2206 = vrcp.f32 %v855_v10  ;;  %v853_v18 = vadd.f32 1.0, %v2179_v14  ;;  %v1687_v19 = vmul.f32 -1.442695, %v797_v11  ;;  %v802_v20 = vadd.f32 %v2600_v52, %v775_v12  ;;  %v1997_v21 = vpop.f32.mrf.mxu0 }
 0x11f   :  { %v2183_v22 = vpop.eup %2182  ;;  %2208 = vpow2.f32 %v1689_v15  ;;  %v767_v24 = vadd.f32 %v766_v16, %v621_v13  ;;  %v2029_v25 = vpop.f32.mrf.mxu1 }
 0x120   :  { %v2652_v26 = vpop.eup %2184  ;;  %2210 = vrcp.f32 %v853_v18  ;;  %v858_v27 = vadd.f32 1.0, %v2183_v22  ;;  %v1692_v29 = vmul.f32 -1.442695, %v802_v20  ;;  %v778_v30 = vadd.f32 %v2029_v25, %v1997_v21  ;;  %v624_v31 = vpop.f32.mrf.mxu0 }
 0x121   :  { %v2187_v33 = vpop.eup %2186  ;;  %2212 = vpow2.f32 %v1687_v19  ;;  %v800_v36 = vadd.f32 %v2600_v52, %v767_v24  ;;  %v769_v37 = vpop.f32.mrf.mxu1 }
 0x122   :  { %v2655_v40 = vpop.eup %2188  ;;  %2214 = vrcp.f32 %v858_v27  ;;  %v856_v41 = vadd.f32 1.0, %v2187_v33  ;;  %v803_v35 = vadd.f32 %v2600_v52, %v778_v30  ;;  %v770_v44 = vadd.f32 %v769_v37, %v624_v31  ;;  %v2048_v45 = vpop.f32.mrf.mxu0 }
 0x123   :  { %v2191_v46 = vpop.eup %2190  ;;  %2216 = vpow2.f32 %v1692_v29  ;;  %v1690_v49 = vmul.f32 -1.442695, %v800_v36  ;;  %v2080_v50 = vpop.f32.mrf.mxu1 }
 0x124   :  { %v2658_v38 = vpop.eup %2192  ;;  %2218 = vrcp.f32 %v856_v41  ;;  %v859_v53 = vadd.f32 1.0, %v2191_v46  ;;  %v1693_v54 = vmul.f32 -1.442695, %v803_v35  ;;  %v801_v55 = vadd.f32 %v2600_v52, %v770_v44  ;;  %v1078_v57 = vpop.f32.mrf.mxu0 }
 0x125   :  { %v2195_v59 = vpop.eup %2194  ;;  %2220 = vpow2.f32 %v1690_v49  ;;  %v1232_v61 = vadd.f32 %v2080_v50, %v2048_v45  ;;  %v1223_v43 = vpop.f32.mrf.mxu1 }
 0x126   :  { %v2668_v62 = vpop.eup %2196  ;;  %2222 = vrcp.f32 %v859_v53  ;;  %v857_v63 = vadd.f32 1.0, %v2195_v59  ;;  %v1691_v0 = vmul.f32 -1.442695, %v801_v55  ;;  %v1224_v2 = vadd.f32 %v1223_v43, %v1078_v57  ;;  %v2049_v52 = vpop.f32.mrf.mxu0 }
 0x127   :  { %v2199_v3 = vpop.eup %2198  ;;  %2224 = vpow2.f32 %v1693_v54  ;;  %v1295_v4 = vadd.f32 %v2664_v56, %v1232_v61  ;;  %v2081_v5 = vpop.f32.mrf.mxu1 }
 0x128   :  { %v2201_v6 = vpop.eup %2200  ;;  %2226 = vrcp.f32 %v857_v63  ;;  %v1293_v7 = vadd.f32 %v2664_v56, %v1224_v2  ;;  %v1081_v34 = vpop.f32.mrf.mxu0  ;;  %v1235_v11 = vadd.f32 %v2081_v5, %v2049_v52  ;;  %v902_v20 = vmul.f32 %v2199_v3, %v2616_v23 }
 0x129   :  { %v2203_v48 = vpop.eup %2202  ;;  %v862_v8 = vadd.f32 1.0, %v2201_v6  ;;  %2228 = vpow2.f32 %v1691_v0  ;;  %v1713_v10 = vmul.f32 -1.442695, %v1295_v4  ;;  %v1226_v12 = vpop.f32.mrf.mxu1  ;;  %v934_v33 = vsub.f32 1.0, %v2199_v3 }
 0x12a   :  { %v2205_v13 = vpop.eup %2204  ;;  %2230 = vtanh.f32 %v440_v60  ;;  %v932_v14 = vsub.f32 1.0, %v2203_v48  ;;  %v1711_v15 = vmul.f32 -1.442695, %v1293_v7  ;;  %v1227_v16 = vadd.f32 %v1226_v12, %v1081_v34  ;;  %v2052_v18 = vpop.f32.mrf.mxu0 }
 0x12b   :  { %v2207_v19 = vpop.eup %2206  ;;  %2232 = vrcp.f32 %v862_v8  ;;  %v860_v21 = vadd.f32 1.0, %v2205_v13  ;;  %v2084_v22 = vpop.f32.mrf.mxu1  ;;  %v900_v25 = vmul.f32 %v2203_v48, %v2619_v28  ;;  %v1296_v29 = vadd.f32 %v2664_v56, %v1235_v11 }
 0x12c   :  { %v2209_v24 = vpop.eup %2208  ;;  %v1429_v27 = vmul.f32 0.0, %v932_v14  ;;  %2234 = vpow2.f32 %v1713_v10  ;;  %v1094_v30 = vpop.f32.mrf.mxu0  ;;  %v903_v36 = vmul.f32 %v2207_v19, %v2623_v32  ;;  %v1294_v45 = vadd.f32 %v2664_v56, %v1227_v16 }
 0x12d   :  { %v2211_v31 = vpop.eup %2210  ;;  %2236 = vrcp.f32 %v860_v21  ;;  %v863_v37 = vadd.f32 1.0, %v2209_v24  ;;  %v1239_v41 = vpop.f32.mrf.mxu1  ;;  %v935_v49 = vsub.f32 1.0, %v2207_v19  ;;  %v1248_v53 = vadd.f32 %v2084_v22, %v2052_v18 }
 0x12e   :  { %v2213_v35 = vpop.eup %2212  ;;  %v2676_v23 = vadd.f32 %v1429_v27, %v900_v25  ;;  %v933_v44 = vsub.f32 1.0, %v2211_v31  ;;  %2238 = vpow2.f32 %v1711_v15  ;;  %v2053_v28 = vpop.f32.mrf.mxu0  ;;  %v901_v57 = vmul.f32 %v2211_v31, %v2626_v39 }
 0x12f   :  { %v2215_v46 = vpop.eup %2214  ;;  %2240 = vrcp.f32 %v863_v37  ;;  %v861_v50 = vadd.f32 1.0, %v2213_v35  ;;  %v2085_v54 = vpop.f32.mrf.mxu1  ;;  %v1714_v60 = vmul.f32 -1.442695, %v1296_v29  ;;  %v1299_v0 = vadd.f32 %v2664_v56, %v1248_v53 }
 0x130   :  { %v2217_v55 = vpop.eup %2216  ;;  %v1455_v32 = vmul.f32 %v2676_v23, %v934_v33  ;;  %v1430_v59 = vmul.f32 0.0, %v933_v44  ;;  %v1097_v61 = vpop.f32.mrf.mxu0  ;;  %v1240_v2 = vadd.f32 %v1239_v41, %v1094_v30  ;;  %v1712_v7 = vmul.f32 -1.442695, %v1294_v45 }
 0x131   :  { %v2219_v43 = vpop.eup %2218  ;;  %2242 = vrcp.f32 %v861_v50  ;;  %v866_v63 = vadd.f32 1.0, %v2217_v55  ;;  %v1242_v52 = vpop.f32.mrf.mxu1  ;;  %v906_v39 = vmul.f32 %v2215_v46, %v2630_v42  ;;  %v938_v8 = vsub.f32 1.0, %v2215_v46 }
 0x132   :  { %v2221_v3 = vpop.eup %2220  ;;  %v2682_v4 = vadd.f32 %v1430_v59, %v901_v57  ;;  %v936_v5 = vsub.f32 1.0, %v2219_v43  ;;  %v2684_v6 = vadd.f32 %v1455_v32, %v902_v20  ;;  %v2056_v34 = vpop.f32.mrf.mxu0  ;;  %v904_v10 = vmul.f32 %v2219_v43, %v2633_v47 }
 0x133   :  { %v2223_v48 = vpop.eup %2222  ;;  %v864_v11 = vadd.f32 1.0, %v2221_v3  ;;  %v2088_v12 = vpop.f32.mrf.mxu1  ;;  %2244 = vrcp.f32 %v866_v63  ;;  %v1717_v16 = vmul.f32 -1.442695, %v1299_v0  ;;  %v1297_v21 = vadd.f32 %v2664_v56, %v1240_v2 }
 0x134   :  { %v2225_v13 = vpop.eup %2224  ;;  %v1456_v14 = vmul.f32 %v2682_v4, %v935_v49  ;;  %v1481_v15 = vmul.f32 %v2684_v6, %v936_v5  ;;  %v1110_v18 = vpop.f32.mrf.mxu0  ;;  %v1251_v22 = vadd.f32 %v2085_v54, %v2053_v28  ;;  %v1243_v41 = vadd.f32 %v1242_v52, %v1097_v61 }
 0x135   :  { %v2227_v19 = vpop.eup %2226  ;;  %2246 = vrcp.f32 %v864_v11  ;;  %v867_v20 = vadd.f32 1.0, %v2225_v13  ;;  %v1255_v42 = vpop.f32.mrf.mxu1  ;;  %v1264_v46 = vadd.f32 %v2088_v12, %v2056_v34  ;;  %v939_v49 = vsub.f32 1.0, %v2223_v48 }
 0x136   :  { %v2229_v24 = vpop.eup %2228  ;;  %v2691_v25 = vadd.f32 %v1481_v15, %v904_v10  ;;  %v905_v47 = vmul.f32 %v2227_v19, %v2640_v58  ;;  %v937_v27 = vsub.f32 1.0, %v2227_v19  ;;  %v2694_v29 = vadd.f32 %v1456_v14, %v903_v36  ;;  %v2057_v30 = vpop.f32.mrf.mxu0 }
 0x137   :  { %v2696_v31 = vpop.eup %2230  ;;  %2248 = vrcp.f32 %v867_v20  ;;  %v865_v33 = vadd.f32 1.0, %v2229_v24  ;;  %v1300_v37 = vadd.f32 %v2664_v56, %v1251_v22  ;;  %v2089_v35 = vpop.f32.mrf.mxu1  ;;  %v907_v36 = vmul.f32 %v2223_v48, %v2637_v51 }
 0x138   :  { %v2233_v44 = vpop.eup %2232  ;;  %v1507_v45 = vmul.f32 %v2691_v25, %v938_v8  ;;  %v1482_v28 = vmul.f32 %v2694_v29, %v937_v27  ;;  %2250 = vpow2.f32 %v1714_v60  ;;  %v1715_v50 = vmul.f32 -1.442695, %v1297_v21  ;;  %v1113_v53 = vpop.f32.mrf.mxu0 }
 0x139   :  { %v2235_v58 = vpop.eup %2234  ;;  %2252 = vrcp.f32 %v865_v33  ;;  %v1258_v54 = vpop.f32.mrf.mxu1  ;;  %v1718_v60 = vmul.f32 -1.442695, %v1300_v37  ;;  %v1298_v63 = vadd.f32 %v2664_v56, %v1243_v41  ;;  %v910_v2 = vmul.f32 %v2233_v44, %v2643_v1 }
 0x13a   :  { %v2237_v55 = vpop.eup %2236  ;;  %v2702_v32 = vadd.f32 %v1482_v28, %v905_v47  ;;  %v2704_v57 = vadd.f32 %v1507_v45, %v906_v39  ;;  %v1359_v59 = vadd.f32 1.0, %v2235_v58  ;;  %2254 = vpow2.f32 %v1712_v7  ;;  %v2060_v7 = vpop.f32.mrf.mxu0 }
 0x13b   :  { %v2239_v61 = vpop.eup %2238  ;;  %v940_v43 = vsub.f32 1.0, %v2237_v55  ;;  %2256 = vpow2.f32 %v1717_v16  ;;  %v942_v52 = vsub.f32 1.0, %v2233_v44  ;;  %v1303_v3 = vadd.f32 %v2664_v56, %v1264_v46  ;;  %v2092_v39 = vpop.f32.mrf.mxu1 }
 0x13c   :  { %v2241_v0 = vpop.eup %2240  ;;  %v1508_v51 = vmul.f32 %v2702_v32, %v939_v49  ;;  %v908_v5 = vmul.f32 %v2237_v55, %v2646_v9  ;;  %v1357_v48 = vadd.f32 1.0, %v2239_v61  ;;  %2258 = vpow2.f32 %v1715_v50  ;;  %v1126_v24 = vpop.f32.mrf.mxu0 }
 0x13d   :  { %v1533_v34 = vmul.f32 %v2704_v57, %v940_v43  ;;  %2260 = vrcp.f32 %v1359_v59  ;;  %v1716_v11 = vmul.f32 -1.442695, %v1298_v63  ;;  %v1721_v12 = vmul.f32 -1.442695, %v1303_v3  ;;  %v1271_v47 = vpop.f32.mrf.mxu1 }
 0x13e   :  { %v2243_v8 = vpop.eup %2242  ;;  %v2712_v10 = vadd.f32 %v1508_v51, %v907_v36  ;;  %v911_v1 = vmul.f32 %v2241_v0, %v2649_v17  ;;  %2262 = vpow2.f32 %v1718_v60  ;;  %v1256_v9 = vadd.f32 %v1255_v42, %v1110_v18 }
 0x13f   :  { %v2714_v13 = vadd.f32 %v1533_v34, %v908_v5  ;;  %v941_v14 = vsub.f32 1.0, %v2243_v8  ;;  %2264 = vpow2.f32 %v1716_v11  ;;  %v1267_v15 = vadd.f32 %v2089_v35, %v2057_v30 }
 0x140   :  { %v1259_v16 = vadd.f32 %v1258_v54, %v1113_v53  ;;  %v2245_v19 = vpop.eup %2244  ;;  %v909_v21 = vmul.f32 %v2243_v8, %v2652_v26  ;;  %2266 = vrcp.f32 %v1357_v48  ;;  %v943_v33 = vsub.f32 1.0, %v2241_v0  ;;  %v2061_v53 = vpop.f32.mrf.mxu0 }
 0x141   :  { %v1559_v20 = vmul.f32 %v2714_v13, %v942_v52  ;;  %v1534_v22 = vmul.f32 %v2712_v10, %v941_v14  ;;  %2268 = vpow2.f32 %v1721_v12  ;;  %v1301_v17 = vadd.f32 %v2664_v56, %v1256_v9  ;;  %v2093_v54 = vpop.f32.mrf.mxu1 }
 0x142   :  { %v2247_v27 = vpop.eup %2246  ;;  %v1304_v37 = vadd.f32 %v2664_v56, %v1267_v15  ;;  %v1302_v41 = vadd.f32 %v2664_v56, %v1259_v16  ;;  %v914_v35 = vmul.f32 %v2245_v19, %v2655_v40  ;;  %v946_v44 = vsub.f32 1.0, %v2245_v19 }
 0x143   :  { %v2722_v18 = vadd.f32 %v1534_v22, %v909_v21  ;;  %v944_v42 = vsub.f32 1.0, %v2247_v27  ;;  %v2724_v30 = vadd.f32 %v1559_v20, %v910_v2  ;;  %v1719_v45 = vmul.f32 -1.442695, %v1301_v17 }
 0x144   :  { %v2249_v26 = vpop.eup %2248  ;;  %v1280_v28 = vadd.f32 %v2092_v39, %v2060_v7  ;;  %v912_v36 = vmul.f32 %v2247_v27, %v2658_v38  ;;  %v1722_v50 = vmul.f32 -1.442695, %v1304_v37  ;;  %v1272_v43 = vadd.f32 %v1271_v47, %v1126_v24  ;;  %v1129_v7 = vpop.f32.mrf.mxu0 }
 0x145   :  { %v2251_v46 = vpop.eup %2250  ;;  %v1560_v58 = vmul.f32 %v2722_v18, %v943_v33  ;;  %v1585_v49 = vmul.f32 %v2724_v30, %v944_v42  ;;  %2270 = vpow2.f32 %v1719_v45  ;;  %v1720_v51 = vmul.f32 -1.442695, %v1302_v41  ;;  %v1274_v39 = vpop.f32.mrf.mxu1 }
 0x146   :  { %v2253_v55 = vpop.eup %2252  ;;  %v1360_v59 = vadd.f32 1.0, %v2251_v46  ;;  %v1307_v61 = vadd.f32 %v2664_v56, %v1280_v28  ;;  %v1305_v3 = vadd.f32 %v2664_v56, %v1272_v43  ;;  %v947_v11 = vsub.f32 1.0, %v2249_v26 }
 0x147   :  { %v2255_v40 = vpop.eup %2254  ;;  %v2732_v60 = vadd.f32 %v1585_v49, %v912_v36  ;;  %v945_v63 = vsub.f32 1.0, %v2253_v55  ;;  %v2734_v0 = vadd.f32 %v1560_v58, %v911_v1  ;;  %v913_v38 = vmul.f32 %v2253_v55, %v2696_v31 }
 0x148   :  { %v2257_v2 = vpop.eup %2256  ;;  %2272 = vrcp.f32 %v1360_v59  ;;  %v1358_v52 = vadd.f32 1.0, %v2255_v40  ;;  %v1725_v12 = vmul.f32 -1.442695, %v1307_v61  ;;  %v1283_v1 = vadd.f32 %v2093_v54, %v2061_v53 }
 0x149   :  { %v1586_v5 = vmul.f32 %v2734_v0, %v945_v63  ;;  %v1363_v34 = vadd.f32 1.0, %v2257_v2  ;;  %2274 = vpow2.f32 %v1722_v50  ;;  %v1611_v48 = vmul.f32 %v2732_v60, %v946_v44  ;;  %v2259_v8 = vpop.eup %2258 }
 0x14a   :  { %2276 = vrcp.f32 %v1358_v52  ;;  %v2261_v14 = vpop.eup %2260  ;;  %v1361_v31 = vadd.f32 1.0, %v2259_v8  ;;  %v915_v19 = vmul.f32 %v2249_v26, %v2668_v62  ;;  %v1308_v20 = vadd.f32 %v2664_v56, %v1283_v1 }
 0x14b   :  { %v2740_v9 = vadd.f32 %v1586_v5, %v913_v38  ;;  %2278 = vrcp.f32 %v1363_v34  ;;  %v2742_v15 = vadd.f32 %v1611_v48, %v914_v35  ;;  %v2263_v16 = vpop.eup %2262  ;;  %v1275_v21 = vadd.f32 %v1274_v39, %v1129_v7 }
 0x14c   :  { %2280 = vpow2.f32 %v1720_v51  ;;  %v2265_v22 = vpop.eup %2264  ;;  %v1364_v24 = vadd.f32 1.0, %v2263_v16  ;;  %v1723_v47 = vmul.f32 -1.442695, %v1305_v3  ;;  %v1726_v41 = vmul.f32 -1.442695, %v1308_v20 }
 0x14d   :  { %2282 = vrcp.f32 %v1361_v31  ;;  %v1612_v27 = vmul.f32 %v2740_v9, %v947_v11  ;;  %v2267_v33 = vpop.eup %2266  ;;  %v1362_v17 = vadd.f32 1.0, %v2265_v22  ;;  %v1306_v37 = vadd.f32 %v2664_v56, %v1275_v21 }
 0x14e   :  { %2284 = vpow2.f32 %v1725_v12  ;;  %v2269_v42 = vpop.eup %2268  ;;  %v1463_v46 = vmul.f32 %v2261_v14, %v2684_v6  ;;  %v1437_v53 = vmul.f32 %v2267_v33, %v2676_v23 }
 0x14f   :  { %2286 = vrcp.f32 %v1364_v24  ;;  %v2748_v35 = vadd.f32 %v1612_v27, %v915_v19  ;;  %v1724_v62 = vmul.f32 -1.442695, %v1306_v37  ;;  %v1367_v44 = vadd.f32 1.0, %v2269_v42 }
 0x150   :  { %2288 = vrcp.f32 %v1362_v17 }
 0x151   :  { %2290 = vpow2.f32 %v1723_v47 }
 0x152   :  { %v2271_v26 = vpop.eup %2270  ;;  %2292 = vpow2.f32 %v1726_v41 }
 0x153   :  { %2294 = vpow2.f32 %v1724_v62  ;;  %v1365_v36 = vadd.f32 1.0, %v2271_v26 }
 0x154   :  { %2296 = vrcp.f32 %v1367_v44 }
 0x155   :  { %v2273_v45 = vpop.eup %2272 }
 0x156   :  { %v2275_v28 = vpop.eup %2274  ;;  %v1464_v58 = vmul.f32 %v2273_v45, %v2694_v29 }
 0x157   :  { %v2277_v56 = vpop.eup %2276  ;;  %v1368_v49 = vadd.f32 1.0, %v2275_v28 }
 0x158   :  { %v2279_v50 = vpop.eup %2278  ;;  %v1767_v54 = vpack.c.bf16 %v1464_v58, %v1463_v46  ;;  %v1438_v55 = vmul.f32 %v2277_v56, %v2682_v4 }
 0x159   :  { %v2281_v59 = vpop.eup %2280  ;;  %2298 = vrcp.f32 %v1368_v49  ;;  %v1515_v4 = vmul.f32 %v2279_v50, %v2704_v57 }
 0x15a   :  { %v2283_v61 = vpop.eup %2282  ;;  %1799 = vst [vmem:[%s2794_s4 + $0x8] sm:$0xff] %v1767_v54   ;;  %v1762_v6 = vpack.c.bf16 %v1438_v55, %v1437_v53  ;;  %2300 = vrcp.f32 %v1365_v36  ;;  %v1366_v29 = vadd.f32 1.0, %v2281_v59 }
 0x15b   :  { %v2285_v43 = vpop.eup %2284  ;;  %v1489_v38 = vmul.f32 %v2283_v61, %v2691_v25 }
 0x15c   :  { %v2287_v40 = vpop.eup %2286  ;;  %1763 = vst [vmem:[%s2794_s4] sm:$0xff] %v1762_v6   ;;  %2302 = vrcp.f32 %v1366_v29  ;;  %v1371_v51 = vadd.f32 1.0, %v2285_v43 }
 0x15d   :  { %v2289_v23 = vpop.eup %2288  ;;  %v1516_v63 = vmul.f32 %v2287_v40, %v2712_v10 }
 0x15e   :  { %v2291_v2 = vpop.eup %2290  ;;  %v1490_v52 = vmul.f32 %v2289_v23, %v2702_v32  ;;  %2304 = vrcp.f32 %v1371_v51 }
 0x15f   :  { %v1777_v3 = vpack.c.bf16 %v1516_v63, %v1515_v4  ;;  %v1369_v5 = vadd.f32 1.0, %v2291_v2  ;;  %v2293_v34 = vpop.eup %2292 }
 0x160   :  { %v1772_v48 = vpack.c.bf16 %v1490_v52, %v1489_v38  ;;  %v2295_v7 = vpop.eup %2294  ;;  %v1372_v39 = vadd.f32 1.0, %v2293_v34 }
 0x161   :  { %1801 = vst [vmem:[%s2794_s4 + $0x18] sm:$0xff] %v1777_v3   ;;  %2306 = vrcp.f32 %v1369_v5  ;;  %v1370_v57 = vadd.f32 1.0, %v2295_v7  ;;  %v2297_v25 = vpop.eup %2296 }
 0x162   :  { %1800 = vst [vmem:[%s2794_s4 + $0x10] sm:$0xff] %v1772_v48   ;;  %2308 = vrcp.f32 %v1372_v39  ;;  %v1567_v8 = vmul.f32 %v2297_v25, %v2724_v30 }
 0x163   :  { %2310 = vrcp.f32 %v1370_v57 }
 0x166   :  { %v2299_v32 = vpop.eup %2298 }
 0x167   :  { %v2301_v10 = vpop.eup %2300  ;;  %v1568_v11 = vmul.f32 %v2299_v32, %v2734_v0 }
 0x168   :  { %v1541_v14 = vmul.f32 %v2301_v10, %v2714_v13 }
 0x169   :  { %v2303_v12 = vpop.eup %2302  ;;  %v1787_v1 = vpack.c.bf16 %v1568_v11, %v1567_v8 }
 0x16a   :  { %v1542_v31 = vmul.f32 %v2303_v12, %v2722_v18 }
 0x16b   :  { %1803 = vst [vmem:[%s2794_s4 + $0x28] sm:$0xff] %v1787_v1   ;;  %v2305_v19 = vpop.eup %2304 }
 0x16c   :  { %v1782_v16 = vpack.c.bf16 %v1542_v31, %v1541_v14  ;;  %v1619_v0 = vmul.f32 %v2305_v19, %v2742_v15 }
 0x16e   :  { %1802 = vst [vmem:[%s2794_s4 + $0x20] sm:$0xff] %v1782_v16   ;;  %v2307_v20 = vpop.eup %2306 }
 0x16f   :  { %v2309_v30 = vpop.eup %2308  ;;  %v1593_v13 = vmul.f32 %v2307_v20, %v2732_v60 }
 0x170   :  { %v2311_v21 = vpop.eup %2310  ;;  %v1620_v22 = vmul.f32 %v2309_v30, %v2748_v35 }
 0x171   :  { %v1594_v18 = vmul.f32 %v2311_v21, %v2740_v9 }
 0x172   :  { %v1797_v24 = vpack.c.bf16 %v1620_v22, %v1619_v0 }
 0x173   :  { %v1792_v47 = vpack.c.bf16 %v1594_v18, %v1593_v13 }
 0x174   :  { %1805 = vst [vmem:[%s2794_s4 + $0x38] sm:$0xff] %v1797_v24  }
 0x175   :  { %1804 = vst [vmem:[%s2794_s4 + $0x30] sm:$0xff] %v1792_v47  }

// kernel: shared_language_model_forward.5
= control target key start
LH: loop header
LB: loop body
LE: loop exit
PB: predicated region body
PF: predicated region fallthrough
CT: control target
= control target key end

     0   :  { %v1610_v1 = vmov 0   ;;  %s2186_s1 = inlined_call_operand.vmem [shape: bf16[128,512], index: 1, kind: input, shape index: {}]   ;;  %s2187_s0 = inlined_call_operand.vmem [shape: bf16[256,128], index: 0, kind: input, shape index: {}]   ;;  %s2188_s2 = inlined_call_operand.vmem [shape: f32[256,512], index: 2, kind: output, shape index: {}]  }
   0x1   :  { %v1546_v0 = vld [vmem:[%s2186_s1 + $0xe4] ss:$16 sps:$4 sm:$0xff]   ;;  %624 = vmatprep.mubr.bf16.mxu0 %v1610_v1  ;;  %817 = vmatprep.mubr.bf16.mxu1 %v1610_v1  ;;  %v1548_v2 = vld [vmem:[%s2186_s1 + $0xec] ss:$16 sps:$4 sm:$0xff]   ;;  %v1550_v3 = vld [vmem:[%s2186_s1 + $0xe0] ss:$16 sps:$4 sm:$0xff]  }
   0x2   :  { %592 = vmatprep.subr.bf16.mxu0 %v1546_v0  ;;  %v1551_v4 = vld [vmem:[%s2186_s1 + $0xe8] ss:$16 sps:$4 sm:$0xff]   ;;  %785 = vmatprep.subr.bf16.mxu1 %v1548_v2  ;;  %v1552_v5 = vld [vmem:[%s2186_s1 + $0xc4] ss:$16 sps:$4 sm:$0xff]   ;;  %v1554_v6 = vld [vmem:[%s2186_s1 + $0xcc] ss:$16 sps:$4 sm:$0xff]  }
   0x3   :  { %593 = vmatpush1.bf16.msra.mxu0 %v1550_v3  ;;  %786 = vmatpush1.bf16.msra.mxu1 %v1551_v4  ;;  %v1556_v7 = vld [vmem:[%s2186_s1 + $0xc0] ss:$16 sps:$4 sm:$0xff]   ;;  %v1557_v8 = vld [vmem:[%s2186_s1 + $0xc8] ss:$16 sps:$4 sm:$0xff]   ;;  %v1558_v9 = vld [vmem:[%s2186_s1 + $0xa4] ss:$16 sps:$4 sm:$0xff]  }
   0x4   :  { %594 = vmatprep.subr.bf16.mxu0 %v1552_v5  ;;  %787 = vmatprep.subr.bf16.mxu1 %v1554_v6  ;;  %v1560_v10 = vld [vmem:[%s2186_s1 + $0xac] ss:$16 sps:$4 sm:$0xff]   ;;  %v1562_v11 = vld [vmem:[%s2186_s1 + $0xa0] ss:$16 sps:$4 sm:$0xff]   ;;  %v1563_v12 = vld [vmem:[%s2186_s1 + $0xa8] ss:$16 sps:$4 sm:$0xff]  }
   0x5   :  { %v1564_v13 = vld [vmem:[%s2186_s1 + $0x84] ss:$16 sps:$4 sm:$0xff]   ;;  %v1566_v14 = vld [vmem:[%s2186_s1 + $0x8c] ss:$16 sps:$4 sm:$0xff]   ;;  %v1568_v15 = vld [vmem:[%s2186_s1 + $0x80] ss:$16 sps:$4 sm:$0xff]  }
   0x6   :  { %v1569_v16 = vld [vmem:[%s2186_s1 + $0x88] ss:$16 sps:$4 sm:$0xff]   ;;  %v1570_v17 = vld [vmem:[%s2186_s1 + $0x64] ss:$16 sps:$4 sm:$0xff]   ;;  %v1572_v18 = vld [vmem:[%s2186_s1 + $0x6c] ss:$16 sps:$4 sm:$0xff]  }
   0x7   :  { %595 = vmatpush1.bf16.msra.mxu0 %v1556_v7  ;;  %788 = vmatpush1.bf16.msra.mxu1 %v1557_v8  ;;  %v1574_v19 = vld [vmem:[%s2186_s1 + $0x60] ss:$16 sps:$4 sm:$0xff]   ;;  %v1575_v20 = vld [vmem:[%s2186_s1 + $0x68] ss:$16 sps:$4 sm:$0xff]   ;;  %v1576_v21 = vld [vmem:[%s2186_s1 + $0x44] ss:$16 sps:$4 sm:$0xff]  }
   0x8   :  { %596 = vmatprep.subr.bf16.mxu0 %v1558_v9  ;;  %789 = vmatprep.subr.bf16.mxu1 %v1560_v10  ;;  %v1578_v22 = vld [vmem:[%s2186_s1 + $0x4c] ss:$16 sps:$4 sm:$0xff]   ;;  %v1580_v23 = vld [vmem:[%s2186_s1 + $0x40] ss:$16 sps:$4 sm:$0xff]   ;;  %v1581_v24 = vld [vmem:[%s2186_s1 + $0x48] ss:$16 sps:$4 sm:$0xff]  }
   0x9   :  { %v1582_v25 = vld [vmem:[%s2186_s1 + $0x24] ss:$16 sps:$4 sm:$0xff]   ;;  %v1584_v26 = vld [vmem:[%s2186_s1 + $0x2c] ss:$16 sps:$4 sm:$0xff]   ;;  %v1586_v27 = vld [vmem:[%s2186_s1 + $0x20] ss:$16 sps:$4 sm:$0xff]  }
   0xa   :  { %v1587_v28 = vld [vmem:[%s2186_s1 + $0x28] ss:$16 sps:$4 sm:$0xff]   ;;  %v1588_v29 = vld [vmem:[%s2186_s1 + $0x4] ss:$16 sps:$4 sm:$0xff]   ;;  %v1590_v30 = vld [vmem:[%s2186_s1 + $0xc] ss:$16 sps:$4 sm:$0xff]  }
   0xb   :  { %597 = vmatpush1.bf16.msra.mxu0 %v1562_v11  ;;  %790 = vmatpush1.bf16.msra.mxu1 %v1563_v12  ;;  %v1592_v31 = vld [vmem:[%s2186_s1] ss:$16 sps:$4 sm:$0xff]   ;;  %v1593_v32 = vld [vmem:[%s2186_s1 + $0x8] ss:$16 sps:$4 sm:$0xff]  }
   0xc   :  { %598 = vmatprep.subr.bf16.mxu0 %v1564_v13  ;;  %791 = vmatprep.subr.bf16.mxu1 %v1566_v14  ;;  %v1594_v33 = vld [vmem:[%s2187_s0] sm:$0xff]   ;;  %v1595_v34 = vld [vmem:[%s2187_s0 + $0x8] sm:$0xff]   ;;  %v1596_v35 = vld [vmem:[%s2187_s0 + $0x10] sm:$0xff]  }
   0xd   :  { %v1597_v36 = vld [vmem:[%s2187_s0 + $0x18] sm:$0xff]   ;;  %v1598_v37 = vld [vmem:[%s2187_s0 + $0x20] sm:$0xff]   ;;  %v1599_v38 = vld [vmem:[%s2187_s0 + $0x28] sm:$0xff]  }
   0xe   :  { %v1600_v39 = vld [vmem:[%s2187_s0 + $0x30] sm:$0xff]   ;;  %v1601_v40 = vld [vmem:[%s2187_s0 + $0x38] sm:$0xff]   ;;  %v1602_v41 = vld [vmem:[%s2187_s0 + $0x40] sm:$0xff]  }
   0xf   :  { %599 = vmatpush1.bf16.msra.mxu0 %v1568_v15  ;;  %792 = vmatpush1.bf16.msra.mxu1 %v1569_v16  ;;  %v1603_v42 = vld [vmem:[%s2187_s0 + $0x48] sm:$0xff]   ;;  %v1604_v43 = vld [vmem:[%s2187_s0 + $0x50] sm:$0xff]   ;;  %v1605_v44 = vld [vmem:[%s2187_s0 + $0x58] sm:$0xff]  }
  0x10   :  { %600 = vmatprep.subr.bf16.mxu0 %v1570_v17  ;;  %793 = vmatprep.subr.bf16.mxu1 %v1572_v18  ;;  %v1606_v45 = vld [vmem:[%s2187_s0 + $0x60] sm:$0xff]   ;;  %v1607_v46 = vld [vmem:[%s2187_s0 + $0x68] sm:$0xff]   ;;  %v1608_v47 = vld [vmem:[%s2187_s0 + $0x70] sm:$0xff]  }
  0x11   :  { %v1609_v48 = vld [vmem:[%s2187_s0 + $0x78] sm:$0xff]  }
  0x13   :  { %601 = vmatpush1.bf16.msra.mxu0 %v1574_v19  ;;  %794 = vmatpush1.bf16.msra.mxu1 %v1575_v20 }
  0x14   :  { %602 = vmatprep.subr.bf16.mxu0 %v1576_v21  ;;  %795 = vmatprep.subr.bf16.mxu1 %v1578_v22 }
  0x17   :  { %603 = vmatpush1.bf16.msra.mxu0 %v1580_v23  ;;  %796 = vmatpush1.bf16.msra.mxu1 %v1581_v24 }
  0x18   :  { %604 = vmatprep.subr.bf16.mxu0 %v1582_v25  ;;  %797 = vmatprep.subr.bf16.mxu1 %v1584_v26 }
  0x1b   :  { %605 = vmatpush1.bf16.msra.mxu0 %v1586_v27  ;;  %798 = vmatpush1.bf16.msra.mxu1 %v1587_v28 }
  0x1c   :  { %606 = vmatprep.subr.bf16.mxu0 %v1588_v29  ;;  %799 = vmatprep.subr.bf16.mxu1 %v1590_v30 }
  0x1f   :  { %607 = vmatpush1.bf16.msra.mxu0 %v1592_v31  ;;  %800 = vmatpush1.bf16.msra.mxu1 %v1593_v32 }
  0x22   :  { %625 = vmatmul.mubr.bf16.vlgmr.msra.gmra.mxu0 %v1594_v33  ;;  %818 = vmatmul.mubr.bf16.vlgmr.msra.gmra.mxu1 %v1594_v33 }
  0x23   :  { %634 = vmatprep.mubr.bf16.mxu0 %v1610_v1  ;;  %827 = vmatprep.mubr.bf16.mxu1 %v1610_v1 }
  0x2a   :  { %635 = vmatmul.mubr.bf16.gmra.mxu0 %v1595_v34  ;;  %828 = vmatmul.mubr.bf16.gmra.mxu1 %v1595_v34 }
  0x2b   :  { %644 = vmatprep.mubr.bf16.mxu0 %v1610_v1  ;;  %837 = vmatprep.mubr.bf16.mxu1 %v1610_v1 }
  0x32   :  { %645 = vmatmul.mubr.bf16.gmra.mxu0 %v1596_v35  ;;  %838 = vmatmul.mubr.bf16.gmra.mxu1 %v1596_v35 }
  0x33   :  { %654 = vmatprep.mubr.bf16.mxu0 %v1610_v1  ;;  %847 = vmatprep.mubr.bf16.mxu1 %v1610_v1 }
  0x3a   :  { %655 = vmatmul.mubr.bf16.gmra.mxu0 %v1597_v36  ;;  %848 = vmatmul.mubr.bf16.gmra.mxu1 %v1597_v36 }
  0x3b   :  { %664 = vmatprep.mubr.bf16.mxu0 %v1610_v1  ;;  %857 = vmatprep.mubr.bf16.mxu1 %v1610_v1 }
  0x42   :  { %665 = vmatmul.mubr.bf16.gmra.mxu0 %v1598_v37  ;;  %858 = vmatmul.mubr.bf16.gmra.mxu1 %v1598_v37 }
  0x43   :  { %674 = vmatprep.mubr.bf16.mxu0 %v1610_v1  ;;  %867 = vmatprep.mubr.bf16.mxu1 %v1610_v1 }
  0x4a   :  { %675 = vmatmul.mubr.bf16.gmra.mxu0 %v1599_v38  ;;  %868 = vmatmul.mubr.bf16.gmra.mxu1 %v1599_v38 }
  0x4b   :  { %684 = vmatprep.mubr.bf16.mxu0 %v1610_v1  ;;  %877 = vmatprep.mubr.bf16.mxu1 %v1610_v1 }
  0x52   :  { %685 = vmatmul.mubr.bf16.gmra.mxu0 %v1600_v39  ;;  %878 = vmatmul.mubr.bf16.gmra.mxu1 %v1600_v39 }
  0x53   :  { %694 = vmatprep.mubr.bf16.mxu0 %v1610_v1  ;;  %887 = vmatprep.mubr.bf16.mxu1 %v1610_v1 }
  0x5a   :  { %695 = vmatmul.mubr.bf16.gmra.mxu0 %v1601_v40  ;;  %888 = vmatmul.mubr.bf16.gmra.mxu1 %v1601_v40 }
  0x5b   :  { %704 = vmatprep.mubr.bf16.mxu0 %v1610_v1  ;;  %897 = vmatprep.mubr.bf16.mxu1 %v1610_v1 }
  0x62   :  { %705 = vmatmul.mubr.bf16.gmra.mxu0 %v1602_v41  ;;  %898 = vmatmul.mubr.bf16.gmra.mxu1 %v1602_v41 }
  0x63   :  { %714 = vmatprep.mubr.bf16.mxu0 %v1610_v1  ;;  %907 = vmatprep.mubr.bf16.mxu1 %v1610_v1 }
  0x6a   :  { %715 = vmatmul.mubr.bf16.gmra.mxu0 %v1603_v42  ;;  %908 = vmatmul.mubr.bf16.gmra.mxu1 %v1603_v42 }
  0x6b   :  { %724 = vmatprep.mubr.bf16.mxu0 %v1610_v1  ;;  %917 = vmatprep.mubr.bf16.mxu1 %v1610_v1 }
  0x72   :  { %725 = vmatmul.mubr.bf16.gmra.mxu0 %v1604_v43  ;;  %918 = vmatmul.mubr.bf16.gmra.mxu1 %v1604_v43 }
  0x73   :  { %734 = vmatprep.mubr.bf16.mxu0 %v1610_v1  ;;  %927 = vmatprep.mubr.bf16.mxu1 %v1610_v1 }
  0x7a   :  { %735 = vmatmul.mubr.bf16.gmra.mxu0 %v1605_v44  ;;  %928 = vmatmul.mubr.bf16.gmra.mxu1 %v1605_v44 }
  0x7b   :  { %744 = vmatprep.mubr.bf16.mxu0 %v1610_v1  ;;  %937 = vmatprep.mubr.bf16.mxu1 %v1610_v1 }
  0x82   :  { %745 = vmatmul.mubr.bf16.gmra.mxu0 %v1606_v45  ;;  %938 = vmatmul.mubr.bf16.gmra.mxu1 %v1606_v45 }
  0x83   :  { %754 = vmatprep.mubr.bf16.mxu0 %v1610_v1  ;;  %947 = vmatprep.mubr.bf16.mxu1 %v1610_v1 }
  0x8a   :  { %755 = vmatmul.mubr.bf16.gmra.mxu0 %v1607_v46  ;;  %948 = vmatmul.mubr.bf16.gmra.mxu1 %v1607_v46 }
  0x8b   :  { %764 = vmatprep.mubr.bf16.mxu0 %v1610_v1  ;;  %957 = vmatprep.mubr.bf16.mxu1 %v1610_v1 }
  0x92   :  { %765 = vmatmul.mubr.bf16.gmra.mxu0 %v1608_v47  ;;  %958 = vmatmul.mubr.bf16.gmra.mxu1 %v1608_v47 }
  0x93   :  { %774 = vmatprep.mubr.bf16.mxu0 %v1610_v1  ;;  %967 = vmatprep.mubr.bf16.mxu1 %v1610_v1 }
  0x9a   :  { %775 = vmatmul.mubr.bf16.gmra.mxu0 %v1609_v48  ;;  %968 = vmatmul.mubr.bf16.gmra.mxu1 %v1609_v48 }
  0xe2   :  { %v626_v49 = vpop.f32.mrf.mxu0  ;;  %v819_v50 = vpop.f32.mrf.mxu1 }
  0xe3   :  { %1365 = vst [vmem:[%s2188_s2] sm:$0xff] %v626_v49  ;;  %1367 = vst [vmem:[%s2188_s2 + $0x10] sm:$0xff] %v819_v50 }
  0xe4   :  { %v628_v51 = vpop.f32.mrf.mxu0  ;;  %v821_v52 = vpop.f32.mrf.mxu1 }
  0xe5   :  { %1366 = vst [vmem:[%s2188_s2 + $0x8] sm:$0xff] %v628_v51  ;;  %1368 = vst [vmem:[%s2188_s2 + $0x18] sm:$0xff] %v821_v52 }
  0xe6   :  { %v630_v53 = vpop.f32.mrf.mxu0  ;;  %v823_v54 = vpop.f32.mrf.mxu1 }
  0xe7   :  { %1369 = vst [vmem:[%s2188_s2 + $0x20] sm:$0xff] %v630_v53  ;;  %1371 = vst [vmem:[%s2188_s2 + $0x30] sm:$0xff] %v823_v54 }
  0xe8   :  { %v632_v55 = vpop.f32.mrf.mxu0  ;;  %v825_v56 = vpop.f32.mrf.mxu1 }
  0xe9   :  { %1370 = vst [vmem:[%s2188_s2 + $0x28] sm:$0xff] %v632_v55  ;;  %1372 = vst [vmem:[%s2188_s2 + $0x38] sm:$0xff] %v825_v56 }
  0xea   :  { %v636_v57 = vpop.f32.mrf.mxu0  ;;  %v829_v58 = vpop.f32.mrf.mxu1 }
  0xeb   :  { %1373 = vst [vmem:[%s2188_s2 + $0x40] sm:$0xff] %v636_v57  ;;  %1375 = vst [vmem:[%s2188_s2 + $0x50] sm:$0xff] %v829_v58 }
  0xec   :  { %v638_v59 = vpop.f32.mrf.mxu0  ;;  %v831_v60 = vpop.f32.mrf.mxu1 }
  0xed   :  { %1374 = vst [vmem:[%s2188_s2 + $0x48] sm:$0xff] %v638_v59  ;;  %1376 = vst [vmem:[%s2188_s2 + $0x58] sm:$0xff] %v831_v60 }
  0xee   :  { %v640_v61 = vpop.f32.mrf.mxu0  ;;  %v833_v62 = vpop.f32.mrf.mxu1 }
  0xef   :  { %1377 = vst [vmem:[%s2188_s2 + $0x60] sm:$0xff] %v640_v61  ;;  %1379 = vst [vmem:[%s2188_s2 + $0x70] sm:$0xff] %v833_v62 }
  0xf0   :  { %v642_v63 = vpop.f32.mrf.mxu0  ;;  %v835_v0 = vpop.f32.mrf.mxu1 }
  0xf1   :  { %1378 = vst [vmem:[%s2188_s2 + $0x68] sm:$0xff] %v642_v63  ;;  %1380 = vst [vmem:[%s2188_s2 + $0x78] sm:$0xff] %v835_v0 }
  0xf2   :  { %v646_v1 = vpop.f32.mrf.mxu0  ;;  %v839_v2 = vpop.f32.mrf.mxu1 }
  0xf3   :  { %1381 = vst [vmem:[%s2188_s2 + $0x80] sm:$0xff] %v646_v1  ;;  %1383 = vst [vmem:[%s2188_s2 + $0x90] sm:$0xff] %v839_v2 }
  0xf4   :  { %v648_v3 = vpop.f32.mrf.mxu0  ;;  %v841_v4 = vpop.f32.mrf.mxu1 }
  0xf5   :  { %1382 = vst [vmem:[%s2188_s2 + $0x88] sm:$0xff] %v648_v3  ;;  %1384 = vst [vmem:[%s2188_s2 + $0x98] sm:$0xff] %v841_v4 }
  0xf6   :  { %v650_v5 = vpop.f32.mrf.mxu0  ;;  %v843_v6 = vpop.f32.mrf.mxu1 }
  0xf7   :  { %1385 = vst [vmem:[%s2188_s2 + $0xa0] sm:$0xff] %v650_v5  ;;  %1387 = vst [vmem:[%s2188_s2 + $0xb0] sm:$0xff] %v843_v6 }
  0xf8   :  { %v652_v7 = vpop.f32.mrf.mxu0  ;;  %v845_v8 = vpop.f32.mrf.mxu1 }
  0xf9   :  { %1386 = vst [vmem:[%s2188_s2 + $0xa8] sm:$0xff] %v652_v7  ;;  %1388 = vst [vmem:[%s2188_s2 + $0xb8] sm:$0xff] %v845_v8 }
  0xfa   :  { %v656_v9 = vpop.f32.mrf.mxu0  ;;  %v849_v10 = vpop.f32.mrf.mxu1 }
  0xfb   :  { %1389 = vst [vmem:[%s2188_s2 + $0xc0] sm:$0xff] %v656_v9  ;;  %1391 = vst [vmem:[%s2188_s2 + $0xd0] sm:$0xff] %v849_v10 }
  0xfc   :  { %v658_v11 = vpop.f32.mrf.mxu0  ;;  %v851_v12 = vpop.f32.mrf.mxu1 }
  0xfd   :  { %1390 = vst [vmem:[%s2188_s2 + $0xc8] sm:$0xff] %v658_v11  ;;  %1392 = vst [vmem:[%s2188_s2 + $0xd8] sm:$0xff] %v851_v12 }
  0xfe   :  { %v660_v13 = vpop.f32.mrf.mxu0  ;;  %v853_v14 = vpop.f32.mrf.mxu1 }
  0xff   :  { %1393 = vst [vmem:[%s2188_s2 + $0xe0] sm:$0xff] %v660_v13  ;;  %1395 = vst [vmem:[%s2188_s2 + $0xf0] sm:$0xff] %v853_v14 }
 0x100   :  { %v662_v15 = vpop.f32.mrf.mxu0  ;;  %v855_v16 = vpop.f32.mrf.mxu1 }
 0x101   :  { %1394 = vst [vmem:[%s2188_s2 + $0xe8] sm:$0xff] %v662_v15  ;;  %1396 = vst [vmem:[%s2188_s2 + $0xf8] sm:$0xff] %v855_v16 }
 0x102   :  { %v666_v17 = vpop.f32.mrf.mxu0  ;;  %v859_v18 = vpop.f32.mrf.mxu1 }
 0x103   :  { %1397 = vst [vmem:[%s2188_s2 + $0x100] sm:$0xff] %v666_v17  ;;  %1399 = vst [vmem:[%s2188_s2 + $0x110] sm:$0xff] %v859_v18 }
 0x104   :  { %v668_v19 = vpop.f32.mrf.mxu0  ;;  %v861_v20 = vpop.f32.mrf.mxu1 }
 0x105   :  { %1398 = vst [vmem:[%s2188_s2 + $0x108] sm:$0xff] %v668_v19  ;;  %1400 = vst [vmem:[%s2188_s2 + $0x118] sm:$0xff] %v861_v20 }
 0x106   :  { %v670_v21 = vpop.f32.mrf.mxu0  ;;  %v863_v22 = vpop.f32.mrf.mxu1 }
 0x107   :  { %1401 = vst [vmem:[%s2188_s2 + $0x120] sm:$0xff] %v670_v21  ;;  %1403 = vst [vmem:[%s2188_s2 + $0x130] sm:$0xff] %v863_v22 }
 0x108   :  { %v672_v23 = vpop.f32.mrf.mxu0  ;;  %v865_v24 = vpop.f32.mrf.mxu1 }
 0x109   :  { %1402 = vst [vmem:[%s2188_s2 + $0x128] sm:$0xff] %v672_v23  ;;  %1404 = vst [vmem:[%s2188_s2 + $0x138] sm:$0xff] %v865_v24 }
 0x10a   :  { %v676_v25 = vpop.f32.mrf.mxu0  ;;  %v869_v26 = vpop.f32.mrf.mxu1 }
 0x10b   :  { %1405 = vst [vmem:[%s2188_s2 + $0x140] sm:$0xff] %v676_v25  ;;  %1407 = vst [vmem:[%s2188_s2 + $0x150] sm:$0xff] %v869_v26 }
 0x10c   :  { %v678_v27 = vpop.f32.mrf.mxu0  ;;  %v871_v28 = vpop.f32.mrf.mxu1 }
 0x10d   :  { %1406 = vst [vmem:[%s2188_s2 + $0x148] sm:$0xff] %v678_v27  ;;  %1408 = vst [vmem:[%s2188_s2 + $0x158] sm:$0xff] %v871_v28 }
 0x10e   :  { %v680_v29 = vpop.f32.mrf.mxu0  ;;  %v873_v30 = vpop.f32.mrf.mxu1 }
 0x10f   :  { %1409 = vst [vmem:[%s2188_s2 + $0x160] sm:$0xff] %v680_v29  ;;  %1411 = vst [vmem:[%s2188_s2 + $0x170] sm:$0xff] %v873_v30 }
 0x110   :  { %v682_v31 = vpop.f32.mrf.mxu0  ;;  %v875_v32 = vpop.f32.mrf.mxu1 }
 0x111   :  { %1410 = vst [vmem:[%s2188_s2 + $0x168] sm:$0xff] %v682_v31  ;;  %1412 = vst [vmem:[%s2188_s2 + $0x178] sm:$0xff] %v875_v32 }
 0x112   :  { %v686_v33 = vpop.f32.mrf.mxu0  ;;  %v879_v34 = vpop.f32.mrf.mxu1 }
 0x113   :  { %1413 = vst [vmem:[%s2188_s2 + $0x180] sm:$0xff] %v686_v33  ;;  %1415 = vst [vmem:[%s2188_s2 + $0x190] sm:$0xff] %v879_v34 }
 0x114   :  { %v688_v35 = vpop.f32.mrf.mxu0  ;;  %v881_v36 = vpop.f32.mrf.mxu1 }
 0x115   :  { %1414 = vst [vmem:[%s2188_s2 + $0x188] sm:$0xff] %v688_v35  ;;  %1416 = vst [vmem:[%s2188_s2 + $0x198] sm:$0xff] %v881_v36 }
 0x116   :  { %v690_v37 = vpop.f32.mrf.mxu0  ;;  %v883_v38 = vpop.f32.mrf.mxu1 }
 0x117   :  { %1417 = vst [vmem:[%s2188_s2 + $0x1a0] sm:$0xff] %v690_v37  ;;  %1419 = vst [vmem:[%s2188_s2 + $0x1b0] sm:$0xff] %v883_v38 }
 0x118   :  { %v692_v39 = vpop.f32.mrf.mxu0  ;;  %v885_v40 = vpop.f32.mrf.mxu1 }
 0x119   :  { %1418 = vst [vmem:[%s2188_s2 + $0x1a8] sm:$0xff] %v692_v39  ;;  %1420 = vst [vmem:[%s2188_s2 + $0x1b8] sm:$0xff] %v885_v40 }
 0x11a   :  { %v696_v41 = vpop.f32.mrf.mxu0  ;;  %v889_v42 = vpop.f32.mrf.mxu1 }
 0x11b   :  { %1421 = vst [vmem:[%s2188_s2 + $0x1c0] sm:$0xff] %v696_v41  ;;  %1423 = vst [vmem:[%s2188_s2 + $0x1d0] sm:$0xff] %v889_v42 }
 0x11c   :  { %v698_v43 = vpop.f32.mrf.mxu0  ;;  %v891_v44 = vpop.f32.mrf.mxu1 }
 0x11d   :  { %1422 = vst [vmem:[%s2188_s2 + $0x1c8] sm:$0xff] %v698_v43  ;;  %1424 = vst [vmem:[%s2188_s2 + $0x1d8] sm:$0xff] %v891_v44 }
 0x11e   :  { %v700_v45 = vpop.f32.mrf.mxu0  ;;  %v893_v46 = vpop.f32.mrf.mxu1 }
 0x11f   :  { %1425 = vst [vmem:[%s2188_s2 + $0x1e0] sm:$0xff] %v700_v45  ;;  %1427 = vst [vmem:[%s2188_s2 + $0x1f0] sm:$0xff] %v893_v46 }
 0x120   :  { %v702_v47 = vpop.f32.mrf.mxu0  ;;  %v895_v48 = vpop.f32.mrf.mxu1 }
 0x121   :  { %1426 = vst [vmem:[%s2188_s2 + $0x1e8] sm:$0xff] %v702_v47  ;;  %1428 = vst [vmem:[%s2188_s2 + $0x1f8] sm:$0xff] %v895_v48 }
 0x122   :  { %v706_v49 = vpop.f32.mrf.mxu0  ;;  %v899_v50 = vpop.f32.mrf.mxu1 }
 0x123   :  { %1429 = vst [vmem:[%s2188_s2 + $0x200] sm:$0xff] %v706_v49  ;;  %1431 = vst [vmem:[%s2188_s2 + $0x210] sm:$0xff] %v899_v50 }
 0x124   :  { %v708_v51 = vpop.f32.mrf.mxu0  ;;  %v901_v52 = vpop.f32.mrf.mxu1 }
 0x125   :  { %1430 = vst [vmem:[%s2188_s2 + $0x208] sm:$0xff] %v708_v51  ;;  %1432 = vst [vmem:[%s2188_s2 + $0x218] sm:$0xff] %v901_v52 }
 0x126   :  { %v710_v53 = vpop.f32.mrf.mxu0  ;;  %v903_v54 = vpop.f32.mrf.mxu1 }
 0x127   :  { %1433 = vst [vmem:[%s2188_s2 + $0x220] sm:$0xff] %v710_v53  ;;  %1435 = vst [vmem:[%s2188_s2 + $0x230] sm:$0xff] %v903_v54 }
 0x128   :  { %v712_v55 = vpop.f32.mrf.mxu0  ;;  %v905_v56 = vpop.f32.mrf.mxu1 }
 0x129   :  { %1434 = vst [vmem:[%s2188_s2 + $0x228] sm:$0xff] %v712_v55  ;;  %1436 = vst [vmem:[%s2188_s2 + $0x238] sm:$0xff] %v905_v56 }
 0x12a   :  { %v716_v57 = vpop.f32.mrf.mxu0  ;;  %v909_v58 = vpop.f32.mrf.mxu1 }
 0x12b   :  { %1437 = vst [vmem:[%s2188_s2 + $0x240] sm:$0xff] %v716_v57  ;;  %1439 = vst [vmem:[%s2188_s2 + $0x250] sm:$0xff] %v909_v58 }
 0x12c   :  { %v718_v59 = vpop.f32.mrf.mxu0  ;;  %v911_v60 = vpop.f32.mrf.mxu1 }
 0x12d   :  { %1438 = vst [vmem:[%s2188_s2 + $0x248] sm:$0xff] %v718_v59  ;;  %1440 = vst [vmem:[%s2188_s2 + $0x258] sm:$0xff] %v911_v60 }
 0x12e   :  { %v720_v61 = vpop.f32.mrf.mxu0  ;;  %v913_v62 = vpop.f32.mrf.mxu1 }
 0x12f   :  { %1441 = vst [vmem:[%s2188_s2 + $0x260] sm:$0xff] %v720_v61  ;;  %1443 = vst [vmem:[%s2188_s2 + $0x270] sm:$0xff] %v913_v62 }
 0x130   :  { %v722_v63 = vpop.f32.mrf.mxu0  ;;  %v915_v0 = vpop.f32.mrf.mxu1 }
 0x131   :  { %1442 = vst [vmem:[%s2188_s2 + $0x268] sm:$0xff] %v722_v63  ;;  %1444 = vst [vmem:[%s2188_s2 + $0x278] sm:$0xff] %v915_v0 }
 0x132   :  { %v726_v1 = vpop.f32.mrf.mxu0  ;;  %v919_v2 = vpop.f32.mrf.mxu1 }
 0x133   :  { %1445 = vst [vmem:[%s2188_s2 + $0x280] sm:$0xff] %v726_v1  ;;  %1447 = vst [vmem:[%s2188_s2 + $0x290] sm:$0xff] %v919_v2 }
 0x134   :  { %v728_v3 = vpop.f32.mrf.mxu0  ;;  %v921_v4 = vpop.f32.mrf.mxu1 }
 0x135   :  { %1446 = vst [vmem:[%s2188_s2 + $0x288] sm:$0xff] %v728_v3  ;;  %1448 = vst [vmem:[%s2188_s2 + $0x298] sm:$0xff] %v921_v4 }
 0x136   :  { %v730_v5 = vpop.f32.mrf.mxu0  ;;  %v923_v6 = vpop.f32.mrf.mxu1 }
 0x137   :  { %1449 = vst [vmem:[%s2188_s2 + $0x2a0] sm:$0xff] %v730_v5  ;;  %1451 = vst [vmem:[%s2188_s2 + $0x2b0] sm:$0xff] %v923_v6 }
 0x138   :  { %v732_v7 = vpop.f32.mrf.mxu0  ;;  %v925_v8 = vpop.f32.mrf.mxu1 }
 0x139   :  { %1450 = vst [vmem:[%s2188_s2 + $0x2a8] sm:$0xff] %v732_v7  ;;  %1452 = vst [vmem:[%s2188_s2 + $0x2b8] sm:$0xff] %v925_v8 }
 0x13a   :  { %v736_v9 = vpop.f32.mrf.mxu0  ;;  %v929_v10 = vpop.f32.mrf.mxu1 }
 0x13b   :  { %1453 = vst [vmem:[%s2188_s2 + $0x2c0] sm:$0xff] %v736_v9  ;;  %1455 = vst [vmem:[%s2188_s2 + $0x2d0] sm:$0xff] %v929_v10 }
 0x13c   :  { %v738_v11 = vpop.f32.mrf.mxu0  ;;  %v931_v12 = vpop.f32.mrf.mxu1 }
 0x13d   :  { %1454 = vst [vmem:[%s2188_s2 + $0x2c8] sm:$0xff] %v738_v11  ;;  %1456 = vst [vmem:[%s2188_s2 + $0x2d8] sm:$0xff] %v931_v12 }
 0x13e   :  { %v740_v13 = vpop.f32.mrf.mxu0  ;;  %v933_v14 = vpop.f32.mrf.mxu1 }
 0x13f   :  { %1457 = vst [vmem:[%s2188_s2 + $0x2e0] sm:$0xff] %v740_v13  ;;  %1459 = vst [vmem:[%s2188_s2 + $0x2f0] sm:$0xff] %v933_v14 }
 0x140   :  { %v742_v15 = vpop.f32.mrf.mxu0  ;;  %v935_v16 = vpop.f32.mrf.mxu1 }
 0x141   :  { %1458 = vst [vmem:[%s2188_s2 + $0x2e8] sm:$0xff] %v742_v15  ;;  %1460 = vst [vmem:[%s2188_s2 + $0x2f8] sm:$0xff] %v935_v16 }
 0x142   :  { %v746_v17 = vpop.f32.mrf.mxu0  ;;  %v939_v18 = vpop.f32.mrf.mxu1 }
 0x143   :  { %1461 = vst [vmem:[%s2188_s2 + $0x300] sm:$0xff] %v746_v17  ;;  %1463 = vst [vmem:[%s2188_s2 + $0x310] sm:$0xff] %v939_v18 }
 0x144   :  { %v748_v19 = vpop.f32.mrf.mxu0  ;;  %v941_v20 = vpop.f32.mrf.mxu1 }
 0x145   :  { %1462 = vst [vmem:[%s2188_s2 + $0x308] sm:$0xff] %v748_v19  ;;  %1464 = vst [vmem:[%s2188_s2 + $0x318] sm:$0xff] %v941_v20 }
 0x146   :  { %v750_v21 = vpop.f32.mrf.mxu0  ;;  %v943_v22 = vpop.f32.mrf.mxu1 }
 0x147   :  { %1465 = vst [vmem:[%s2188_s2 + $0x320] sm:$0xff] %v750_v21  ;;  %1467 = vst [vmem:[%s2188_s2 + $0x330] sm:$0xff] %v943_v22 }
 0x148   :  { %v752_v23 = vpop.f32.mrf.mxu0  ;;  %v945_v24 = vpop.f32.mrf.mxu1 }
 0x149   :  { %1466 = vst [vmem:[%s2188_s2 + $0x328] sm:$0xff] %v752_v23  ;;  %1468 = vst [vmem:[%s2188_s2 + $0x338] sm:$0xff] %v945_v24 }
 0x14a   :  { %v756_v25 = vpop.f32.mrf.mxu0  ;;  %v949_v26 = vpop.f32.mrf.mxu1 }
 0x14b   :  { %1469 = vst [vmem:[%s2188_s2 + $0x340] sm:$0xff] %v756_v25  ;;  %1471 = vst [vmem:[%s2188_s2 + $0x350] sm:$0xff] %v949_v26 }
 0x14c   :  { %v758_v27 = vpop.f32.mrf.mxu0  ;;  %v951_v28 = vpop.f32.mrf.mxu1 }
 0x14d   :  { %1470 = vst [vmem:[%s2188_s2 + $0x348] sm:$0xff] %v758_v27  ;;  %1472 = vst [vmem:[%s2188_s2 + $0x358] sm:$0xff] %v951_v28 }
 0x14e   :  { %v760_v29 = vpop.f32.mrf.mxu0  ;;  %v953_v30 = vpop.f32.mrf.mxu1 }
 0x14f   :  { %1473 = vst [vmem:[%s2188_s2 + $0x360] sm:$0xff] %v760_v29  ;;  %1475 = vst [vmem:[%s2188_s2 + $0x370] sm:$0xff] %v953_v30 }
 0x150   :  { %v762_v31 = vpop.f32.mrf.mxu0  ;;  %v955_v32 = vpop.f32.mrf.mxu1 }
 0x151   :  { %1474 = vst [vmem:[%s2188_s2 + $0x368] sm:$0xff] %v762_v31  ;;  %1476 = vst [vmem:[%s2188_s2 + $0x378] sm:$0xff] %v955_v32 }
 0x152   :  { %v766_v33 = vpop.f32.mrf.mxu0  ;;  %v959_v34 = vpop.f32.mrf.mxu1 }
 0x153   :  { %1477 = vst [vmem:[%s2188_s2 + $0x380] sm:$0xff] %v766_v33  ;;  %1479 = vst [vmem:[%s2188_s2 + $0x390] sm:$0xff] %v959_v34 }
 0x154   :  { %v768_v35 = vpop.f32.mrf.mxu0  ;;  %v961_v36 = vpop.f32.mrf.mxu1 }
 0x155   :  { %1478 = vst [vmem:[%s2188_s2 + $0x388] sm:$0xff] %v768_v35  ;;  %1480 = vst [vmem:[%s2188_s2 + $0x398] sm:$0xff] %v961_v36 }
 0x156   :  { %v770_v37 = vpop.f32.mrf.mxu0  ;;  %v963_v38 = vpop.f32.mrf.mxu1 }
 0x157   :  { %1481 = vst [vmem:[%s2188_s2 + $0x3a0] sm:$0xff] %v770_v37  ;;  %1483 = vst [vmem:[%s2188_s2 + $0x3b0] sm:$0xff] %v963_v38 }
 0x158   :  { %v772_v39 = vpop.f32.mrf.mxu0  ;;  %v965_v40 = vpop.f32.mrf.mxu1 }
 0x159   :  { %1482 = vst [vmem:[%s2188_s2 + $0x3a8] sm:$0xff] %v772_v39  ;;  %1484 = vst [vmem:[%s2188_s2 + $0x3b8] sm:$0xff] %v965_v40 }
 0x15a   :  { %v776_v41 = vpop.f32.mrf.mxu0  ;;  %v969_v42 = vpop.f32.mrf.mxu1 }
 0x15b   :  { %1485 = vst [vmem:[%s2188_s2 + $0x3c0] sm:$0xff] %v776_v41  ;;  %1487 = vst [vmem:[%s2188_s2 + $0x3d0] sm:$0xff] %v969_v42 }
 0x15c   :  { %v778_v43 = vpop.f32.mrf.mxu0  ;;  %v971_v44 = vpop.f32.mrf.mxu1 }
 0x15d   :  { %1486 = vst [vmem:[%s2188_s2 + $0x3c8] sm:$0xff] %v778_v43  ;;  %1488 = vst [vmem:[%s2188_s2 + $0x3d8] sm:$0xff] %v971_v44 }
 0x15e   :  { %v780_v45 = vpop.f32.mrf.mxu0  ;;  %v973_v46 = vpop.f32.mrf.mxu1 }
 0x15f   :  { %1489 = vst [vmem:[%s2188_s2 + $0x3e0] sm:$0xff] %v780_v45  ;;  %1491 = vst [vmem:[%s2188_s2 + $0x3f0] sm:$0xff] %v973_v46 }
 0x160   :  { %v782_v47 = vpop.f32.mrf.mxu0  ;;  %v975_v48 = vpop.f32.mrf.mxu1 }
 0x161   :  { %1490 = vst [vmem:[%s2188_s2 + $0x3e8] sm:$0xff] %v782_v47  ;;  %1492 = vst [vmem:[%s2188_s2 + $0x3f8] sm:$0xff] %v975_v48 }

</bundles_post_ra>
